<compile_context>
chip_gen: v5e
topology: v5e:2x2
jax: 0.10.0
libtpu: 0.0.40
codegen_flags: <defaults>
</compile_context>

<pallas_src>
import math
import functools

import jax
import jax.numpy as jnp
from jax.experimental import pallas as pl
from jax.experimental.pallas import tpu as pltpu


def transformer_lm_kernel(
    ids_ref, emb_ref, pe_ref,
    ipw_ref, ipb_ref, opw_ref, opb_ref,
    ln1w_ref, ln1b_ref, ln2w_ref, ln2b_ref,
    w1_ref, b1_ref, w2_ref, b2_ref,
    fcw_ref, fcb_ref,
    out_ref,
    *, B, S, D, H, L,
):
    N = B * S
    V = emb_ref.shape[0]
    Hd = D // H
    bf16 = jnp.bfloat16

    # --- embedding lookup as one-hot @ table (bf16 inputs, f32 accumulate) ---
    # TODO(synk): at real vocab sizes replace the one-hot matmul with a
    # scalar-prefetch driven gather and tile the LM head over V.
    ids = ids_ref[...]                                        # (N, 1) int32
    iota = jax.lax.broadcasted_iota(jnp.int32, (N, V), 1)
    onehot = (iota == ids).astype(bf16)                       # (N, V)
    x = jnp.dot(onehot, emb_ref[...], preferred_element_type=jnp.float32)
    x = x * math.sqrt(D)
    x = x + jnp.tile(pe_ref[...], (B, 1))                     # broadcast pe over batch
    # dropout omitted (eval-mode forward, p has no effect).

    def layernorm(t, w, b):
        mu = jnp.mean(t, axis=-1, keepdims=True)
        tc = t - mu
        var = jnp.mean(tc * tc, axis=-1, keepdims=True)
        return tc * jax.lax.rsqrt(var + 1e-5) * w + b

    for l in range(L):                       # static unroll, L = 2
        # --- multi-head self attention (post-norm encoder layer) ----------
        # 1/sqrt(Hd) already folded into the Q columns of ipw/ipb glue-side.
        qkv = jnp.dot(x.astype(bf16), ipw_ref[l],
                      preferred_element_type=jnp.float32) + ipb_ref[l]
        q = qkv[:, :D].astype(bf16)
        k = qkv[:, D:2 * D].astype(bf16)
        v = qkv[:, 2 * D:].astype(bf16)

        attn_rows = []
        for b in range(B):                   # static unroll over batch
            rs = slice(b * S, (b + 1) * S)
            head_outs = []
            for h in range(H):               # static unroll over heads
                cs = slice(h * Hd, (h + 1) * Hd)
                qh = q[rs, cs]
                kh = k[rs, cs]
                vh = v[rs, cs]
                s = jnp.einsum('qd,kd->qk', qh, kh,
                               preferred_element_type=jnp.float32)
                s = s - jnp.max(s, axis=-1, keepdims=True)
                p = jnp.exp(s)
                p = p * pl.reciprocal(jnp.sum(p, axis=-1, keepdims=True),
                                      approx=True)
                head_outs.append(jnp.dot(p.astype(bf16), vh,
                                         preferred_element_type=jnp.float32))
            attn_rows.append(jnp.concatenate(head_outs, axis=-1))   # (S, D)
        attn = jnp.concatenate(attn_rows, axis=0)                   # (N, D)
        attn = jnp.dot(attn.astype(bf16), opw_ref[l],
                       preferred_element_type=jnp.float32) + opb_ref[l]
        x = layernorm(x + attn, ln1w_ref[l], ln1b_ref[l])

        # --- feed-forward --------------------------------------------------
        ff = jnp.maximum(
            jnp.dot(x.astype(bf16), w1_ref[l],
                    preferred_element_type=jnp.float32) + b1_ref[l],
            0.0)
        ff = jnp.dot(ff.astype(bf16), w2_ref[l],
                     preferred_element_type=jnp.float32) + b2_ref[l]
        x = layernorm(x + ff, ln2w_ref[l], ln2b_ref[l])

    # --- LM head (lane-dense (N, V) output) ---------------------------------
    out_ref[...] = jnp.dot(x.astype(bf16), fcw_ref[...],
                           preferred_element_type=jnp.float32) + fcb_ref[...]


def transformer_lm_forward(src, params, *, B, S, D, H, L, V, FF):
    N = B * S
    Hd = D // H
    bf16 = jnp.bfloat16

    # Fold the attention scale into the Q third of the in-projection (glue-side),
    # then cast matmul weights to bf16; biases / LN params / pe stay f32.
    scale_cols = jnp.concatenate(
        [jnp.full((D,), 1.0 / math.sqrt(Hd), jnp.float32),
         jnp.ones((2 * D,), jnp.float32)])
    ipw = (params['ipw'] * scale_cols).astype(bf16)     # (L, D, 3D)
    ipb = params['ipb'] * scale_cols                    # (L, 1, 3D) f32

    ids = src.reshape(N, 1).astype(jnp.int32)
    # TODO(synk): at scale, pass ids via scalar-prefetch (SMEM) to drive a
    # gather-based embedding instead of the VMEM one-hot path.
    inputs = [
        ids,
        params['emb'].astype(bf16), params['pe'],
        ipw, ipb,
        params['opw'].astype(bf16), params['opb'],
        params['ln1w'], params['ln1b'], params['ln2w'], params['ln2b'],
        params['w1'].astype(bf16), params['b1'],
        params['w2'].astype(bf16), params['b2'],
        params['fcw'].astype(bf16), params['fcb'],
    ]
    kernel = functools.partial(transformer_lm_kernel, B=B, S=S, D=D, H=H, L=L)

    # Rough advisory cost: ~10.5 MFLOP of matmuls, ~2k transcendentals,
    # ~0.7 MB of params/activations moved.
    cost = pl.CostEstimate(flops=10_500_000, transcendentals=2_048,
                           bytes_accessed=700_000)

    # TODO(synk): for v7x at larger N, add a row grid with
    # dimension_semantics=("parallel",) so both TensorCores get work.
    out = pl.pallas_call(
        kernel,
        out_shape=jax.ShapeDtypeStruct((N, V), jnp.float32),
        in_specs=[pl.BlockSpec(memory_space=pltpu.MemorySpace.VMEM)] * len(inputs),
        out_specs=pl.BlockSpec(memory_space=pltpu.MemorySpace.VMEM),
        cost_estimate=cost,
    )(*inputs)
    return out.reshape(B, S, V)


def init_params(key, *, V, D, FF, L, S, B):
    ks = jax.random.split(key, 11)

    def nrm(k, shape, scale=0.02):
        return (scale * jax.random.normal(k, shape)).astype(jnp.float32)

    params = {}
    params['emb'] = nrm(ks[0], (V, D), 1.0)            # nn.Embedding ~ N(0, 1)

    # sinusoidal positional encoding, first S rows only, shape (S, D)
    position = jnp.arange(S, dtype=jnp.float32)[:, None]
    div_term = jnp.exp(jnp.arange(0, D, 2, dtype=jnp.float32) *
                       (-math.log(10000.0) / D))
    pe = jnp.zeros((S, D), jnp.float32)
    pe = pe.at[:, 0::2].set(jnp.sin(position * div_term))
    pe = pe.at[:, 1::2].set(jnp.cos(position * div_term))
    params['pe'] = pe                                   # (S, D)

    # per-layer weights, pre-transposed so kernel does x @ W
    params['ipw'] = nrm(ks[1], (L, D, 3 * D))           # in_proj_weight.T
    params['ipb'] = nrm(ks[2], (L, 1, 3 * D))
    params['opw'] = nrm(ks[3], (L, D, D))               # out_proj.weight.T
    params['opb'] = nrm(ks[4], (L, 1, D))
    params['ln1w'] = jnp.ones((L, 1, D), jnp.float32)
    params['ln1b'] = jnp.zeros((L, 1, D), jnp.float32)
    params['ln2w'] = jnp.ones((L, 1, D), jnp.float32)
    params['ln2b'] = jnp.zeros((L, 1, D), jnp.float32)
    params['w1'] = nrm(ks[5], (L, D, FF))               # linear1.weight.T
    params['b1'] = nrm(ks[6], (L, 1, FF))
    params['w2'] = nrm(ks[7], (L, FF, D))               # linear2.weight.T
    params['b2'] = nrm(ks[8], (L, 1, D))
    params['fcw'] = nrm(ks[9], (D, V))                  # fc_out.weight.T
    params['fcb'] = nrm(ks[10], (1, V))
    return params


def reference_forward(src, prm, *, B, S, D, H, L, V, FF):
    """Pure-JAX f32 mirror of the PyTorch eval-mode forward (same params)."""
    Hd = D // H
    N = B * S

    def ln(t, w, b):
        mu = jnp.mean(t, axis=-1, keepdims=True)
        tc = t - mu
        var = jnp.mean(tc * tc, axis=-1, keepdims=True)
        return tc * jax.lax.rsqrt(var + 1e-5) * w + b

    x = prm['emb'][src] * math.sqrt(D)                  # (B, S, D)
    x = x + prm['pe'][None, :, :]
    x = x.reshape(N, D)
    for l in range(L):
        qkv = x @ prm['ipw'][l] + prm['ipb'][l]
        q, k, v = qkv[:, :D], qkv[:, D:2 * D], qkv[:, 2 * D:]
        attn = jnp.zeros((N, D), jnp.float32)
        for b in range(B):
            rs = slice(b * S, (b + 1) * S)
            for h in range(H):
                cs = slice(h * Hd, (h + 1) * Hd)
                qh = q[rs, cs] / math.sqrt(Hd)
                sc = qh @ k[rs, cs].T
                pr = jax.nn.softmax(sc, axis=-1)
                attn = attn.at[rs, cs].set(pr @ v[rs, cs])
        attn = attn @ prm['opw'][l] + prm['opb'][l]
        x = ln(x + attn, prm['ln1w'][l], prm['ln1b'][l])
        ff = jax.nn.relu(x @ prm['w1'][l] + prm['b1'][l]) @ prm['w2'][l] + prm['b2'][l]
        x = ln(x + ff, prm['ln2w'][l], prm['ln2b'][l])
    logits = x @ prm['fcw'] + prm['fcb']
    return logits.reshape(B, S, V)


if __name__ == "__main__":
    # small shapes consistent with the module defaults
    B, S = 2, 8
    V, D, H, L, FF = 128, 128, 4, 2, 256

    key = jax.random.PRNGKey(0)
    kp, kd = jax.random.split(key)
    params = init_params(kp, V=V, D=D, FF=FF, L=L, S=S, B=B)
    src = jax.random.randint(kd, (B, S), 0, V, dtype=jnp.int32)

    logits = transformer_lm_forward(src, params, B=B, S=S, D=D, H=H, L=L, V=V, FF=FF)
    jax.block_until_ready(logits)

    ref = reference_forward(src, params, B=B, S=S, D=D, H=H, L=L, V=V, FF=FF)
    assert logits.shape == (B, S, V)
    err = float(jnp.max(jnp.abs(logits - ref)))
    # bf16 matmul inputs in the kernel vs f32 reference -> slightly looser tol
    assert jnp.allclose(logits, ref, atol=2e-2, rtol=2e-2), err

    print("KERNEL_OK")
</pallas_src>

<mosaic_0001>
module attributes {stable_mosaic.version = 11 : i64} {
  func.func @transformer_lm_kernel(%arg0: memref<16x1xi32, #tpu.memory_space<vmem>>, %arg1: memref<128x128xbf16, #tpu.memory_space<vmem>>, %arg2: memref<8x128xf32, #tpu.memory_space<vmem>>, %arg3: memref<2x128x384xbf16, #tpu.memory_space<vmem>>, %arg4: memref<2x1x384xf32, #tpu.memory_space<vmem>>, %arg5: memref<2x128x128xbf16, #tpu.memory_space<vmem>>, %arg6: memref<2x1x128xf32, #tpu.memory_space<vmem>>, %arg7: memref<2x1x128xf32, #tpu.memory_space<vmem>>, %arg8: memref<2x1x128xf32, #tpu.memory_space<vmem>>, %arg9: memref<2x1x128xf32, #tpu.memory_space<vmem>>, %arg10: memref<2x1x128xf32, #tpu.memory_space<vmem>>, %arg11: memref<2x128x256xbf16, #tpu.memory_space<vmem>>, %arg12: memref<2x1x256xf32, #tpu.memory_space<vmem>>, %arg13: memref<2x256x128xbf16, #tpu.memory_space<vmem>>, %arg14: memref<2x1x128xf32, #tpu.memory_space<vmem>>, %arg15: memref<128x128xbf16, #tpu.memory_space<vmem>>, %arg16: memref<1x128xf32, #tpu.memory_space<vmem>>, %arg17: memref<16x128xf32, #tpu.memory_space<vmem>>) attributes {dimension_semantics = [], scalar_prefetch = 0 : i64, scratch_operands = 0 : i64, tpu.core_type = #tpu.core_type<tc>} {
    %c0 = arith.constant 0 : index
    %c0_0 = arith.constant 0 : index
    %0 = vector.load %arg0[%c0, %c0_0] : memref<16x1xi32, #tpu.memory_space<vmem>>, vector<16x1xi32>
    %1 = tpu.iota {dimensions = array<i32: 1>} : vector<16x128xi32>
    %2 = vector.broadcast %0 : vector<16x1xi32> to vector<16x128xi32>
    %3 = arith.cmpi eq, %1, %2 : vector<16x128xi32>
    %4 = arith.extui %3 : vector<16x128xi1> to vector<16x128xi32>
    %5 = arith.sitofp %4 : vector<16x128xi32> to vector<16x128xf32>
    %6 = arith.truncf %5 : vector<16x128xf32> to vector<16x128xbf16>
    %c0_1 = arith.constant 0 : index
    %c0_2 = arith.constant 0 : index
    %7 = vector.load %arg1[%c0_1, %c0_2] : memref<128x128xbf16, #tpu.memory_space<vmem>>, vector<128x128xbf16>
    %cst = arith.constant dense<0.000000e+00> : vector<16x128xf32>
    %8 = tpu.matmul %6, %7, %cst {dimension_numbers = #tpu.dot_dimension_numbers<[1], [0], [0], [1], [0, 0, 1, 1], [], []>} : vector<16x128xbf16>, vector<128x128xbf16>, vector<16x128xf32> -> vector<16x128xf32>
    %cst_3 = arith.constant 11.3137083 : f32
    %9 = vector.broadcast %cst_3 : f32 to vector<16x128xf32>
    %10 = arith.mulf %8, %9 : vector<16x128xf32>
    %c0_4 = arith.constant 0 : index
    %c0_5 = arith.constant 0 : index
    %11 = vector.load %arg2[%c0_4, %c0_5] : memref<8x128xf32, #tpu.memory_space<vmem>>, vector<8x128xf32>
    %12 = tpu.concatenate %11, %11 in 0 : vector<8x128xf32>, vector<8x128xf32> -> vector<16x128xf32>
    %13 = arith.addf %10, %12 : vector<16x128xf32>
    %14 = arith.truncf %13 : vector<16x128xf32> to vector<16x128xbf16>
    %c0_6 = arith.constant 0 : index
    %c0_7 = arith.constant 0 : index
    %c0_8 = arith.constant 0 : index
    %15 = vector.load %arg3[%c0_6, %c0_7, %c0_8] : memref<2x128x384xbf16, #tpu.memory_space<vmem>>, vector<1x128x384xbf16>
    %16 = vector.shape_cast %15 : vector<1x128x384xbf16> to vector<128x384xbf16>
    %cst_9 = arith.constant dense<0.000000e+00> : vector<16x384xf32>
    %17 = tpu.matmul %14, %16, %cst_9 {dimension_numbers = #tpu.dot_dimension_numbers<[1], [0], [0], [1], [0, 0, 1, 1], [], []>} : vector<16x128xbf16>, vector<128x384xbf16>, vector<16x384xf32> -> vector<16x384xf32>
    %c0_10 = arith.constant 0 : index
    %c0_11 = arith.constant 0 : index
    %c0_12 = arith.constant 0 : index
    %18 = vector.load %arg4[%c0_10, %c0_11, %c0_12] : memref<2x1x384xf32, #tpu.memory_space<vmem>>, vector<1x1x384xf32>
    %19 = vector.shape_cast %18 : vector<1x1x384xf32> to vector<1x384xf32>
    %20 = vector.broadcast %19 : vector<1x384xf32> to vector<16x384xf32>
    %21 = arith.addf %17, %20 : vector<16x384xf32>
    %22 = vector.extract_strided_slice %21 {offsets = [0, 0], sizes = [16, 128], strides = [1, 1]} : vector<16x384xf32> to vector<16x128xf32>
    %23 = arith.truncf %22 : vector<16x128xf32> to vector<16x128xbf16>
    %24 = vector.extract_strided_slice %21 {offsets = [0, 128], sizes = [16, 128], strides = [1, 1]} : vector<16x384xf32> to vector<16x128xf32>
    %25 = arith.truncf %24 : vector<16x128xf32> to vector<16x128xbf16>
    %26 = vector.extract_strided_slice %21 {offsets = [0, 256], sizes = [16, 128], strides = [1, 1]} : vector<16x384xf32> to vector<16x128xf32>
    %27 = arith.truncf %26 : vector<16x128xf32> to vector<16x128xbf16>
    %28 = vector.extract_strided_slice %23 {offsets = [0, 0], sizes = [8, 32], strides = [1, 1]} : vector<16x128xbf16> to vector<8x32xbf16>
    %29 = vector.extract_strided_slice %25 {offsets = [0, 0], sizes = [8, 32], strides = [1, 1]} : vector<16x128xbf16> to vector<8x32xbf16>
    %30 = vector.extract_strided_slice %27 {offsets = [0, 0], sizes = [8, 32], strides = [1, 1]} : vector<16x128xbf16> to vector<8x32xbf16>
    "tpu.trace_start"() <{level = 10 : i32, message = "qd,kd->qk"}> : () -> ()
    %cst_13 = arith.constant dense<0.000000e+00> : vector<8x8xf32>
    %31 = tpu.matmul %28, %29, %cst_13 {dimension_numbers = #tpu.dot_dimension_numbers<[1], [1], [0], [0], [0, 0, 1, 0], [], []>} : vector<8x32xbf16>, vector<8x32xbf16>, vector<8x8xf32> -> vector<8x8xf32>
    "tpu.trace_stop"() : () -> ()
    %cst_14 = arith.constant dense<0xFF800000> : vector<8xf32>
    %32 = vector.multi_reduction <maximumf>, %31, %cst_14 [1] : vector<8x8xf32> to vector<8xf32>
    %33 = vector.shape_cast %32 : vector<8xf32> to vector<8x1xf32>
    %34 = vector.broadcast %33 : vector<8x1xf32> to vector<8x8xf32>
    %35 = arith.subf %31, %34 : vector<8x8xf32>
    %36 = math.exp %35 : vector<8x8xf32>
    %cst_15 = arith.constant dense<0.000000e+00> : vector<8xf32>
    %37 = vector.multi_reduction <add>, %36, %cst_15 [1] : vector<8x8xf32> to vector<8xf32>
    %38 = vector.shape_cast %37 : vector<8xf32> to vector<8x1xf32>
    %39 = tpu.reciprocal %38 {approx = true} : vector<8x1xf32> -> vector<8x1xf32>
    %40 = vector.broadcast %39 : vector<8x1xf32> to vector<8x8xf32>
    %41 = arith.mulf %36, %40 : vector<8x8xf32>
    %42 = arith.truncf %41 : vector<8x8xf32> to vector<8x8xbf16>
    %cst_16 = arith.constant dense<0.000000e+00> : vector<8x32xf32>
    %43 = tpu.matmul %42, %30, %cst_16 {dimension_numbers = #tpu.dot_dimension_numbers<[1], [0], [0], [1], [0, 0, 1, 1], [], []>} : vector<8x8xbf16>, vector<8x32xbf16>, vector<8x32xf32> -> vector<8x32xf32>
    %44 = vector.extract_strided_slice %23 {offsets = [0, 32], sizes = [8, 32], strides = [1, 1]} : vector<16x128xbf16> to vector<8x32xbf16>
    %45 = vector.extract_strided_slice %25 {offsets = [0, 32], sizes = [8, 32], strides = [1, 1]} : vector<16x128xbf16> to vector<8x32xbf16>
    %46 = vector.extract_strided_slice %27 {offsets = [0, 32], sizes = [8, 32], strides = [1, 1]} : vector<16x128xbf16> to vector<8x32xbf16>
    "tpu.trace_start"() <{level = 10 : i32, message = "qd,kd->qk"}> : () -> ()
    %cst_17 = arith.constant dense<0.000000e+00> : vector<8x8xf32>
    %47 = tpu.matmul %44, %45, %cst_17 {dimension_numbers = #tpu.dot_dimension_numbers<[1], [1], [0], [0], [0, 0, 1, 0], [], []>} : vector<8x32xbf16>, vector<8x32xbf16>, vector<8x8xf32> -> vector<8x8xf32>
    "tpu.trace_stop"() : () -> ()
    %cst_18 = arith.constant dense<0xFF800000> : vector<8xf32>
    %48 = vector.multi_reduction <maximumf>, %47, %cst_18 [1] : vector<8x8xf32> to vector<8xf32>
    %49 = vector.shape_cast %48 : vector<8xf32> to vector<8x1xf32>
    %50 = vector.broadcast %49 : vector<8x1xf32> to vector<8x8xf32>
    %51 = arith.subf %47, %50 : vector<8x8xf32>
    %52 = math.exp %51 : vector<8x8xf32>
    %cst_19 = arith.constant dense<0.000000e+00> : vector<8xf32>
    %53 = vector.multi_reduction <add>, %52, %cst_19 [1] : vector<8x8xf32> to vector<8xf32>
    %54 = vector.shape_cast %53 : vector<8xf32> to vector<8x1xf32>
    %55 = tpu.reciprocal %54 {approx = true} : vector<8x1xf32> -> vector<8x1xf32>
    %56 = vector.broadcast %55 : vector<8x1xf32> to vector<8x8xf32>
    %57 = arith.mulf %52, %56 : vector<8x8xf32>
    %58 = arith.truncf %57 : vector<8x8xf32> to vector<8x8xbf16>
    %cst_20 = arith.constant dense<0.000000e+00> : vector<8x32xf32>
    %59 = tpu.matmul %58, %46, %cst_20 {dimension_numbers = #tpu.dot_dimension_numbers<[1], [0], [0], [1], [0, 0, 1, 1], [], []>} : vector<8x8xbf16>, vector<8x32xbf16>, vector<8x32xf32> -> vector<8x32xf32>
    %60 = vector.extract_strided_slice %23 {offsets = [0, 64], sizes = [8, 32], strides = [1, 1]} : vector<16x128xbf16> to vector<8x32xbf16>
    %61 = vector.extract_strided_slice %25 {offsets = [0, 64], sizes = [8, 32], strides = [1, 1]} : vector<16x128xbf16> to vector<8x32xbf16>
    %62 = vector.extract_strided_slice %27 {offsets = [0, 64], sizes = [8, 32], strides = [1, 1]} : vector<16x128xbf16> to vector<8x32xbf16>
    "tpu.trace_start"() <{level = 10 : i32, message = "qd,kd->qk"}> : () -> ()
    %cst_21 = arith.constant dense<0.000000e+00> : vector<8x8xf32>
    %63 = tpu.matmul %60, %61, %cst_21 {dimension_numbers = #tpu.dot_dimension_numbers<[1], [1], [0], [0], [0, 0, 1, 0], [], []>} : vector<8x32xbf16>, vector<8x32xbf16>, vector<8x8xf32> -> vector<8x8xf32>
    "tpu.trace_stop"() : () -> ()
    %cst_22 = arith.constant dense<0xFF800000> : vector<8xf32>
    %64 = vector.multi_reduction <maximumf>, %63, %cst_22 [1] : vector<8x8xf32> to vector<8xf32>
    %65 = vector.shape_cast %64 : vector<8xf32> to vector<8x1xf32>
    %66 = vector.broadcast %65 : vector<8x1xf32> to vector<8x8xf32>
    %67 = arith.subf %63, %66 : vector<8x8xf32>
    %68 = math.exp %67 : vector<8x8xf32>
    %cst_23 = arith.constant dense<0.000000e+00> : vector<8xf32>
    %69 = vector.multi_reduction <add>, %68, %cst_23 [1] : vector<8x8xf32> to vector<8xf32>
    %70 = vector.shape_cast %69 : vector<8xf32> to vector<8x1xf32>
    %71 = tpu.reciprocal %70 {approx = true} : vector<8x1xf32> -> vector<8x1xf32>
    %72 = vector.broadcast %71 : vector<8x1xf32> to vector<8x8xf32>
    %73 = arith.mulf %68, %72 : vector<8x8xf32>
    %74 = arith.truncf %73 : vector<8x8xf32> to vector<8x8xbf16>
    %cst_24 = arith.constant dense<0.000000e+00> : vector<8x32xf32>
    %75 = tpu.matmul %74, %62, %cst_24 {dimension_numbers = #tpu.dot_dimension_numbers<[1], [0], [0], [1], [0, 0, 1, 1], [], []>} : vector<8x8xbf16>, vector<8x32xbf16>, vector<8x32xf32> -> vector<8x32xf32>
    %76 = vector.extract_strided_slice %23 {offsets = [0, 96], sizes = [8, 32], strides = [1, 1]} : vector<16x128xbf16> to vector<8x32xbf16>
    %77 = vector.extract_strided_slice %25 {offsets = [0, 96], sizes = [8, 32], strides = [1, 1]} : vector<16x128xbf16> to vector<8x32xbf16>
    %78 = vector.extract_strided_slice %27 {offsets = [0, 96], sizes = [8, 32], strides = [1, 1]} : vector<16x128xbf16> to vector<8x32xbf16>
    "tpu.trace_start"() <{level = 10 : i32, message = "qd,kd->qk"}> : () -> ()
    %cst_25 = arith.constant dense<0.000000e+00> : vector<8x8xf32>
    %79 = tpu.matmul %76, %77, %cst_25 {dimension_numbers = #tpu.dot_dimension_numbers<[1], [1], [0], [0], [0, 0, 1, 0], [], []>} : vector<8x32xbf16>, vector<8x32xbf16>, vector<8x8xf32> -> vector<8x8xf32>
    "tpu.trace_stop"() : () -> ()
    %cst_26 = arith.constant dense<0xFF800000> : vector<8xf32>
    %80 = vector.multi_reduction <maximumf>, %79, %cst_26 [1] : vector<8x8xf32> to vector<8xf32>
    %81 = vector.shape_cast %80 : vector<8xf32> to vector<8x1xf32>
    %82 = vector.broadcast %81 : vector<8x1xf32> to vector<8x8xf32>
    %83 = arith.subf %79, %82 : vector<8x8xf32>
    %84 = math.exp %83 : vector<8x8xf32>
    %cst_27 = arith.constant dense<0.000000e+00> : vector<8xf32>
    %85 = vector.multi_reduction <add>, %84, %cst_27 [1] : vector<8x8xf32> to vector<8xf32>
    %86 = vector.shape_cast %85 : vector<8xf32> to vector<8x1xf32>
    %87 = tpu.reciprocal %86 {approx = true} : vector<8x1xf32> -> vector<8x1xf32>
    %88 = vector.broadcast %87 : vector<8x1xf32> to vector<8x8xf32>
    %89 = arith.mulf %84, %88 : vector<8x8xf32>
    %90 = arith.truncf %89 : vector<8x8xf32> to vector<8x8xbf16>
    %cst_28 = arith.constant dense<0.000000e+00> : vector<8x32xf32>
    %91 = tpu.matmul %90, %78, %cst_28 {dimension_numbers = #tpu.dot_dimension_numbers<[1], [0], [0], [1], [0, 0, 1, 1], [], []>} : vector<8x8xbf16>, vector<8x32xbf16>, vector<8x32xf32> -> vector<8x32xf32>
    %92 = tpu.concatenate %43, %59, %75, %91 in 1 : vector<8x32xf32>, vector<8x32xf32>, vector<8x32xf32>, vector<8x32xf32> -> vector<8x128xf32>
    %93 = vector.extract_strided_slice %23 {offsets = [8, 0], sizes = [8, 32], strides = [1, 1]} : vector<16x128xbf16> to vector<8x32xbf16>
    %94 = vector.extract_strided_slice %25 {offsets = [8, 0], sizes = [8, 32], strides = [1, 1]} : vector<16x128xbf16> to vector<8x32xbf16>
    %95 = vector.extract_strided_slice %27 {offsets = [8, 0], sizes = [8, 32], strides = [1, 1]} : vector<16x128xbf16> to vector<8x32xbf16>
    "tpu.trace_start"() <{level = 10 : i32, message = "qd,kd->qk"}> : () -> ()
    %cst_29 = arith.constant dense<0.000000e+00> : vector<8x8xf32>
    %96 = tpu.matmul %93, %94, %cst_29 {dimension_numbers = #tpu.dot_dimension_numbers<[1], [1], [0], [0], [0, 0, 1, 0], [], []>} : vector<8x32xbf16>, vector<8x32xbf16>, vector<8x8xf32> -> vector<8x8xf32>
    "tpu.trace_stop"() : () -> ()
    %cst_30 = arith.constant dense<0xFF800000> : vector<8xf32>
    %97 = vector.multi_reduction <maximumf>, %96, %cst_30 [1] : vector<8x8xf32> to vector<8xf32>
    %98 = vector.shape_cast %97 : vector<8xf32> to vector<8x1xf32>
    %99 = vector.broadcast %98 : vector<8x1xf32> to vector<8x8xf32>
    %100 = arith.subf %96, %99 : vector<8x8xf32>
    %101 = math.exp %100 : vector<8x8xf32>
    %cst_31 = arith.constant dense<0.000000e+00> : vector<8xf32>
    %102 = vector.multi_reduction <add>, %101, %cst_31 [1] : vector<8x8xf32> to vector<8xf32>
    %103 = vector.shape_cast %102 : vector<8xf32> to vector<8x1xf32>
    %104 = tpu.reciprocal %103 {approx = true} : vector<8x1xf32> -> vector<8x1xf32>
    %105 = vector.broadcast %104 : vector<8x1xf32> to vector<8x8xf32>
    %106 = arith.mulf %101, %105 : vector<8x8xf32>
    %107 = arith.truncf %106 : vector<8x8xf32> to vector<8x8xbf16>
    %cst_32 = arith.constant dense<0.000000e+00> : vector<8x32xf32>
    %108 = tpu.matmul %107, %95, %cst_32 {dimension_numbers = #tpu.dot_dimension_numbers<[1], [0], [0], [1], [0, 0, 1, 1], [], []>} : vector<8x8xbf16>, vector<8x32xbf16>, vector<8x32xf32> -> vector<8x32xf32>
    %109 = vector.extract_strided_slice %23 {offsets = [8, 32], sizes = [8, 32], strides = [1, 1]} : vector<16x128xbf16> to vector<8x32xbf16>
    %110 = vector.extract_strided_slice %25 {offsets = [8, 32], sizes = [8, 32], strides = [1, 1]} : vector<16x128xbf16> to vector<8x32xbf16>
    %111 = vector.extract_strided_slice %27 {offsets = [8, 32], sizes = [8, 32], strides = [1, 1]} : vector<16x128xbf16> to vector<8x32xbf16>
    "tpu.trace_start"() <{level = 10 : i32, message = "qd,kd->qk"}> : () -> ()
    %cst_33 = arith.constant dense<0.000000e+00> : vector<8x8xf32>
    %112 = tpu.matmul %109, %110, %cst_33 {dimension_numbers = #tpu.dot_dimension_numbers<[1], [1], [0], [0], [0, 0, 1, 0], [], []>} : vector<8x32xbf16>, vector<8x32xbf16>, vector<8x8xf32> -> vector<8x8xf32>
    "tpu.trace_stop"() : () -> ()
    %cst_34 = arith.constant dense<0xFF800000> : vector<8xf32>
    %113 = vector.multi_reduction <maximumf>, %112, %cst_34 [1] : vector<8x8xf32> to vector<8xf32>
    %114 = vector.shape_cast %113 : vector<8xf32> to vector<8x1xf32>
    %115 = vector.broadcast %114 : vector<8x1xf32> to vector<8x8xf32>
    %116 = arith.subf %112, %115 : vector<8x8xf32>
    %117 = math.exp %116 : vector<8x8xf32>
    %cst_35 = arith.constant dense<0.000000e+00> : vector<8xf32>
    %118 = vector.multi_reduction <add>, %117, %cst_35 [1] : vector<8x8xf32> to vector<8xf32>
    %119 = vector.shape_cast %118 : vector<8xf32> to vector<8x1xf32>
    %120 = tpu.reciprocal %119 {approx = true} : vector<8x1xf32> -> vector<8x1xf32>
    %121 = vector.broadcast %120 : vector<8x1xf32> to vector<8x8xf32>
    %122 = arith.mulf %117, %121 : vector<8x8xf32>
    %123 = arith.truncf %122 : vector<8x8xf32> to vector<8x8xbf16>
    %cst_36 = arith.constant dense<0.000000e+00> : vector<8x32xf32>
    %124 = tpu.matmul %123, %111, %cst_36 {dimension_numbers = #tpu.dot_dimension_numbers<[1], [0], [0], [1], [0, 0, 1, 1], [], []>} : vector<8x8xbf16>, vector<8x32xbf16>, vector<8x32xf32> -> vector<8x32xf32>
    %125 = vector.extract_strided_slice %23 {offsets = [8, 64], sizes = [8, 32], strides = [1, 1]} : vector<16x128xbf16> to vector<8x32xbf16>
    %126 = vector.extract_strided_slice %25 {offsets = [8, 64], sizes = [8, 32], strides = [1, 1]} : vector<16x128xbf16> to vector<8x32xbf16>
    %127 = vector.extract_strided_slice %27 {offsets = [8, 64], sizes = [8, 32], strides = [1, 1]} : vector<16x128xbf16> to vector<8x32xbf16>
    "tpu.trace_start"() <{level = 10 : i32, message = "qd,kd->qk"}> : () -> ()
    %cst_37 = arith.constant dense<0.000000e+00> : vector<8x8xf32>
    %128 = tpu.matmul %125, %126, %cst_37 {dimension_numbers = #tpu.dot_dimension_numbers<[1], [1], [0], [0], [0, 0, 1, 0], [], []>} : vector<8x32xbf16>, vector<8x32xbf16>, vector<8x8xf32> -> vector<8x8xf32>
    "tpu.trace_stop"() : () -> ()
    %cst_38 = arith.constant dense<0xFF800000> : vector<8xf32>
    %129 = vector.multi_reduction <maximumf>, %128, %cst_38 [1] : vector<8x8xf32> to vector<8xf32>
    %130 = vector.shape_cast %129 : vector<8xf32> to vector<8x1xf32>
    %131 = vector.broadcast %130 : vector<8x1xf32> to vector<8x8xf32>
    %132 = arith.subf %128, %131 : vector<8x8xf32>
    %133 = math.exp %132 : vector<8x8xf32>
    %cst_39 = arith.constant dense<0.000000e+00> : vector<8xf32>
    %134 = vector.multi_reduction <add>, %133, %cst_39 [1] : vector<8x8xf32> to vector<8xf32>
    %135 = vector.shape_cast %134 : vector<8xf32> to vector<8x1xf32>
    %136 = tpu.reciprocal %135 {approx = true} : vector<8x1xf32> -> vector<8x1xf32>
    %137 = vector.broadcast %136 : vector<8x1xf32> to vector<8x8xf32>
    %138 = arith.mulf %133, %137 : vector<8x8xf32>
    %139 = arith.truncf %138 : vector<8x8xf32> to vector<8x8xbf16>
    %cst_40 = arith.constant dense<0.000000e+00> : vector<8x32xf32>
    %140 = tpu.matmul %139, %127, %cst_40 {dimension_numbers = #tpu.dot_dimension_numbers<[1], [0], [0], [1], [0, 0, 1, 1], [], []>} : vector<8x8xbf16>, vector<8x32xbf16>, vector<8x32xf32> -> vector<8x32xf32>
    %141 = vector.extract_strided_slice %23 {offsets = [8, 96], sizes = [8, 32], strides = [1, 1]} : vector<16x128xbf16> to vector<8x32xbf16>
    %142 = vector.extract_strided_slice %25 {offsets = [8, 96], sizes = [8, 32], strides = [1, 1]} : vector<16x128xbf16> to vector<8x32xbf16>
    %143 = vector.extract_strided_slice %27 {offsets = [8, 96], sizes = [8, 32], strides = [1, 1]} : vector<16x128xbf16> to vector<8x32xbf16>
    "tpu.trace_start"() <{level = 10 : i32, message = "qd,kd->qk"}> : () -> ()
    %cst_41 = arith.constant dense<0.000000e+00> : vector<8x8xf32>
    %144 = tpu.matmul %141, %142, %cst_41 {dimension_numbers = #tpu.dot_dimension_numbers<[1], [1], [0], [0], [0, 0, 1, 0], [], []>} : vector<8x32xbf16>, vector<8x32xbf16>, vector<8x8xf32> -> vector<8x8xf32>
    "tpu.trace_stop"() : () -> ()
    %cst_42 = arith.constant dense<0xFF800000> : vector<8xf32>
    %145 = vector.multi_reduction <maximumf>, %144, %cst_42 [1] : vector<8x8xf32> to vector<8xf32>
    %146 = vector.shape_cast %145 : vector<8xf32> to vector<8x1xf32>
    %147 = vector.broadcast %146 : vector<8x1xf32> to vector<8x8xf32>
    %148 = arith.subf %144, %147 : vector<8x8xf32>
    %149 = math.exp %148 : vector<8x8xf32>
    %cst_43 = arith.constant dense<0.000000e+00> : vector<8xf32>
    %150 = vector.multi_reduction <add>, %149, %cst_43 [1] : vector<8x8xf32> to vector<8xf32>
    %151 = vector.shape_cast %150 : vector<8xf32> to vector<8x1xf32>
    %152 = tpu.reciprocal %151 {approx = true} : vector<8x1xf32> -> vector<8x1xf32>
    %153 = vector.broadcast %152 : vector<8x1xf32> to vector<8x8xf32>
    %154 = arith.mulf %149, %153 : vector<8x8xf32>
    %155 = arith.truncf %154 : vector<8x8xf32> to vector<8x8xbf16>
    %cst_44 = arith.constant dense<0.000000e+00> : vector<8x32xf32>
    %156 = tpu.matmul %155, %143, %cst_44 {dimension_numbers = #tpu.dot_dimension_numbers<[1], [0], [0], [1], [0, 0, 1, 1], [], []>} : vector<8x8xbf16>, vector<8x32xbf16>, vector<8x32xf32> -> vector<8x32xf32>
    %157 = tpu.concatenate %108, %124, %140, %156 in 1 : vector<8x32xf32>, vector<8x32xf32>, vector<8x32xf32>, vector<8x32xf32> -> vector<8x128xf32>
    %158 = tpu.concatenate %92, %157 in 0 : vector<8x128xf32>, vector<8x128xf32> -> vector<16x128xf32>
    %159 = arith.truncf %158 : vector<16x128xf32> to vector<16x128xbf16>
    %c0_45 = arith.constant 0 : index
    %c0_46 = arith.constant 0 : index
    %c0_47 = arith.constant 0 : index
    %160 = vector.load %arg5[%c0_45, %c0_46, %c0_47] : memref<2x128x128xbf16, #tpu.memory_space<vmem>>, vector<1x128x128xbf16>
    %161 = vector.shape_cast %160 : vector<1x128x128xbf16> to vector<128x128xbf16>
    %cst_48 = arith.constant dense<0.000000e+00> : vector<16x128xf32>
    %162 = tpu.matmul %159, %161, %cst_48 {dimension_numbers = #tpu.dot_dimension_numbers<[1], [0], [0], [1], [0, 0, 1, 1], [], []>} : vector<16x128xbf16>, vector<128x128xbf16>, vector<16x128xf32> -> vector<16x128xf32>
    %c0_49 = arith.constant 0 : index
    %c0_50 = arith.constant 0 : index
    %c0_51 = arith.constant 0 : index
    %163 = vector.load %arg6[%c0_49, %c0_50, %c0_51] : memref<2x1x128xf32, #tpu.memory_space<vmem>>, vector<1x1x128xf32>
    %164 = vector.shape_cast %163 : vector<1x1x128xf32> to vector<1x128xf32>
    %165 = vector.broadcast %164 : vector<1x128xf32> to vector<16x128xf32>
    %166 = arith.addf %162, %165 : vector<16x128xf32>
    %167 = arith.addf %13, %166 : vector<16x128xf32>
    %c0_52 = arith.constant 0 : index
    %c0_53 = arith.constant 0 : index
    %c0_54 = arith.constant 0 : index
    %168 = vector.load %arg7[%c0_52, %c0_53, %c0_54] : memref<2x1x128xf32, #tpu.memory_space<vmem>>, vector<1x1x128xf32>
    %169 = vector.shape_cast %168 : vector<1x1x128xf32> to vector<1x128xf32>
    %c0_55 = arith.constant 0 : index
    %c0_56 = arith.constant 0 : index
    %c0_57 = arith.constant 0 : index
    %170 = vector.load %arg8[%c0_55, %c0_56, %c0_57] : memref<2x1x128xf32, #tpu.memory_space<vmem>>, vector<1x1x128xf32>
    %171 = vector.shape_cast %170 : vector<1x1x128xf32> to vector<1x128xf32>
    %cst_58 = arith.constant dense<0.000000e+00> : vector<16xf32>
    %172 = vector.multi_reduction <add>, %167, %cst_58 [1] : vector<16x128xf32> to vector<16xf32>
    %173 = vector.shape_cast %172 : vector<16xf32> to vector<16x1xf32>
    %cst_59 = arith.constant 1.280000e+02 : f32
    %174 = vector.broadcast %cst_59 : f32 to vector<16x1xf32>
    %175 = arith.divf %173, %174 : vector<16x1xf32>
    %176 = vector.broadcast %175 : vector<16x1xf32> to vector<16x128xf32>
    %177 = arith.subf %167, %176 : vector<16x128xf32>
    %178 = arith.mulf %177, %177 : vector<16x128xf32>
    %cst_60 = arith.constant dense<0.000000e+00> : vector<16xf32>
    %179 = vector.multi_reduction <add>, %178, %cst_60 [1] : vector<16x128xf32> to vector<16xf32>
    %180 = vector.shape_cast %179 : vector<16xf32> to vector<16x1xf32>
    %cst_61 = arith.constant 1.280000e+02 : f32
    %181 = vector.broadcast %cst_61 : f32 to vector<16x1xf32>
    %182 = arith.divf %180, %181 : vector<16x1xf32>
    %cst_62 = arith.constant 9.99999974E-6 : f32
    %183 = vector.broadcast %cst_62 : f32 to vector<16x1xf32>
    %184 = arith.addf %182, %183 : vector<16x1xf32>
    %185 = math.rsqrt %184 : vector<16x1xf32>
    %186 = vector.broadcast %185 : vector<16x1xf32> to vector<16x128xf32>
    %187 = arith.mulf %177, %186 : vector<16x128xf32>
    %188 = vector.broadcast %169 : vector<1x128xf32> to vector<16x128xf32>
    %189 = arith.mulf %187, %188 : vector<16x128xf32>
    %190 = vector.broadcast %171 : vector<1x128xf32> to vector<16x128xf32>
    %191 = arith.addf %189, %190 : vector<16x128xf32>
    %192 = arith.truncf %191 : vector<16x128xf32> to vector<16x128xbf16>
    %c0_63 = arith.constant 0 : index
    %c0_64 = arith.constant 0 : index
    %c0_65 = arith.constant 0 : index
    %193 = vector.load %arg11[%c0_63, %c0_64, %c0_65] : memref<2x128x256xbf16, #tpu.memory_space<vmem>>, vector<1x128x256xbf16>
    %194 = vector.shape_cast %193 : vector<1x128x256xbf16> to vector<128x256xbf16>
    %cst_66 = arith.constant dense<0.000000e+00> : vector<16x256xf32>
    %195 = tpu.matmul %192, %194, %cst_66 {dimension_numbers = #tpu.dot_dimension_numbers<[1], [0], [0], [1], [0, 0, 1, 1], [], []>} : vector<16x128xbf16>, vector<128x256xbf16>, vector<16x256xf32> -> vector<16x256xf32>
    %c0_67 = arith.constant 0 : index
    %c0_68 = arith.constant 0 : index
    %c0_69 = arith.constant 0 : index
    %196 = vector.load %arg12[%c0_67, %c0_68, %c0_69] : memref<2x1x256xf32, #tpu.memory_space<vmem>>, vector<1x1x256xf32>
    %197 = vector.shape_cast %196 : vector<1x1x256xf32> to vector<1x256xf32>
    %198 = vector.broadcast %197 : vector<1x256xf32> to vector<16x256xf32>
    %199 = arith.addf %195, %198 : vector<16x256xf32>
    %cst_70 = arith.constant 0.000000e+00 : f32
    %200 = vector.broadcast %cst_70 : f32 to vector<16x256xf32>
    %201 = arith.maximumf %199, %200 : vector<16x256xf32>
    %202 = arith.truncf %201 : vector<16x256xf32> to vector<16x256xbf16>
    %c0_71 = arith.constant 0 : index
    %c0_72 = arith.constant 0 : index
    %c0_73 = arith.constant 0 : index
    %203 = vector.load %arg13[%c0_71, %c0_72, %c0_73] : memref<2x256x128xbf16, #tpu.memory_space<vmem>>, vector<1x256x128xbf16>
    %204 = vector.shape_cast %203 : vector<1x256x128xbf16> to vector<256x128xbf16>
    %cst_74 = arith.constant dense<0.000000e+00> : vector<16x128xf32>
    %205 = tpu.matmul %202, %204, %cst_74 {dimension_numbers = #tpu.dot_dimension_numbers<[1], [0], [0], [1], [0, 0, 1, 1], [], []>} : vector<16x256xbf16>, vector<256x128xbf16>, vector<16x128xf32> -> vector<16x128xf32>
    %c0_75 = arith.constant 0 : index
    %c0_76 = arith.constant 0 : index
    %c0_77 = arith.constant 0 : index
    %206 = vector.load %arg14[%c0_75, %c0_76, %c0_77] : memref<2x1x128xf32, #tpu.memory_space<vmem>>, vector<1x1x128xf32>
    %207 = vector.shape_cast %206 : vector<1x1x128xf32> to vector<1x128xf32>
    %208 = vector.broadcast %207 : vector<1x128xf32> to vector<16x128xf32>
    %209 = arith.addf %205, %208 : vector<16x128xf32>
    %210 = arith.addf %191, %209 : vector<16x128xf32>
    %c0_78 = arith.constant 0 : index
    %c0_79 = arith.constant 0 : index
    %c0_80 = arith.constant 0 : index
    %211 = vector.load %arg9[%c0_78, %c0_79, %c0_80] : memref<2x1x128xf32, #tpu.memory_space<vmem>>, vector<1x1x128xf32>
    %212 = vector.shape_cast %211 : vector<1x1x128xf32> to vector<1x128xf32>
    %c0_81 = arith.constant 0 : index
    %c0_82 = arith.constant 0 : index
    %c0_83 = arith.constant 0 : index
    %213 = vector.load %arg10[%c0_81, %c0_82, %c0_83] : memref<2x1x128xf32, #tpu.memory_space<vmem>>, vector<1x1x128xf32>
    %214 = vector.shape_cast %213 : vector<1x1x128xf32> to vector<1x128xf32>
    %cst_84 = arith.constant dense<0.000000e+00> : vector<16xf32>
    %215 = vector.multi_reduction <add>, %210, %cst_84 [1] : vector<16x128xf32> to vector<16xf32>
    %216 = vector.shape_cast %215 : vector<16xf32> to vector<16x1xf32>
    %cst_85 = arith.constant 1.280000e+02 : f32
    %217 = vector.broadcast %cst_85 : f32 to vector<16x1xf32>
    %218 = arith.divf %216, %217 : vector<16x1xf32>
    %219 = vector.broadcast %218 : vector<16x1xf32> to vector<16x128xf32>
    %220 = arith.subf %210, %219 : vector<16x128xf32>
    %221 = arith.mulf %220, %220 : vector<16x128xf32>
    %cst_86 = arith.constant dense<0.000000e+00> : vector<16xf32>
    %222 = vector.multi_reduction <add>, %221, %cst_86 [1] : vector<16x128xf32> to vector<16xf32>
    %223 = vector.shape_cast %222 : vector<16xf32> to vector<16x1xf32>
    %cst_87 = arith.constant 1.280000e+02 : f32
    %224 = vector.broadcast %cst_87 : f32 to vector<16x1xf32>
    %225 = arith.divf %223, %224 : vector<16x1xf32>
    %cst_88 = arith.constant 9.99999974E-6 : f32
    %226 = vector.broadcast %cst_88 : f32 to vector<16x1xf32>
    %227 = arith.addf %225, %226 : vector<16x1xf32>
    %228 = math.rsqrt %227 : vector<16x1xf32>
    %229 = vector.broadcast %228 : vector<16x1xf32> to vector<16x128xf32>
    %230 = arith.mulf %220, %229 : vector<16x128xf32>
    %231 = vector.broadcast %212 : vector<1x128xf32> to vector<16x128xf32>
    %232 = arith.mulf %230, %231 : vector<16x128xf32>
    %233 = vector.broadcast %214 : vector<1x128xf32> to vector<16x128xf32>
    %234 = arith.addf %232, %233 : vector<16x128xf32>
    %235 = arith.truncf %234 : vector<16x128xf32> to vector<16x128xbf16>
    %c1 = arith.constant 1 : index
    %c0_89 = arith.constant 0 : index
    %c0_90 = arith.constant 0 : index
    %236 = vector.load %arg3[%c1, %c0_89, %c0_90] : memref<2x128x384xbf16, #tpu.memory_space<vmem>>, vector<1x128x384xbf16>
    %237 = vector.shape_cast %236 : vector<1x128x384xbf16> to vector<128x384xbf16>
    %cst_91 = arith.constant dense<0.000000e+00> : vector<16x384xf32>
    %238 = tpu.matmul %235, %237, %cst_91 {dimension_numbers = #tpu.dot_dimension_numbers<[1], [0], [0], [1], [0, 0, 1, 1], [], []>} : vector<16x128xbf16>, vector<128x384xbf16>, vector<16x384xf32> -> vector<16x384xf32>
    %c1_92 = arith.constant 1 : index
    %c0_93 = arith.constant 0 : index
    %c0_94 = arith.constant 0 : index
    %239 = vector.load %arg4[%c1_92, %c0_93, %c0_94] : memref<2x1x384xf32, #tpu.memory_space<vmem>>, vector<1x1x384xf32>
    %240 = vector.shape_cast %239 : vector<1x1x384xf32> to vector<1x384xf32>
    %241 = vector.broadcast %240 : vector<1x384xf32> to vector<16x384xf32>
    %242 = arith.addf %238, %241 : vector<16x384xf32>
    %243 = vector.extract_strided_slice %242 {offsets = [0, 0], sizes = [16, 128], strides = [1, 1]} : vector<16x384xf32> to vector<16x128xf32>
    %244 = arith.truncf %243 : vector<16x128xf32> to vector<16x128xbf16>
    %245 = vector.extract_strided_slice %242 {offsets = [0, 128], sizes = [16, 128], strides = [1, 1]} : vector<16x384xf32> to vector<16x128xf32>
    %246 = arith.truncf %245 : vector<16x128xf32> to vector<16x128xbf16>
    %247 = vector.extract_strided_slice %242 {offsets = [0, 256], sizes = [16, 128], strides = [1, 1]} : vector<16x384xf32> to vector<16x128xf32>
    %248 = arith.truncf %247 : vector<16x128xf32> to vector<16x128xbf16>
    %249 = vector.extract_strided_slice %244 {offsets = [0, 0], sizes = [8, 32], strides = [1, 1]} : vector<16x128xbf16> to vector<8x32xbf16>
    %250 = vector.extract_strided_slice %246 {offsets = [0, 0], sizes = [8, 32], strides = [1, 1]} : vector<16x128xbf16> to vector<8x32xbf16>
    %251 = vector.extract_strided_slice %248 {offsets = [0, 0], sizes = [8, 32], strides = [1, 1]} : vector<16x128xbf16> to vector<8x32xbf16>
    "tpu.trace_start"() <{level = 10 : i32, message = "qd,kd->qk"}> : () -> ()
    %cst_95 = arith.constant dense<0.000000e+00> : vector<8x8xf32>
    %252 = tpu.matmul %249, %250, %cst_95 {dimension_numbers = #tpu.dot_dimension_numbers<[1], [1], [0], [0], [0, 0, 1, 0], [], []>} : vector<8x32xbf16>, vector<8x32xbf16>, vector<8x8xf32> -> vector<8x8xf32>
    "tpu.trace_stop"() : () -> ()
    %cst_96 = arith.constant dense<0xFF800000> : vector<8xf32>
    %253 = vector.multi_reduction <maximumf>, %252, %cst_96 [1] : vector<8x8xf32> to vector<8xf32>
    %254 = vector.shape_cast %253 : vector<8xf32> to vector<8x1xf32>
    %255 = vector.broadcast %254 : vector<8x1xf32> to vector<8x8xf32>
    %256 = arith.subf %252, %255 : vector<8x8xf32>
    %257 = math.exp %256 : vector<8x8xf32>
    %cst_97 = arith.constant dense<0.000000e+00> : vector<8xf32>
    %258 = vector.multi_reduction <add>, %257, %cst_97 [1] : vector<8x8xf32> to vector<8xf32>
    %259 = vector.shape_cast %258 : vector<8xf32> to vector<8x1xf32>
    %260 = tpu.reciprocal %259 {approx = true} : vector<8x1xf32> -> vector<8x1xf32>
    %261 = vector.broadcast %260 : vector<8x1xf32> to vector<8x8xf32>
    %262 = arith.mulf %257, %261 : vector<8x8xf32>
    %263 = arith.truncf %262 : vector<8x8xf32> to vector<8x8xbf16>
    %cst_98 = arith.constant dense<0.000000e+00> : vector<8x32xf32>
    %264 = tpu.matmul %263, %251, %cst_98 {dimension_numbers = #tpu.dot_dimension_numbers<[1], [0], [0], [1], [0, 0, 1, 1], [], []>} : vector<8x8xbf16>, vector<8x32xbf16>, vector<8x32xf32> -> vector<8x32xf32>
    %265 = vector.extract_strided_slice %244 {offsets = [0, 32], sizes = [8, 32], strides = [1, 1]} : vector<16x128xbf16> to vector<8x32xbf16>
    %266 = vector.extract_strided_slice %246 {offsets = [0, 32], sizes = [8, 32], strides = [1, 1]} : vector<16x128xbf16> to vector<8x32xbf16>
    %267 = vector.extract_strided_slice %248 {offsets = [0, 32], sizes = [8, 32], strides = [1, 1]} : vector<16x128xbf16> to vector<8x32xbf16>
    "tpu.trace_start"() <{level = 10 : i32, message = "qd,kd->qk"}> : () -> ()
    %cst_99 = arith.constant dense<0.000000e+00> : vector<8x8xf32>
    %268 = tpu.matmul %265, %266, %cst_99 {dimension_numbers = #tpu.dot_dimension_numbers<[1], [1], [0], [0], [0, 0, 1, 0], [], []>} : vector<8x32xbf16>, vector<8x32xbf16>, vector<8x8xf32> -> vector<8x8xf32>
    "tpu.trace_stop"() : () -> ()
    %cst_100 = arith.constant dense<0xFF800000> : vector<8xf32>
    %269 = vector.multi_reduction <maximumf>, %268, %cst_100 [1] : vector<8x8xf32> to vector<8xf32>
    %270 = vector.shape_cast %269 : vector<8xf32> to vector<8x1xf32>
    %271 = vector.broadcast %270 : vector<8x1xf32> to vector<8x8xf32>
    %272 = arith.subf %268, %271 : vector<8x8xf32>
    %273 = math.exp %272 : vector<8x8xf32>
    %cst_101 = arith.constant dense<0.000000e+00> : vector<8xf32>
    %274 = vector.multi_reduction <add>, %273, %cst_101 [1] : vector<8x8xf32> to vector<8xf32>
    %275 = vector.shape_cast %274 : vector<8xf32> to vector<8x1xf32>
    %276 = tpu.reciprocal %275 {approx = true} : vector<8x1xf32> -> vector<8x1xf32>
    %277 = vector.broadcast %276 : vector<8x1xf32> to vector<8x8xf32>
    %278 = arith.mulf %273, %277 : vector<8x8xf32>
    %279 = arith.truncf %278 : vector<8x8xf32> to vector<8x8xbf16>
    %cst_102 = arith.constant dense<0.000000e+00> : vector<8x32xf32>
    %280 = tpu.matmul %279, %267, %cst_102 {dimension_numbers = #tpu.dot_dimension_numbers<[1], [0], [0], [1], [0, 0, 1, 1], [], []>} : vector<8x8xbf16>, vector<8x32xbf16>, vector<8x32xf32> -> vector<8x32xf32>
    %281 = vector.extract_strided_slice %244 {offsets = [0, 64], sizes = [8, 32], strides = [1, 1]} : vector<16x128xbf16> to vector<8x32xbf16>
    %282 = vector.extract_strided_slice %246 {offsets = [0, 64], sizes = [8, 32], strides = [1, 1]} : vector<16x128xbf16> to vector<8x32xbf16>
    %283 = vector.extract_strided_slice %248 {offsets = [0, 64], sizes = [8, 32], strides = [1, 1]} : vector<16x128xbf16> to vector<8x32xbf16>
    "tpu.trace_start"() <{level = 10 : i32, message = "qd,kd->qk"}> : () -> ()
    %cst_103 = arith.constant dense<0.000000e+00> : vector<8x8xf32>
    %284 = tpu.matmul %281, %282, %cst_103 {dimension_numbers = #tpu.dot_dimension_numbers<[1], [1], [0], [0], [0, 0, 1, 0], [], []>} : vector<8x32xbf16>, vector<8x32xbf16>, vector<8x8xf32> -> vector<8x8xf32>
    "tpu.trace_stop"() : () -> ()
    %cst_104 = arith.constant dense<0xFF800000> : vector<8xf32>
    %285 = vector.multi_reduction <maximumf>, %284, %cst_104 [1] : vector<8x8xf32> to vector<8xf32>
    %286 = vector.shape_cast %285 : vector<8xf32> to vector<8x1xf32>
    %287 = vector.broadcast %286 : vector<8x1xf32> to vector<8x8xf32>
    %288 = arith.subf %284, %287 : vector<8x8xf32>
    %289 = math.exp %288 : vector<8x8xf32>
    %cst_105 = arith.constant dense<0.000000e+00> : vector<8xf32>
    %290 = vector.multi_reduction <add>, %289, %cst_105 [1] : vector<8x8xf32> to vector<8xf32>
    %291 = vector.shape_cast %290 : vector<8xf32> to vector<8x1xf32>
    %292 = tpu.reciprocal %291 {approx = true} : vector<8x1xf32> -> vector<8x1xf32>
    %293 = vector.broadcast %292 : vector<8x1xf32> to vector<8x8xf32>
    %294 = arith.mulf %289, %293 : vector<8x8xf32>
    %295 = arith.truncf %294 : vector<8x8xf32> to vector<8x8xbf16>
    %cst_106 = arith.constant dense<0.000000e+00> : vector<8x32xf32>
    %296 = tpu.matmul %295, %283, %cst_106 {dimension_numbers = #tpu.dot_dimension_numbers<[1], [0], [0], [1], [0, 0, 1, 1], [], []>} : vector<8x8xbf16>, vector<8x32xbf16>, vector<8x32xf32> -> vector<8x32xf32>
    %297 = vector.extract_strided_slice %244 {offsets = [0, 96], sizes = [8, 32], strides = [1, 1]} : vector<16x128xbf16> to vector<8x32xbf16>
    %298 = vector.extract_strided_slice %246 {offsets = [0, 96], sizes = [8, 32], strides = [1, 1]} : vector<16x128xbf16> to vector<8x32xbf16>
    %299 = vector.extract_strided_slice %248 {offsets = [0, 96], sizes = [8, 32], strides = [1, 1]} : vector<16x128xbf16> to vector<8x32xbf16>
    "tpu.trace_start"() <{level = 10 : i32, message = "qd,kd->qk"}> : () -> ()
    %cst_107 = arith.constant dense<0.000000e+00> : vector<8x8xf32>
    %300 = tpu.matmul %297, %298, %cst_107 {dimension_numbers = #tpu.dot_dimension_numbers<[1], [1], [0], [0], [0, 0, 1, 0], [], []>} : vector<8x32xbf16>, vector<8x32xbf16>, vector<8x8xf32> -> vector<8x8xf32>
    "tpu.trace_stop"() : () -> ()
    %cst_108 = arith.constant dense<0xFF800000> : vector<8xf32>
    %301 = vector.multi_reduction <maximumf>, %300, %cst_108 [1] : vector<8x8xf32> to vector<8xf32>
    %302 = vector.shape_cast %301 : vector<8xf32> to vector<8x1xf32>
    %303 = vector.broadcast %302 : vector<8x1xf32> to vector<8x8xf32>
    %304 = arith.subf %300, %303 : vector<8x8xf32>
    %305 = math.exp %304 : vector<8x8xf32>
    %cst_109 = arith.constant dense<0.000000e+00> : vector<8xf32>
    %306 = vector.multi_reduction <add>, %305, %cst_109 [1] : vector<8x8xf32> to vector<8xf32>
    %307 = vector.shape_cast %306 : vector<8xf32> to vector<8x1xf32>
    %308 = tpu.reciprocal %307 {approx = true} : vector<8x1xf32> -> vector<8x1xf32>
    %309 = vector.broadcast %308 : vector<8x1xf32> to vector<8x8xf32>
    %310 = arith.mulf %305, %309 : vector<8x8xf32>
    %311 = arith.truncf %310 : vector<8x8xf32> to vector<8x8xbf16>
    %cst_110 = arith.constant dense<0.000000e+00> : vector<8x32xf32>
    %312 = tpu.matmul %311, %299, %cst_110 {dimension_numbers = #tpu.dot_dimension_numbers<[1], [0], [0], [1], [0, 0, 1, 1], [], []>} : vector<8x8xbf16>, vector<8x32xbf16>, vector<8x32xf32> -> vector<8x32xf32>
    %313 = tpu.concatenate %264, %280, %296, %312 in 1 : vector<8x32xf32>, vector<8x32xf32>, vector<8x32xf32>, vector<8x32xf32> -> vector<8x128xf32>
    %314 = vector.extract_strided_slice %244 {offsets = [8, 0], sizes = [8, 32], strides = [1, 1]} : vector<16x128xbf16> to vector<8x32xbf16>
    %315 = vector.extract_strided_slice %246 {offsets = [8, 0], sizes = [8, 32], strides = [1, 1]} : vector<16x128xbf16> to vector<8x32xbf16>
    %316 = vector.extract_strided_slice %248 {offsets = [8, 0], sizes = [8, 32], strides = [1, 1]} : vector<16x128xbf16> to vector<8x32xbf16>
    "tpu.trace_start"() <{level = 10 : i32, message = "qd,kd->qk"}> : () -> ()
    %cst_111 = arith.constant dense<0.000000e+00> : vector<8x8xf32>
    %317 = tpu.matmul %314, %315, %cst_111 {dimension_numbers = #tpu.dot_dimension_numbers<[1], [1], [0], [0], [0, 0, 1, 0], [], []>} : vector<8x32xbf16>, vector<8x32xbf16>, vector<8x8xf32> -> vector<8x8xf32>
    "tpu.trace_stop"() : () -> ()
    %cst_112 = arith.constant dense<0xFF800000> : vector<8xf32>
    %318 = vector.multi_reduction <maximumf>, %317, %cst_112 [1] : vector<8x8xf32> to vector<8xf32>
    %319 = vector.shape_cast %318 : vector<8xf32> to vector<8x1xf32>
    %320 = vector.broadcast %319 : vector<8x1xf32> to vector<8x8xf32>
    %321 = arith.subf %317, %320 : vector<8x8xf32>
    %322 = math.exp %321 : vector<8x8xf32>
    %cst_113 = arith.constant dense<0.000000e+00> : vector<8xf32>
    %323 = vector.multi_reduction <add>, %322, %cst_113 [1] : vector<8x8xf32> to vector<8xf32>
    %324 = vector.shape_cast %323 : vector<8xf32> to vector<8x1xf32>
    %325 = tpu.reciprocal %324 {approx = true} : vector<8x1xf32> -> vector<8x1xf32>
    %326 = vector.broadcast %325 : vector<8x1xf32> to vector<8x8xf32>
    %327 = arith.mulf %322, %326 : vector<8x8xf32>
    %328 = arith.truncf %327 : vector<8x8xf32> to vector<8x8xbf16>
    %cst_114 = arith.constant dense<0.000000e+00> : vector<8x32xf32>
    %329 = tpu.matmul %328, %316, %cst_114 {dimension_numbers = #tpu.dot_dimension_numbers<[1], [0], [0], [1], [0, 0, 1, 1], [], []>} : vector<8x8xbf16>, vector<8x32xbf16>, vector<8x32xf32> -> vector<8x32xf32>
    %330 = vector.extract_strided_slice %244 {offsets = [8, 32], sizes = [8, 32], strides = [1, 1]} : vector<16x128xbf16> to vector<8x32xbf16>
    %331 = vector.extract_strided_slice %246 {offsets = [8, 32], sizes = [8, 32], strides = [1, 1]} : vector<16x128xbf16> to vector<8x32xbf16>
    %332 = vector.extract_strided_slice %248 {offsets = [8, 32], sizes = [8, 32], strides = [1, 1]} : vector<16x128xbf16> to vector<8x32xbf16>
    "tpu.trace_start"() <{level = 10 : i32, message = "qd,kd->qk"}> : () -> ()
    %cst_115 = arith.constant dense<0.000000e+00> : vector<8x8xf32>
    %333 = tpu.matmul %330, %331, %cst_115 {dimension_numbers = #tpu.dot_dimension_numbers<[1], [1], [0], [0], [0, 0, 1, 0], [], []>} : vector<8x32xbf16>, vector<8x32xbf16>, vector<8x8xf32> -> vector<8x8xf32>
    "tpu.trace_stop"() : () -> ()
    %cst_116 = arith.constant dense<0xFF800000> : vector<8xf32>
    %334 = vector.multi_reduction <maximumf>, %333, %cst_116 [1] : vector<8x8xf32> to vector<8xf32>
    %335 = vector.shape_cast %334 : vector<8xf32> to vector<8x1xf32>
    %336 = vector.broadcast %335 : vector<8x1xf32> to vector<8x8xf32>
    %337 = arith.subf %333, %336 : vector<8x8xf32>
    %338 = math.exp %337 : vector<8x8xf32>
    %cst_117 = arith.constant dense<0.000000e+00> : vector<8xf32>
    %339 = vector.multi_reduction <add>, %338, %cst_117 [1] : vector<8x8xf32> to vector<8xf32>
    %340 = vector.shape_cast %339 : vector<8xf32> to vector<8x1xf32>
    %341 = tpu.reciprocal %340 {approx = true} : vector<8x1xf32> -> vector<8x1xf32>
    %342 = vector.broadcast %341 : vector<8x1xf32> to vector<8x8xf32>
    %343 = arith.mulf %338, %342 : vector<8x8xf32>
    %344 = arith.truncf %343 : vector<8x8xf32> to vector<8x8xbf16>
    %cst_118 = arith.constant dense<0.000000e+00> : vector<8x32xf32>
    %345 = tpu.matmul %344, %332, %cst_118 {dimension_numbers = #tpu.dot_dimension_numbers<[1], [0], [0], [1], [0, 0, 1, 1], [], []>} : vector<8x8xbf16>, vector<8x32xbf16>, vector<8x32xf32> -> vector<8x32xf32>
    %346 = vector.extract_strided_slice %244 {offsets = [8, 64], sizes = [8, 32], strides = [1, 1]} : vector<16x128xbf16> to vector<8x32xbf16>
    %347 = vector.extract_strided_slice %246 {offsets = [8, 64], sizes = [8, 32], strides = [1, 1]} : vector<16x128xbf16> to vector<8x32xbf16>
    %348 = vector.extract_strided_slice %248 {offsets = [8, 64], sizes = [8, 32], strides = [1, 1]} : vector<16x128xbf16> to vector<8x32xbf16>
    "tpu.trace_start"() <{level = 10 : i32, message = "qd,kd->qk"}> : () -> ()
    %cst_119 = arith.constant dense<0.000000e+00> : vector<8x8xf32>
    %349 = tpu.matmul %346, %347, %cst_119 {dimension_numbers = #tpu.dot_dimension_numbers<[1], [1], [0], [0], [0, 0, 1, 0], [], []>} : vector<8x32xbf16>, vector<8x32xbf16>, vector<8x8xf32> -> vector<8x8xf32>
    "tpu.trace_stop"() : () -> ()
    %cst_120 = arith.constant dense<0xFF800000> : vector<8xf32>
    %350 = vector.multi_reduction <maximumf>, %349, %cst_120 [1] : vector<8x8xf32> to vector<8xf32>
    %351 = vector.shape_cast %350 : vector<8xf32> to vector<8x1xf32>
    %352 = vector.broadcast %351 : vector<8x1xf32> to vector<8x8xf32>
    %353 = arith.subf %349, %352 : vector<8x8xf32>
    %354 = math.exp %353 : vector<8x8xf32>
    %cst_121 = arith.constant dense<0.000000e+00> : vector<8xf32>
    %355 = vector.multi_reduction <add>, %354, %cst_121 [1] : vector<8x8xf32> to vector<8xf32>
    %356 = vector.shape_cast %355 : vector<8xf32> to vector<8x1xf32>
    %357 = tpu.reciprocal %356 {approx = true} : vector<8x1xf32> -> vector<8x1xf32>
    %358 = vector.broadcast %357 : vector<8x1xf32> to vector<8x8xf32>
    %359 = arith.mulf %354, %358 : vector<8x8xf32>
    %360 = arith.truncf %359 : vector<8x8xf32> to vector<8x8xbf16>
    %cst_122 = arith.constant dense<0.000000e+00> : vector<8x32xf32>
    %361 = tpu.matmul %360, %348, %cst_122 {dimension_numbers = #tpu.dot_dimension_numbers<[1], [0], [0], [1], [0, 0, 1, 1], [], []>} : vector<8x8xbf16>, vector<8x32xbf16>, vector<8x32xf32> -> vector<8x32xf32>
    %362 = vector.extract_strided_slice %244 {offsets = [8, 96], sizes = [8, 32], strides = [1, 1]} : vector<16x128xbf16> to vector<8x32xbf16>
    %363 = vector.extract_strided_slice %246 {offsets = [8, 96], sizes = [8, 32], strides = [1, 1]} : vector<16x128xbf16> to vector<8x32xbf16>
    %364 = vector.extract_strided_slice %248 {offsets = [8, 96], sizes = [8, 32], strides = [1, 1]} : vector<16x128xbf16> to vector<8x32xbf16>
    "tpu.trace_start"() <{level = 10 : i32, message = "qd,kd->qk"}> : () -> ()
    %cst_123 = arith.constant dense<0.000000e+00> : vector<8x8xf32>
    %365 = tpu.matmul %362, %363, %cst_123 {dimension_numbers = #tpu.dot_dimension_numbers<[1], [1], [0], [0], [0, 0, 1, 0], [], []>} : vector<8x32xbf16>, vector<8x32xbf16>, vector<8x8xf32> -> vector<8x8xf32>
    "tpu.trace_stop"() : () -> ()
    %cst_124 = arith.constant dense<0xFF800000> : vector<8xf32>
    %366 = vector.multi_reduction <maximumf>, %365, %cst_124 [1] : vector<8x8xf32> to vector<8xf32>
    %367 = vector.shape_cast %366 : vector<8xf32> to vector<8x1xf32>
    %368 = vector.broadcast %367 : vector<8x1xf32> to vector<8x8xf32>
    %369 = arith.subf %365, %368 : vector<8x8xf32>
    %370 = math.exp %369 : vector<8x8xf32>
    %cst_125 = arith.constant dense<0.000000e+00> : vector<8xf32>
    %371 = vector.multi_reduction <add>, %370, %cst_125 [1] : vector<8x8xf32> to vector<8xf32>
    %372 = vector.shape_cast %371 : vector<8xf32> to vector<8x1xf32>
    %373 = tpu.reciprocal %372 {approx = true} : vector<8x1xf32> -> vector<8x1xf32>
    %374 = vector.broadcast %373 : vector<8x1xf32> to vector<8x8xf32>
    %375 = arith.mulf %370, %374 : vector<8x8xf32>
    %376 = arith.truncf %375 : vector<8x8xf32> to vector<8x8xbf16>
    %cst_126 = arith.constant dense<0.000000e+00> : vector<8x32xf32>
    %377 = tpu.matmul %376, %364, %cst_126 {dimension_numbers = #tpu.dot_dimension_numbers<[1], [0], [0], [1], [0, 0, 1, 1], [], []>} : vector<8x8xbf16>, vector<8x32xbf16>, vector<8x32xf32> -> vector<8x32xf32>
    %378 = tpu.concatenate %329, %345, %361, %377 in 1 : vector<8x32xf32>, vector<8x32xf32>, vector<8x32xf32>, vector<8x32xf32> -> vector<8x128xf32>
    %379 = tpu.concatenate %313, %378 in 0 : vector<8x128xf32>, vector<8x128xf32> -> vector<16x128xf32>
    %380 = arith.truncf %379 : vector<16x128xf32> to vector<16x128xbf16>
    %c1_127 = arith.constant 1 : index
    %c0_128 = arith.constant 0 : index
    %c0_129 = arith.constant 0 : index
    %381 = vector.load %arg5[%c1_127, %c0_128, %c0_129] : memref<2x128x128xbf16, #tpu.memory_space<vmem>>, vector<1x128x128xbf16>
    %382 = vector.shape_cast %381 : vector<1x128x128xbf16> to vector<128x128xbf16>
    %cst_130 = arith.constant dense<0.000000e+00> : vector<16x128xf32>
    %383 = tpu.matmul %380, %382, %cst_130 {dimension_numbers = #tpu.dot_dimension_numbers<[1], [0], [0], [1], [0, 0, 1, 1], [], []>} : vector<16x128xbf16>, vector<128x128xbf16>, vector<16x128xf32> -> vector<16x128xf32>
    %c1_131 = arith.constant 1 : index
    %c0_132 = arith.constant 0 : index
    %c0_133 = arith.constant 0 : index
    %384 = vector.load %arg6[%c1_131, %c0_132, %c0_133] : memref<2x1x128xf32, #tpu.memory_space<vmem>>, vector<1x1x128xf32>
    %385 = vector.shape_cast %384 : vector<1x1x128xf32> to vector<1x128xf32>
    %386 = vector.broadcast %385 : vector<1x128xf32> to vector<16x128xf32>
    %387 = arith.addf %383, %386 : vector<16x128xf32>
    %388 = arith.addf %234, %387 : vector<16x128xf32>
    %c1_134 = arith.constant 1 : index
    %c0_135 = arith.constant 0 : index
    %c0_136 = arith.constant 0 : index
    %389 = vector.load %arg7[%c1_134, %c0_135, %c0_136] : memref<2x1x128xf32, #tpu.memory_space<vmem>>, vector<1x1x128xf32>
    %390 = vector.shape_cast %389 : vector<1x1x128xf32> to vector<1x128xf32>
    %c1_137 = arith.constant 1 : index
    %c0_138 = arith.constant 0 : index
    %c0_139 = arith.constant 0 : index
    %391 = vector.load %arg8[%c1_137, %c0_138, %c0_139] : memref<2x1x128xf32, #tpu.memory_space<vmem>>, vector<1x1x128xf32>
    %392 = vector.shape_cast %391 : vector<1x1x128xf32> to vector<1x128xf32>
    %cst_140 = arith.constant dense<0.000000e+00> : vector<16xf32>
    %393 = vector.multi_reduction <add>, %388, %cst_140 [1] : vector<16x128xf32> to vector<16xf32>
    %394 = vector.shape_cast %393 : vector<16xf32> to vector<16x1xf32>
    %cst_141 = arith.constant 1.280000e+02 : f32
    %395 = vector.broadcast %cst_141 : f32 to vector<16x1xf32>
    %396 = arith.divf %394, %395 : vector<16x1xf32>
    %397 = vector.broadcast %396 : vector<16x1xf32> to vector<16x128xf32>
    %398 = arith.subf %388, %397 : vector<16x128xf32>
    %399 = arith.mulf %398, %398 : vector<16x128xf32>
    %cst_142 = arith.constant dense<0.000000e+00> : vector<16xf32>
    %400 = vector.multi_reduction <add>, %399, %cst_142 [1] : vector<16x128xf32> to vector<16xf32>
    %401 = vector.shape_cast %400 : vector<16xf32> to vector<16x1xf32>
    %cst_143 = arith.constant 1.280000e+02 : f32
    %402 = vector.broadcast %cst_143 : f32 to vector<16x1xf32>
    %403 = arith.divf %401, %402 : vector<16x1xf32>
    %cst_144 = arith.constant 9.99999974E-6 : f32
    %404 = vector.broadcast %cst_144 : f32 to vector<16x1xf32>
    %405 = arith.addf %403, %404 : vector<16x1xf32>
    %406 = math.rsqrt %405 : vector<16x1xf32>
    %407 = vector.broadcast %406 : vector<16x1xf32> to vector<16x128xf32>
    %408 = arith.mulf %398, %407 : vector<16x128xf32>
    %409 = vector.broadcast %390 : vector<1x128xf32> to vector<16x128xf32>
    %410 = arith.mulf %408, %409 : vector<16x128xf32>
    %411 = vector.broadcast %392 : vector<1x128xf32> to vector<16x128xf32>
    %412 = arith.addf %410, %411 : vector<16x128xf32>
    %413 = arith.truncf %412 : vector<16x128xf32> to vector<16x128xbf16>
    %c1_145 = arith.constant 1 : index
    %c0_146 = arith.constant 0 : index
    %c0_147 = arith.constant 0 : index
    %414 = vector.load %arg11[%c1_145, %c0_146, %c0_147] : memref<2x128x256xbf16, #tpu.memory_space<vmem>>, vector<1x128x256xbf16>
    %415 = vector.shape_cast %414 : vector<1x128x256xbf16> to vector<128x256xbf16>
    %cst_148 = arith.constant dense<0.000000e+00> : vector<16x256xf32>
    %416 = tpu.matmul %413, %415, %cst_148 {dimension_numbers = #tpu.dot_dimension_numbers<[1], [0], [0], [1], [0, 0, 1, 1], [], []>} : vector<16x128xbf16>, vector<128x256xbf16>, vector<16x256xf32> -> vector<16x256xf32>
    %c1_149 = arith.constant 1 : index
    %c0_150 = arith.constant 0 : index
    %c0_151 = arith.constant 0 : index
    %417 = vector.load %arg12[%c1_149, %c0_150, %c0_151] : memref<2x1x256xf32, #tpu.memory_space<vmem>>, vector<1x1x256xf32>
    %418 = vector.shape_cast %417 : vector<1x1x256xf32> to vector<1x256xf32>
    %419 = vector.broadcast %418 : vector<1x256xf32> to vector<16x256xf32>
    %420 = arith.addf %416, %419 : vector<16x256xf32>
    %cst_152 = arith.constant 0.000000e+00 : f32
    %421 = vector.broadcast %cst_152 : f32 to vector<16x256xf32>
    %422 = arith.maximumf %420, %421 : vector<16x256xf32>
    %423 = arith.truncf %422 : vector<16x256xf32> to vector<16x256xbf16>
    %c1_153 = arith.constant 1 : index
    %c0_154 = arith.constant 0 : index
    %c0_155 = arith.constant 0 : index
    %424 = vector.load %arg13[%c1_153, %c0_154, %c0_155] : memref<2x256x128xbf16, #tpu.memory_space<vmem>>, vector<1x256x128xbf16>
    %425 = vector.shape_cast %424 : vector<1x256x128xbf16> to vector<256x128xbf16>
    %cst_156 = arith.constant dense<0.000000e+00> : vector<16x128xf32>
    %426 = tpu.matmul %423, %425, %cst_156 {dimension_numbers = #tpu.dot_dimension_numbers<[1], [0], [0], [1], [0, 0, 1, 1], [], []>} : vector<16x256xbf16>, vector<256x128xbf16>, vector<16x128xf32> -> vector<16x128xf32>
    %c1_157 = arith.constant 1 : index
    %c0_158 = arith.constant 0 : index
    %c0_159 = arith.constant 0 : index
    %427 = vector.load %arg14[%c1_157, %c0_158, %c0_159] : memref<2x1x128xf32, #tpu.memory_space<vmem>>, vector<1x1x128xf32>
    %428 = vector.shape_cast %427 : vector<1x1x128xf32> to vector<1x128xf32>
    %429 = vector.broadcast %428 : vector<1x128xf32> to vector<16x128xf32>
    %430 = arith.addf %426, %429 : vector<16x128xf32>
    %431 = arith.addf %412, %430 : vector<16x128xf32>
    %c1_160 = arith.constant 1 : index
    %c0_161 = arith.constant 0 : index
    %c0_162 = arith.constant 0 : index
    %432 = vector.load %arg9[%c1_160, %c0_161, %c0_162] : memref<2x1x128xf32, #tpu.memory_space<vmem>>, vector<1x1x128xf32>
    %433 = vector.shape_cast %432 : vector<1x1x128xf32> to vector<1x128xf32>
    %c1_163 = arith.constant 1 : index
    %c0_164 = arith.constant 0 : index
    %c0_165 = arith.constant 0 : index
    %434 = vector.load %arg10[%c1_163, %c0_164, %c0_165] : memref<2x1x128xf32, #tpu.memory_space<vmem>>, vector<1x1x128xf32>
    %435 = vector.shape_cast %434 : vector<1x1x128xf32> to vector<1x128xf32>
    %cst_166 = arith.constant dense<0.000000e+00> : vector<16xf32>
    %436 = vector.multi_reduction <add>, %431, %cst_166 [1] : vector<16x128xf32> to vector<16xf32>
    %437 = vector.shape_cast %436 : vector<16xf32> to vector<16x1xf32>
    %cst_167 = arith.constant 1.280000e+02 : f32
    %438 = vector.broadcast %cst_167 : f32 to vector<16x1xf32>
    %439 = arith.divf %437, %438 : vector<16x1xf32>
    %440 = vector.broadcast %439 : vector<16x1xf32> to vector<16x128xf32>
    %441 = arith.subf %431, %440 : vector<16x128xf32>
    %442 = arith.mulf %441, %441 : vector<16x128xf32>
    %cst_168 = arith.constant dense<0.000000e+00> : vector<16xf32>
    %443 = vector.multi_reduction <add>, %442, %cst_168 [1] : vector<16x128xf32> to vector<16xf32>
    %444 = vector.shape_cast %443 : vector<16xf32> to vector<16x1xf32>
    %cst_169 = arith.constant 1.280000e+02 : f32
    %445 = vector.broadcast %cst_169 : f32 to vector<16x1xf32>
    %446 = arith.divf %444, %445 : vector<16x1xf32>
    %cst_170 = arith.constant 9.99999974E-6 : f32
    %447 = vector.broadcast %cst_170 : f32 to vector<16x1xf32>
    %448 = arith.addf %446, %447 : vector<16x1xf32>
    %449 = math.rsqrt %448 : vector<16x1xf32>
    %450 = vector.broadcast %449 : vector<16x1xf32> to vector<16x128xf32>
    %451 = arith.mulf %441, %450 : vector<16x128xf32>
    %452 = vector.broadcast %433 : vector<1x128xf32> to vector<16x128xf32>
    %453 = arith.mulf %451, %452 : vector<16x128xf32>
    %454 = vector.broadcast %435 : vector<1x128xf32> to vector<16x128xf32>
    %455 = arith.addf %453, %454 : vector<16x128xf32>
    %456 = arith.truncf %455 : vector<16x128xf32> to vector<16x128xbf16>
    %c0_171 = arith.constant 0 : index
    %c0_172 = arith.constant 0 : index
    %457 = vector.load %arg15[%c0_171, %c0_172] : memref<128x128xbf16, #tpu.memory_space<vmem>>, vector<128x128xbf16>
    %cst_173 = arith.constant dense<0.000000e+00> : vector<16x128xf32>
    %458 = tpu.matmul %456, %457, %cst_173 {dimension_numbers = #tpu.dot_dimension_numbers<[1], [0], [0], [1], [0, 0, 1, 1], [], []>} : vector<16x128xbf16>, vector<128x128xbf16>, vector<16x128xf32> -> vector<16x128xf32>
    %c0_174 = arith.constant 0 : index
    %c0_175 = arith.constant 0 : index
    %459 = vector.load %arg16[%c0_174, %c0_175] : memref<1x128xf32, #tpu.memory_space<vmem>>, vector<1x128xf32>
    %460 = vector.broadcast %459 : vector<1x128xf32> to vector<16x128xf32>
    %461 = arith.addf %458, %460 : vector<16x128xf32>
    %c0_176 = arith.constant 0 : index
    %c0_177 = arith.constant 0 : index
    %462 = vector.load %arg17[%c0_176, %c0_177] : memref<16x128xf32, #tpu.memory_space<vmem>>, vector<16x128xf32>
    tpu.vector_store %arg17[%c0_176, %c0_177], %461 {strides = array<i32>} : memref<16x128xf32, #tpu.memory_space<vmem>>, vector<16x128xf32>,
    return
  }
}

</mosaic_0001>

<bundles_post_ra>
// kernel: tpu_custom_call.1
= control target key start
LH: loop header
LB: loop body
LE: loop exit
PB: predicated region body
PF: predicated region fallthrough
CT: control target
= control target key end

     0   :  { %s4381_s0 = inlined_call_operand.vmem [shape: s32[16,1], index: 0, kind: input, shape index: {}]   ;;  %s4382_s1 = inlined_call_operand.hbm [shape: bf16[128,128], index: 1, kind: input, shape index: {}]   ;;  %s4383_s2 = inlined_call_operand.vmem [shape: f32[8,128], index: 2, kind: input, shape index: {}]   ;;  %s4384_s3 = inlined_call_operand.hbm [shape: bf16[2,128,384], index: 3, kind: input, shape index: {}]   ;;  %s4385_s4 = inlined_call_operand.vmem [shape: f32[2,1,384], index: 4, kind: input, shape index: {}]   ;;  %s4386_s5 = inlined_call_operand.hbm [shape: bf16[2,128,128], index: 5, kind: input, shape index: {}]   ;;  %s4387_s6 = inlined_call_operand.vmem [shape: f32[2,1,128], index: 6, kind: input, shape index: {}]   ;;  %s4388_s7 = inlined_call_operand.vmem [shape: f32[2,1,128], index: 7, kind: input, shape index: {}]   ;;  %s4389_s8 = inlined_call_operand.vmem [shape: f32[2,1,128], index: 8, kind: input, shape index: {}]   ;;  %s4390_s9 = inlined_call_operand.hbm [shape: f32[2,1,128], index: 9, kind: input, shape index: {}]   ;;  %s4391_s10 = inlined_call_operand.vmem [shape: f32[2,1,128], index: 10, kind: input, shape index: {}]   ;;  %s4392_s11 = inlined_call_operand.hbm [shape: bf16[2,128,256], index: 11, kind: input, shape index: {}]   ;;  %s4393_s12 = inlined_call_operand.vmem [shape: f32[2,1,256], index: 12, kind: input, shape index: {}]   ;;  %s4394_s13 = inlined_call_operand.hbm [shape: bf16[2,256,128], index: 13, kind: input, shape index: {}]   ;;  %s4395_s14 = inlined_call_operand.vmem [shape: f32[2,1,128], index: 14, kind: input, shape index: {}]   ;;  %s4396_s15 = inlined_call_operand.hbm [shape: bf16[128,128], index: 15, kind: input, shape index: {}]   ;;  %s4397_s16 = inlined_call_operand.vmem [shape: f32[1,128], index: 16, kind: input, shape index: {}]   ;;  %s4398_s17 = inlined_call_operand.hbm [shape: f32[16,128], index: 17, kind: output, shape index: {}]  }
   0x1   :  { %4400 = sst [smem:[#allocation20_spill]] %s4381_s0 }
   0x2   :  { %4401 = sst [smem:[#allocation21_spill]] %s4382_s1 }
   0x3   :  { %4402 = sst [smem:[#allocation22_spill]] %s4398_s17 }
   0x4   :  { %22 = vsyncpa [#allocation3], 0 }
   0x5   :  { %23 = vsyncpa [#allocation6], 0 }
   0x6   :  { %24 = vsyncpa [#allocation9], 0 }
   0x7   :  { %25 = vsyncpa [#allocation12], 0  ;;  %s48_s26 = sshll.u32 %s4384_s3, 4  ;;  %s49_s26 = int_to_ptr.hbm [resolvable:$true] %s48_s26 }
   0x8   :  { %26 = vsyncpa [#allocation4], 0  ;;  %s3888_s27 = smov [#allocation5]   ;;  %s82_s30 = sshll.u32 %s4390_s9, 4  ;;  %s83_s30 = int_to_ptr.hbm [resolvable:$true] %s82_s30 }
   0x9   :  { %s50_s28 = sshll.u32 %s3888_s27, 4  ;;  %s3889_s18 = smov 192   ;;  %s51_s28 = int_to_ptr.vmem [resolvable:$true] %s50_s28 }
   0xa   :  { %s3890_s19 = smov 12   ;;  %s3891_s1 = smov [#allocation8]  }
   0xb   :  { %56 = dma.hbm_to_vmem [thread:$0]  %s49_s26, 6144, %s51_s28, [#allocation6], %s3889_s18, %s3889_s18, %s3890_s19  }
   0xc   :  { %s84_s20 = sshll.u32 %s3891_s1, 4  ;;  %s3892_s21 = smov 16   ;;  %s85_s20 = int_to_ptr.vmem [resolvable:$true] %s84_s20 }
   0xd   :  { %s3893_s22 = smov 1   ;;  %s112_s24 = sshll.u32 %s4394_s13, 4  ;;  %s113_s24 = int_to_ptr.hbm [resolvable:$true] %s112_s24 }
   0xe   :  { %90 = dma.hbm_to_vmem [thread:$0]  %s83_s30, 32, %s85_s20, [#allocation9], %s3892_s21, %s3892_s21, %s3893_s22  }
   0xf   :  { %s3894_s25 = smov [#allocation11]   ;;  %s4403_s0 = sld [smem:[#allocation21_spill]] }
  0x10   :  { %s114_s27 = sshll.u32 %s3894_s25, 4  ;;  %s3895_s26 = smov 64   ;;  %s115_s27 = int_to_ptr.vmem [resolvable:$true] %s114_s27 }
  0x11   :  { %s3896_s28 = smov 4   ;;  %s3897_s30 = smov [#allocation2]  }
  0x12   :  { %120 = dma.hbm_to_vmem [thread:$0]  %s113_s24, 4096, %s115_s27, [#allocation12], %s3895_s26, %s3895_s26, %s3896_s28  }
  0x13   :  { %s35_s18 = sshll.u32 %s3897_s30, 4  ;;  %s63_s13 = sshll.u32 %s4386_s5, 4  ;;  %s36_s18 = int_to_ptr.vmem [resolvable:$true] %s35_s18  ;;  %s64_s13 = int_to_ptr.hbm [resolvable:$true] %s63_s13 }
  0x14   :  { %s97_s22 = sshll.u32 %s4392_s11, 4  ;;  %s3898_s3 = smov [#allocation7]   ;;  %s98_s22 = int_to_ptr.hbm [resolvable:$true] %s97_s22 }
  0x15   :  { %s33_s17 = sshll.u32 %s4403_s0, 4  ;;  %s65_s23 = sshll.u32 %s3898_s3, 4  ;;  %s34_s17 = int_to_ptr.hbm [resolvable:$true] %s33_s17  ;;  %s66_s23 = int_to_ptr.vmem [resolvable:$true] %s65_s23 }
  0x16   :  { %41 = dma.hbm_to_vmem [thread:$0]  %s34_s17, 1024, %s36_s18, [#allocation3], %s3895_s26, %s3895_s26, %s3896_s28  }
  0x17   :  { %71 = dma.hbm_to_vmem [thread:$0]  %s64_s13, 2048, %s66_s23, [#allocation6], %s3895_s26, %s3895_s26, %s3896_s28  }
  0x18   :  { %s3899_s24 = smov [#allocation10]   ;;  %s3900_s25 = smov 128  }
  0x19   :  { %s99_s5 = sshll.u32 %s3899_s24, 4  ;;  %s3901_s27 = smov 8   ;;  %s100_s5 = int_to_ptr.vmem [resolvable:$true] %s99_s5 }
  0x1a   :  { %105 = dma.hbm_to_vmem [thread:$0]  %s98_s22, 4096, %s100_s5, [#allocation9], %s3900_s25, %s3900_s25, %s3901_s27  }
  0x1b   :  { %s127_s11 = sshll.u32 %s4396_s15, 4  ;;  %s3902_s9 = smov [#allocation13]   ;;  %s128_s11 = int_to_ptr.hbm [resolvable:$true] %s127_s11 }
  0x1c   :  { %s129_s0 = sshll.u32 %s3902_s9, 4  ;;  %s130_s0 = int_to_ptr.vmem [resolvable:$true] %s129_s0 }
  0x1d   :  { %135 = dma.hbm_to_vmem [thread:$0]  %s128_s11, 1024, %s130_s0, [#allocation12], %s3895_s26, %s3895_s26, %s3896_s28  }
  0x1e   :  { %3878 = dma.done.wait [#allocation3], 1024  }
  0x1f   :  { %3879 = vsyncadd [#allocation3], 4294966272 }
  0x20   :  { %3880 = dma.done.wait [#allocation6], 8192  }
  0x21   :  { %3881 = vsyncadd [#allocation6], 4294959104 }
  0x22   :  { %3882 = dma.done.wait [#allocation9], 4128  }
  0x23   :  { %3883 = vsyncadd [#allocation9], 4294963168 }
  0x24   :  { %3884 = dma.done.wait [#allocation12], 5120  }
  0x25   :  { %3885 = vsyncadd [#allocation12], 4294962176  ;;  %v3903_v0 = vmov 0   ;;  %s4404_s18 = sld [smem:[#allocation20_spill]]  ;;  %v3402_v2 = vld [vmem:[#allocation2 + $0x38] sm:$0xff]  ;;  %v3401_v3 = vld [vmem:[#allocation2 + $0x30] sm:$0xff]  ;;  %v169_v48 = vlaneseq }
  0x26   :  { %3560 = vset.pattern.permute.xlu0 %v3903_v0  ;;  %248 = vmatpush.bf16.msra.mxu0 %v3402_v2  ;;  %v3400_v5 = vld [vmem:[#allocation2 + $0x28] sm:$0xff]  ;;  %v3399_v6 = vld [vmem:[#allocation2 + $0x20] sm:$0xff]  ;;  %v3398_v7 = vld [vmem:[#allocation2 + $0x18] sm:$0xff]  ;;  %v3904_v51 = vmov 1.0|1.0   ;;  %vm484_vm3 = vcmask 261120  }
  0x27   :  { %v3397_v8 = vld [vmem:[#allocation2 + $0x10] sm:$0xff]  ;;  %v3396_v9 = vld [vmem:[#allocation2 + $0x8] sm:$0xff]  ;;  %v3395_v10 = vld [vmem:[#allocation2] sm:$0xff]  ;;  %v170_v49 = vand.u32 127, %v169_v48  ;;  %vm520_vm4 = vcmask 1043456   ;;  %s3906_s22 = smov 96  }
  0x28   :  { %v2898_v11 = vld [vmem:[#allocation5 + $0xa8] sm:$0xf]  ;;  %v3425_v12 = vld [vmem:[#allocation5 + $0xb0] sm:$0xf0]  ;;  %v3424_v13 = vld [vmem:[#allocation5 + $0xac] sm:$0xf] }
  0x29   :  { %v2899_v14 = vor.u32 %v3425_v12, %v2898_v11  ;;  %v2900_v15 = vld [vmem:[#allocation5 + $0xb4] sm:$0xf0]  ;;  %v2906_v16 = vld [vmem:[#allocation5 + $0xb0] sm:$0xf]  ;;  %v3426_v17 = vld [vmem:[#allocation5 + $0xb8] sm:$0xf0] }
  0x2a   :  { %249 = vmatpush.bf16.msra.mxu0 %v3401_v3  ;;  %v2903_v18 = vor.u32 %v3424_v13, %v2900_v15  ;;  %v2907_v19 = vor.u32 %v3426_v17, %v2906_v16  ;;  %v2886_v20 = vld [vmem:[#allocation5 + $0x90] sm:$0xf]  ;;  %v3422_v21 = vld [vmem:[#allocation5 + $0x98] sm:$0xf0]  ;;  %v3421_v22 = vld [vmem:[#allocation5 + $0x94] sm:$0xf] }
  0x2b   :  { %v167_v1 = vld [vmem:[%s4404_s18] sm:$0xff]  ;;  %v168_v4 = vld [vmem:[%s4404_s18 + $0x8] sm:$0xff]  ;;  %436 = vmatpush.bf16.msra.mxu1 %v2899_v14  ;;  %v2887_v23 = vor.u32 %v3422_v21, %v2886_v20  ;;  %v2894_v25 = vld [vmem:[#allocation5 + $0x98] sm:$0xf]  ;;  %vm504_vm5 = vcmask 64512   ;;  %vm727_vm6 = vcmask 523264  }
  0x2c   :  { %172 = vperm.xlu0 %3560, %v167_v1   ;;  %v2888_v24 = vld [vmem:[#allocation5 + $0x9c] sm:$0xf0]  ;;  %v3423_v26 = vld [vmem:[#allocation5 + $0xa0] sm:$0xf0]  ;;  %450 = vmatpush.bf16.msra.mxu2 %v2903_v18  ;;  %v2874_v29 = vld [vmem:[#allocation5 + $0x78] sm:$0xf] }
  0x2d   :  { %464 = vmatpush.bf16.msra.mxu3 %v2907_v19  ;;  %v2891_v27 = vor.u32 %v3421_v22, %v2888_v24  ;;  %v2895_v28 = vor.u32 %v3423_v26, %v2894_v25  ;;  %v3419_v30 = vld [vmem:[#allocation5 + $0x80] sm:$0xf0]  ;;  %v3418_v31 = vld [vmem:[#allocation5 + $0x7c] sm:$0xf]  ;;  %v2876_v32 = vld [vmem:[#allocation5 + $0x84] sm:$0xf0] }
  0x2e   :  { %250 = vmatpush.bf16.msra.mxu0 %v3400_v5  ;;  %v2882_v33 = vld [vmem:[#allocation5 + $0x80] sm:$0xf]  ;;  %v3420_v34 = vld [vmem:[#allocation5 + $0x88] sm:$0xf0]  ;;  %v2875_v35 = vor.u32 %v3419_v30, %v2874_v29  ;;  %v2879_v36 = vor.u32 %v3418_v31, %v2876_v32  ;;  %v3415_v40 = vld [vmem:[#allocation5 + $0x64] sm:$0xf] }
  0x2f   :  { %437 = vmatpush.bf16.msra.mxu1 %v2887_v23  ;;  %v2883_v37 = vor.u32 %v3420_v34, %v2882_v33  ;;  %v2862_v38 = vld [vmem:[#allocation5 + $0x60] sm:$0xf]  ;;  %v3416_v39 = vld [vmem:[#allocation5 + $0x68] sm:$0xf0]  ;;  %v2864_v41 = vld [vmem:[#allocation5 + $0x6c] sm:$0xf0] }
  0x30   :  { %451 = vmatpush.bf16.msra.mxu2 %v2891_v27  ;;  %v2870_v42 = vld [vmem:[#allocation5 + $0x68] sm:$0xf]  ;;  %v3417_v43 = vld [vmem:[#allocation5 + $0x70] sm:$0xf0]  ;;  %v2863_v44 = vor.u32 %v3416_v39, %v2862_v38  ;;  %v2867_v45 = vor.u32 %v3415_v40, %v2864_v41  ;;  %v3412_v54 = vld [vmem:[#allocation5 + $0x4c] sm:$0xf] }
  0x31   :  { %465 = vmatpush.bf16.msra.mxu3 %v2895_v28  ;;  %v2871_v46 = vor.u32 %v3417_v43, %v2870_v42  ;;  %v2850_v52 = vld [vmem:[#allocation5 + $0x48] sm:$0xf]  ;;  %v3413_v53 = vld [vmem:[#allocation5 + $0x50] sm:$0xf0]  ;;  %v2852_v56 = vld [vmem:[#allocation5 + $0x54] sm:$0xf0] }
  0x32   :  { %251 = vmatpush.bf16.msra.mxu0 %v3399_v6  ;;  %v2851_v55 = vor.u32 %v3413_v53, %v2850_v52  ;;  %v2858_v57 = vld [vmem:[#allocation5 + $0x50] sm:$0xf]  ;;  %v3414_v58 = vld [vmem:[#allocation5 + $0x58] sm:$0xf0]  ;;  %v2855_v59 = vor.u32 %v3412_v54, %v2852_v56  ;;  %v3409_v0 = vld [vmem:[#allocation5 + $0x34] sm:$0xf] }
  0x33   :  { %438 = vmatpush.bf16.msra.mxu1 %v2875_v35  ;;  %v2859_v60 = vor.u32 %v3414_v58, %v2858_v57  ;;  %v2838_v61 = vld [vmem:[#allocation5 + $0x30] sm:$0xf]  ;;  %v3410_v62 = vld [vmem:[#allocation5 + $0x38] sm:$0xf0]  ;;  %v2840_v1 = vld [vmem:[#allocation5 + $0x3c] sm:$0xf0] }
  0x34   :  { %175 = vperm.xlu0 %3560, %v168_v4   ;;  %452 = vmatpush.bf16.msra.mxu2 %v2879_v36  ;;  %v2839_v63 = vor.u32 %v3410_v62, %v2838_v61  ;;  %v2846_v2 = vld [vmem:[#allocation5 + $0x38] sm:$0xf]  ;;  %v2843_v3 = vor.u32 %v3409_v0, %v2840_v1  ;;  %v3411_v4 = vld [vmem:[#allocation5 + $0x40] sm:$0xf0]  ;;  %v2834_v11 = vld [vmem:[#allocation5 + $0x20] sm:$0xf] }
  0x35   :  { %466 = vmatpush.bf16.msra.mxu3 %v2883_v37  ;;  %v2847_v5 = vor.u32 %v3411_v4, %v2846_v2  ;;  %v2826_v6 = vld [vmem:[#allocation5 + $0x18] sm:$0xf]  ;;  %v3408_v12 = vld [vmem:[#allocation5 + $0x28] sm:$0xf0]  ;;  %v2814_v15 = vld [vmem:[#allocation5] sm:$0xf] }
  0x36   :  { %252 = vmatpush.bf16.msra.mxu0 %v3398_v7  ;;  %v3407_v7 = vld [vmem:[#allocation5 + $0x20] sm:$0xf0]  ;;  %v2835_v14 = vor.u32 %v3408_v12, %v2834_v11  ;;  %v3404_v16 = vld [vmem:[#allocation5 + $0x8] sm:$0xf0]  ;;  %v2816_v19 = vld [vmem:[#allocation5 + $0xc] sm:$0xf0] }
  0x37   :  { %439 = vmatpush.bf16.msra.mxu1 %v2863_v44  ;;  %v3403_v17 = vld [vmem:[#allocation5 + $0x4] sm:$0xf]  ;;  %v2815_v18 = vor.u32 %v3404_v16, %v2814_v15  ;;  %v2822_v20 = vld [vmem:[#allocation5 + $0x8] sm:$0xf]  ;;  %v3405_v21 = vld [vmem:[#allocation5 + $0x10] sm:$0xf0] }
  0x38   :  { %453 = vmatpush.bf16.msra.mxu2 %v2867_v45  ;;  %v2819_v22 = vor.u32 %v3403_v17, %v2816_v19  ;;  %v2823_v23 = vor.u32 %v3405_v21, %v2822_v20  ;;  %v264_v26 = vld [vmem:[%s4383_s2] sm:$0xff]  ;;  %s3905_s2 = smov 32   ;;  %vm729_vm7 = vcmask 785408   ;;  %s3908_s23 = smov [#allocation14]  }
  0x39   :  { %467 = vmatpush.bf16.msra.mxu3 %v2871_v46  ;;  %v4053_v33 = vld [vmem:[%s4385_s4] sm:$0x7]  ;;  %s2758_s24 = sshll.u32 %s3908_s23, 4  ;;  %s4405_s29 = sld [smem:[#allocation22_spill]]  ;;  %s2759_s24 = int_to_ptr.vmem [resolvable:$true] %s2758_s24 }
  0x3a   :  { %253 = vmatpush.bf16.msra.mxu0 %v3397_v8  ;;  %v3406_v8 = vld [vmem:[#allocation5 + $0x1c] sm:$0xf]  ;;  %v303_v34 = vperm.slane %v4053_v33, 1  ;;  %v304_v35 = vperm.slane %v4053_v33, 2  ;;  %v302_v36 = vperm.slane %v4053_v33, 0 }
  0x3b   :  { %440 = vmatpush.bf16.msra.mxu1 %v2851_v55 }
  0x3c   :  { %454 = vmatpush.bf16.msra.mxu2 %v2855_v59 }
  0x3d   :  { %468 = vmatpush.bf16.msra.mxu3 %v2859_v60 }
  0x3e   :  { %254 = vmatpush.bf16.msra.mxu0 %v3396_v9  ;;  %v2827_v9 = vor.u32 %v3407_v7, %v2826_v6 }
  0x3f   :  { %441 = vmatpush.bf16.msra.mxu1 %v2839_v63  ;;  %s2760_s11 = sshll.u32 %s4405_s29, 4  ;;  %s2761_s11 = int_to_ptr.hbm [resolvable:$true] %s2760_s11 }
  0x40   :  { %455 = vmatpush.bf16.msra.mxu2 %v2843_v3 }
  0x41   :  { %469 = vmatpush.bf16.msra.mxu3 %v2847_v5 }
  0x42   :  { %255 = vmatpush.bf16.msra.mxu0 %v3395_v10  ;;  %v2828_v10 = vld [vmem:[#allocation5 + $0x24] sm:$0xf0] }
  0x43   :  { %v2831_v13 = vor.u32 %v3406_v8, %v2828_v10  ;;  %442 = vmatpush.bf16.msra.mxu1 %v2827_v9 }
  0x45   :  { %456 = vmatpush.bf16.msra.mxu2 %v2831_v13  ;;  %470 = vmatpush.bf16.msra.mxu3 %v2835_v14 }
  0x47   :  { %443 = vmatpush.bf16.msra.mxu1 %v2815_v18 }
  0x49   :  { %457 = vmatpush.bf16.msra.mxu2 %v2819_v22  ;;  %471 = vmatpush.bf16.msra.mxu3 %v2823_v23 }
  0x9e   :  { %v173_v47 = vpop.permute.xlu0 %172 }
  0x9f   :  { %vm177_vm0 = vcmp.eq.s32.totalorder %v170_v49, %v173_v47 }
  0xa6   :  { %v176_v50 = vpop.permute.xlu0 %175 }
  0xa7   :  { %vm178_vm1 = vcmp.eq.s32.totalorder %v170_v49, %v176_v50 }
  0xa8   :  { %vm2810_vm2 = vmpackc.low %vm178_vm1, %vm177_vm0 }
  0xa9   :  { %2811 = vmatmul.msk.bf16.vlgmr.msra.gmra.mxu0 %vm2810_vm2, %v3904_v51 }
 0x126   :  { %v257_v24 = vpop.f32.mrf.mxu0 }
 0x127   :  { %v262_v25 = vmul.f32 11.313708, %v257_v24 }
 0x129   :  { %v4044_v29 = vadd.f32 %v264_v26, %v262_v25 }
 0x12e   :  { %v259_v27 = vpop.f32.mrf.mxu0 }
 0x12f   :  { %v263_v28 = vmul.f32 11.313708, %v259_v27 }
 0x131   :  { %v4046_v30 = vadd.f32 %v264_v26, %v263_v28 }
 0x133   :  { %v267_v31 = vpack.c.bf16 %v4046_v30, %v4044_v29 }
 0x135   :  { %444 = vmatmul.bf16.vlgmr.msra.gmra.mxu1 %v267_v31  ;;  %458 = vmatmul.bf16.vlgmr.msra.gmra.mxu2 %v267_v31 }
 0x136   :  { %472 = vmatmul.bf16.vlgmr.msra.gmra.mxu3 %v267_v31 }
 0x1b2   :  { %v445_v32 = vpop.f32.mrf.mxu1 }
 0x1b3   :  { %v446_v42 = vadd.f32 %v445_v32, %v302_v36 }
 0x1b5   :  { %v478_v49 = vpack.c.bf16 %v446_v42, %v446_v42 }
 0x1b7   :  { %v538_v53 = vunpack.c.l.b16 %v478_v49 }
 0x1b8   :  { %v459_v37 = vpop.f32.mrf.mxu2 }
 0x1b9   :  { %v460_v38 = vadd.f32 %v459_v37, %v303_v34  ;;  %v473_v39 = vpop.f32.mrf.mxu3  ;;  %v539_v56 = vpack.c.b16 %v538_v53, %v538_v53 }
 0x1ba   :  { %v474_v40 = vadd.f32 %v473_v39, %v304_v35  ;;  %v447_v41 = vpop.f32.mrf.mxu1 }
 0x1bb   :  { %v480_v43 = vpack.c.bf16 %v460_v38, %v460_v38  ;;  %v448_v44 = vadd.f32 %v447_v41, %v302_v36 }
 0x1bc   :  { %v4060_v45 = vpack.c.bf16 %v474_v40, %v474_v40 }
 0x1bd   :  { %v543_v46 = vunpack.c.l.b16 %v480_v43  ;;  %v489_v47 = vsel %vm484_vm3, %v480_v43, 0  ;;  %v479_v51 = vpack.c.bf16 %v448_v44, %v448_v44 }
 0x1be   :  { %498 = vmatpush.bf16.xpose.msrb.mxu2 %v489_v47  ;;  %v522_v48 = vsel %vm520_vm4, %v4060_v45, 0  ;;  %v579_v39 = vunpack.c.l.b16 %v4060_v45 }
 0x1bf   :  { %v544_v50 = vpack.c.b16 %v543_v46, %v543_v46  ;;  %531 = vmatpush.bf16.msrb.mxu3 %v522_v48  ;;  %v782_v54 = vunpack.c.l.b16 %v479_v51 }
 0x1c0   :  { %v461_v52 = vpop.f32.mrf.mxu2  ;;  %v580_v43 = vpack.c.b16 %v579_v39, %v579_v39 }
 0x1c1   :  { %604 = vrot.lane.b32.xlu0 %v544_v50, %s3895_s26  ;;  %660 = vrot.lane.b32.xlu2 %v544_v50, %s3905_s2  ;;  %v462_v55 = vadd.f32 %v461_v52, %v303_v34  ;;  %v783_v57 = vpack.c.b16 %v782_v54, %v782_v54 }
 0x1c2   :  { %545 = vrot.lane.b32.xlu1 %v544_v50, %s3906_s22 }
 0x1c3   :  { %v481_v58 = vpack.c.bf16 %v462_v55, %v462_v55 }
 0x1c5   :  { %2908 = vmatmul.msk.bf16.vlgmr.msrb.gmra.mxu2 %vm484_vm3, %v478_v49  ;;  %v787_v59 = vunpack.c.l.b16 %v481_v58  ;;  %v735_v3 = vsel %vm484_vm3, %v481_v58, 0 }
 0x1c7   :  { %v788_v60 = vpack.c.b16 %v787_v59, %v787_v59 }
 0x1c9   :  { %784 = vrot.lane.b32.xlu0 %v783_v57, %s3906_s22  ;;  %658 = vrot.lane.b32.xlu2 %v539_v56, %s3905_s2 }
 0x1ca   :  { %540 = vrot.lane.b32.xlu1 %v539_v56, %s3906_s22 }
 0x1d1   :  { %848 = vrot.lane.b32.xlu0 %v788_v60, %s3895_s26  ;;  %602 = vrot.lane.b32.xlu2 %v539_v56, %s3895_s26 }
 0x1d2   :  { %789 = vrot.lane.b32.xlu1 %v788_v60, %s3906_s22 }
 0x1d9   :  { %902 = vrot.lane.b32.xlu2 %v783_v57, %s3905_s2 }
 0x1da   :  { %904 = vrot.lane.b32.xlu1 %v788_v60, %s3905_s2 }
 0x1e2   :  { %846 = vrot.lane.b32.xlu1 %v783_v57, %s3895_s26 }
 0x21b   :  { %v661_v61 = vpop.permute.xlu2 %660 }
 0x21c   :  { %v666_v4 = vsel %vm484_vm3, %v661_v61, 0 }
 0x223   :  { %v659_v62 = vpop.permute.xlu2 %658 }
 0x22b   :  { %v603_v5 = vpop.permute.xlu2 %602 }
 0x233   :  { %v605_v63 = vpop.permute.xlu0 %604  ;;  %v903_v18 = vpop.permute.xlu2 %902 }
 0x234   :  { %v546_v0 = vpop.permute.xlu1 %545  ;;  %v610_v1 = vsel %vm484_vm3, %v605_v63, 0 }
 0x235   :  { %v551_v2 = vsel %vm484_vm3, %v546_v0, 0  ;;  %619 = vmatpush.bf16.xpose.msrb.mxu0 %v610_v1  ;;  %v475_v1 = vpop.f32.mrf.mxu3 }
 0x236   :  { %560 = vmatpush.bf16.xpose.msra.mxu2 %v551_v2 }
 0x23b   :  { %v785_v6 = vpop.permute.xlu0 %784 }
 0x23c   :  { %v541_v7 = vpop.permute.xlu1 %540  ;;  %2912 = vmatmul.msk.bf16.vlgmr.msrb.gmra.mxu0 %vm484_vm3, %v603_v5 }
 0x23d   :  { %744 = vmatpush.bf16.xpose.msra.mxu0 %v735_v3  ;;  %2910 = vmatmul.msk.bf16.vlgmr.msra.gmra.mxu2 %vm484_vm3, %v541_v7 }
 0x23e   :  { %675 = vmatpush.bf16.xpose.msrb.mxu2 %v666_v4  ;;  %v476_v4 = vadd.f32 %v475_v1, %v304_v35 }
 0x243   :  { %v849_v8 = vpop.permute.xlu0 %848 }
 0x244   :  { %v854_v9 = vsel %vm484_vm3, %v849_v8, 0  ;;  %v790_v10 = vpop.permute.xlu1 %789 }
 0x245   :  { %v795_v11 = vsel %vm484_vm3, %v790_v10, 0  ;;  %863 = vmatpush.bf16.xpose.msrb.mxu0 %v854_v9  ;;  %v483_v10 = vpack.c.bf16 %v476_v4, %v476_v4 }
 0x246   :  { %804 = vmatpush.bf16.xpose.msra.mxu2 %v795_v11 }
 0x248   :  { %v500_v12 = vpop.f32.mrf.mxu2 }
 0x249   :  { %v505_v13 = vsel %vm504_vm5, %v500_v12, -inf }
 0x24a   :  { %506 = vmax.xlane.f32.xlu2 %v505_v13 }
 0x24c   :  { %v905_v14 = vpop.permute.xlu1 %904  ;;  %2916 = vmatmul.msk.bf16.vlgmr.msra.gmra.mxu0 %vm484_vm3, %v479_v51 }
 0x24d   :  { %v910_v15 = vsel %vm484_vm3, %v905_v14, 0  ;;  %2914 = vmatmul.msk.bf16.vlgmr.msrb.gmra.mxu2 %vm484_vm3, %v659_v62 }
 0x24e   :  { %919 = vmatpush.bf16.xpose.msrb.mxu2 %v910_v15 }
 0x250   :  { %v502_v16 = vpop.f32.mrf.mxu2 }
 0x254   :  { %v847_v17 = vpop.permute.xlu1 %846 }
 0x25c   :  { %2920 = vmatmul.msk.bf16.vlgmr.msrb.gmra.mxu0 %vm484_vm3, %v847_v17 }
 0x25d   :  { %2918 = vmatmul.msk.bf16.vlgmr.msra.gmra.mxu2 %vm484_vm3, %v785_v6 }
 0x26d   :  { %2922 = vmatmul.msk.bf16.vlgmr.msrb.gmra.mxu2 %vm484_vm3, %v903_v18 }
 0x2b9   :  { %v621_v19 = vpop.f32.mrf.mxu0 }
 0x2ba   :  { %v625_v20 = vsel %vm504_vm5, %v621_v19, -inf }
 0x2bb   :  { %626 = vmax.xlane.f32.xlu2 %v625_v20 }
 0x2bd   :  { %v507_v21 = vpop.xlane.xlu2 %506 }
 0x2be   :  { %v508_v22 = vsub.f32 %v500_v12, %v507_v21  ;;  %v823_v12 = vunpack.c.l.b16 %v483_v10 }
 0x2c0   :  { %v509_v23 = vmul.f32 1.442695, %v508_v22  ;;  %v562_v24 = vpop.f32.mrf.mxu2  ;;  %v824_v33 = vpack.c.b16 %v823_v12, %v823_v12 }
 0x2c1   :  { %v623_v25 = vpop.f32.mrf.mxu0  ;;  %v566_v26 = vsel %vm504_vm5, %v562_v24, -inf }
 0x2c2   :  { %3604 = vpow2.f32 %v509_v23  ;;  %567 = vmax.xlane.f32.xlu0 %v566_v26  ;;  %v766_v26 = vsel %vm520_vm4, %v483_v10, 0 }
 0x2c8   :  { %v3605_v27 = vpop.eup %3604  ;;  %v564_v28 = vpop.f32.mrf.mxu2 }
 0x2c9   :  { %v746_v31 = vpop.f32.mrf.mxu0  ;;  %v511_v32 = vsel %vm504_vm5, %v3605_v27, 0.0 }
 0x2ca   :  { %512 = vadd.xlane.f32.xlu0 %v511_v32  ;;  %v750_v34 = vsel %vm504_vm5, %v746_v31, -inf }
 0x2cb   :  { %751 = vmax.xlane.f32.xlu1 %v750_v34 }
 0x2d0   :  { %v677_v36 = vpop.f32.mrf.mxu2 }
 0x2d1   :  { %v748_v37 = vpop.f32.mrf.mxu0  ;;  %v681_v38 = vsel %vm504_vm5, %v677_v36, -inf }
 0x2d3   :  { %682 = vmax.xlane.f32.xlu1 %v681_v38 }
 0x2d8   :  { %v679_v40 = vpop.f32.mrf.mxu2 }
 0x2d9   :  { %v865_v41 = vpop.f32.mrf.mxu0 }
 0x2da   :  { %v869_v42 = vsel %vm504_vm5, %v865_v41, -inf }
 0x2db   :  { %870 = vmax.xlane.f32.xlu1 %v869_v42 }
 0x2de   :  { %693 = vrot.lane.b32.xlu0 %v580_v43, %s3905_s2 }
 0x2e0   :  { %v806_v44 = vpop.f32.mrf.mxu2 }
 0x2e1   :  { %v867_v46 = vpop.f32.mrf.mxu0  ;;  %v810_v47 = vsel %vm504_vm5, %v806_v44, -inf }
 0x2e2   :  { %811 = vmax.xlane.f32.xlu2 %v810_v47 }
 0x2e8   :  { %v808_v48 = vpop.f32.mrf.mxu2 }
 0x2f0   :  { %v4102_v49 = vpop.f32.mrf.mxu2 }
 0x2f1   :  { %v925_v50 = vsel %vm504_vm5, %v4102_v49, -inf }
 0x2f2   :  { %926 = vmax.xlane.f32.xlu2 %v925_v50 }
 0x2f4   :  { %637 = vrot.lane.b32.xlu1 %v580_v43, %s3895_s26 }
 0x2f8   :  { %v923_v45 = vpop.f32.mrf.mxu2 }
 0x30a   :  { %581 = vrot.lane.b32.xlu2 %v580_v43, %s3906_s22 }
 0x32e   :  { %v627_v51 = vpop.xlane.xlu2 %626 }
 0x32f   :  { %v628_v52 = vsub.f32 %v621_v19, %v627_v51 }
 0x331   :  { %v629_v53 = vmul.f32 1.442695, %v628_v52 }
 0x333   :  { %3606 = vpow2.f32 %v629_v53 }
 0x335   :  { %v568_v54 = vpop.xlane.xlu0 %567 }
 0x336   :  { %v569_v55 = vsub.f32 %v562_v24, %v568_v54 }
 0x338   :  { %v570_v56 = vmul.f32 1.442695, %v569_v55 }
 0x339   :  { %v4108_v57 = vpop.eup %3606 }
 0x33a   :  { %3608 = vpow2.f32 %v570_v56  ;;  %v631_v58 = vsel %vm504_vm5, %v4108_v57, 0.0 }
 0x33b   :  { %632 = vadd.xlane.f32.xlu1 %v631_v58 }
 0x33d   :  { %v513_v59 = vpop.xlane.xlu0 %512 }
 0x33e   :  { %3610 = vrcp.f32 %v513_v59  ;;  %v752_v60 = vpop.xlane.xlu1 %751 }
 0x33f   :  { %v753_v61 = vsub.f32 %v746_v31, %v752_v60 }
 0x340   :  { %v4112_v62 = vpop.eup %3608 }
 0x341   :  { %v754_v63 = vmul.f32 1.442695, %v753_v61  ;;  %v572_v0 = vsel %vm504_vm5, %v4112_v62, 0.0 }
 0x342   :  { %573 = vadd.xlane.f32.xlu0 %v572_v0 }
 0x343   :  { %3612 = vpow2.f32 %v754_v63 }
 0x344   :  { %v3611_v2 = vpop.eup %3610 }
 0x345   :  { %v515_v3 = vmul.f32 %v3611_v2, %v3605_v27 }
 0x346   :  { %v683_v5 = vpop.xlane.xlu1 %682 }
 0x347   :  { %v684_v6 = vsub.f32 %v677_v36, %v683_v5  ;;  %v516_v7 = vpack.c.bf16 %v515_v3, %v515_v3 }
 0x349   :  { %v3613_v8 = vpop.eup %3612  ;;  %v685_v9 = vmul.f32 1.442695, %v684_v6  ;;  %2909 = vmatmul.msk.bf16.vlgmr.msrb.gmra.mxu3 %vm504_vm5, %v516_v7 }
 0x34a   :  { %v756_v11 = vsel %vm504_vm5, %v3613_v8, 0.0 }
 0x34b   :  { %3614 = vpow2.f32 %v685_v9  ;;  %757 = vadd.xlane.f32.xlu0 %v756_v11 }
 0x34e   :  { %v871_v35 = vpop.xlane.xlu1 %870 }
 0x34f   :  { %v872_v17 = vsub.f32 %v865_v41, %v871_v35 }
 0x350   :  { %v694_v28 = vpop.permute.xlu0 %693 }
 0x351   :  { %v4120_v13 = vpop.eup %3614  ;;  %v873_v19 = vmul.f32 1.442695, %v872_v17  ;;  %v699_v36 = vsel %vm520_vm4, %v694_v28, 0  ;;  %v3430_v28 = vld [vmem:[#allocation7 + $0x18] sm:$0xff] }
 0x352   :  { %v687_v14 = vsel %vm504_vm5, %v4120_v13, 0.0 }
 0x353   :  { %688 = vadd.xlane.f32.xlu0 %v687_v14 }
 0x354   :  { %825 = vrot.lane.b32.xlu1 %v824_v33, %s3906_s22 }
 0x355   :  { %v812_v15 = vpop.xlane.xlu2 %811 }
 0x356   :  { %v813_v16 = vsub.f32 %v806_v44, %v812_v15 }
 0x358   :  { %v814_v18 = vmul.f32 1.442695, %v813_v16 }
 0x35a   :  { %3616 = vpow2.f32 %v814_v18 }
 0x35b   :  { %3618 = vpow2.f32 %v873_v19 }
 0x360   :  { %v3617_v20 = vpop.eup %3616 }
 0x361   :  { %v816_v21 = vsel %vm504_vm5, %v3617_v20, 0.0  ;;  %v4126_v23 = vpop.eup %3618 }
 0x362   :  { %817 = vadd.xlane.f32.xlu2 %v816_v21  ;;  %v875_v27 = vsel %vm504_vm5, %v4126_v23, 0.0 }
 0x365   :  { %v927_v22 = vpop.xlane.xlu2 %926 }
 0x366   :  { %v638_v24 = vpop.permute.xlu1 %637  ;;  %v928_v31 = vsub.f32 %v4102_v49, %v927_v22  ;;  %v3434_v22 = vld [vmem:[#allocation7 + $0x38] sm:$0xff] }
 0x367   :  { %937 = vrot.lane.b32.xlu0 %v824_v33, %s3905_s2  ;;  %v643_v25 = vsel %vm520_vm4, %v638_v24, 0  ;;  %1042 = vmatpush.bf16.msra.mxu0 %v3434_v22  ;;  %v3446_v22 = vld [vmem:[#allocation10 + $0x54] sm:$0xf0] }
 0x368   :  { %652 = vmatpush.bf16.msrb.mxu1 %v643_v25  ;;  %v929_v37 = vmul.f32 1.442695, %v928_v31  ;;  %v3432_v25 = vld [vmem:[#allocation7 + $0x28] sm:$0xff]  ;;  %v3429_v31 = vld [vmem:[#allocation7 + $0x10] sm:$0xff] }
 0x36a   :  { %876 = vadd.xlane.f32.xlu2 %v875_v27  ;;  %3620 = vpow2.f32 %v929_v37  ;;  %v3431_v27 = vld [vmem:[#allocation7 + $0x20] sm:$0xff]  ;;  %v3428_v37 = vld [vmem:[#allocation7 + $0x8] sm:$0xff] }
 0x36c   :  { %775 = vmatpush.bf16.msra.mxu1 %v766_v26 }
 0x36d   :  { %v582_v32 = vpop.permute.xlu2 %581 }
 0x36e   :  { %v587_v34 = vsel %vm520_vm4, %v582_v32, 0 }
 0x36f   :  { %596 = vmatpush.bf16.msra.mxu3 %v587_v34 }
 0x370   :  { %v3621_v38 = vpop.eup %3620 }
 0x371   :  { %v931_v39 = vsel %vm504_vm5, %v3621_v38, 0.0 }
 0x373   :  { %708 = vmatpush.bf16.msrb.mxu3 %v699_v36 }
 0x37e   :  { %932 = vadd.xlane.f32.xlu1 %v931_v39 }
 0x382   :  { %881 = vrot.lane.b32.xlu2 %v824_v33, %s3895_s26 }
 0x3ae   :  { %v633_v40 = vpop.xlane.xlu1 %632 }
 0x3af   :  { %3622 = vrcp.f32 %v633_v40 }
 0x3b5   :  { %v3623_v41 = vpop.eup %3622  ;;  %v574_v42 = vpop.xlane.xlu0 %573 }
 0x3b6   :  { %v635_v43 = vmul.f32 %v3623_v41, %v4108_v57  ;;  %3624 = vrcp.f32 %v574_v42 }
 0x3b8   :  { %v636_v44 = vpack.c.bf16 %v635_v43, %v635_v43 }
 0x3ba   :  { %2913 = vmatmul.msk.bf16.vlgmr.msrb.gmra.mxu1 %vm504_vm5, %v636_v44 }
 0x3bc   :  { %v3625_v46 = vpop.eup %3624 }
 0x3bd   :  { %v576_v47 = vmul.f32 %v3625_v46, %v4112_v62 }
 0x3be   :  { %v758_v48 = vpop.xlane.xlu0 %757 }
 0x3bf   :  { %v577_v49 = vpack.c.bf16 %v576_v47, %v576_v47  ;;  %3626 = vrcp.f32 %v758_v48 }
 0x3c1   :  { %2911 = vmatmul.msk.bf16.vlgmr.msra.gmra.mxu3 %vm504_vm5, %v577_v49 }
 0x3c5   :  { %v3627_v50 = vpop.eup %3626 }
 0x3c6   :  { %v760_v45 = vmul.f32 %v3627_v50, %v3613_v8  ;;  %v689_v51 = vpop.xlane.xlu0 %688  ;;  %v826_v52 = vpop.permute.xlu1 %825 }
 0x3c7   :  { %3628 = vrcp.f32 %v689_v51  ;;  %v831_v53 = vsel %vm520_vm4, %v826_v52, 0 }
 0x3c8   :  { %v761_v54 = vpack.c.bf16 %v760_v45, %v760_v45  ;;  %840 = vmatpush.bf16.msra.mxu3 %v831_v53 }
 0x3ca   :  { %2917 = vmatmul.msk.bf16.vlgmr.msra.gmra.mxu1 %vm504_vm5, %v761_v54 }
 0x3cc   :  { %v4144_v55 = vpop.f32.mrf.mxu3 }
 0x3cd   :  { %v3629_v56 = vpop.eup %3628 }
 0x3ce   :  { %v691_v57 = vmul.f32 %v3629_v56, %v4120_v13  ;;  %v3591_v56 = vld [vmem:[%s4387_s6] ss:$0 sm:$0xff] }
 0x3d0   :  { %v692_v58 = vpack.c.bf16 %v691_v57, %v691_v57 }
 0x3d2   :  { %2915 = vmatmul.msk.bf16.vlgmr.msrb.gmra.mxu3 %vm504_vm5, %v692_v58 }
 0x3d4   :  { %v535_v59 = vpop.f32.mrf.mxu3 }
 0x3d5   :  { %v818_v60 = vpop.xlane.xlu2 %817 }
 0x3d6   :  { %3630 = vrcp.f32 %v818_v60 }
 0x3d9   :  { %v938_v61 = vpop.permute.xlu0 %937 }
 0x3da   :  { %v943_v62 = vsel %vm520_vm4, %v938_v61, 0 }
 0x3db   :  { %952 = vmatpush.bf16.msrb.mxu3 %v943_v62  ;;  %v3907_v62 = vmov 128.0  }
 0x3dc   :  { %v3631_v63 = vpop.eup %3630 }
 0x3dd   :  { %v820_v0 = vmul.f32 %v3631_v63, %v3617_v20  ;;  %v877_v1 = vpop.xlane.xlu2 %876 }
 0x3de   :  { %3632 = vrcp.f32 %v877_v1 }
 0x3df   :  { %v821_v2 = vpack.c.bf16 %v820_v0, %v820_v0 }
 0x3e2   :  { %2919 = vmatmul.msk.bf16.vlgmr.msra.gmra.mxu3 %vm504_vm5, %v821_v2 }
 0x3e4   :  { %v3633_v3 = vpop.eup %3632 }
 0x3e5   :  { %v879_v4 = vmul.f32 %v3633_v3, %v4126_v23  ;;  %v882_v5 = vpop.permute.xlu2 %881  ;;  %v3433_v23 = vld [vmem:[#allocation7 + $0x30] sm:$0xff] }
 0x3e6   :  { %v887_v6 = vsel %vm520_vm4, %v882_v5, 0  ;;  %1043 = vmatpush.bf16.msra.mxu0 %v3433_v23  ;;  %v3445_v23 = vld [vmem:[#allocation10 + $0x54] sm:$0xf] }
 0x3e7   :  { %v880_v7 = vpack.c.bf16 %v879_v4, %v879_v4  ;;  %896 = vmatpush.bf16.msrb.mxu1 %v887_v6 }
 0x3ea   :  { %2921 = vmatmul.msk.bf16.vlgmr.msrb.gmra.mxu1 %vm504_vm5, %v880_v7  ;;  %1044 = vmatpush.bf16.msra.mxu0 %v3432_v25  ;;  %v3000_v25 = vld [vmem:[#allocation10 + $0x58] sm:$0xf0] }
 0x3ee   :  { %1045 = vmatpush.bf16.msra.mxu0 %v3431_v27  ;;  %v2990_v27 = vld [vmem:[#allocation10 + $0x40] sm:$0xf] }
 0x3f1   :  { %v933_v8 = vpop.xlane.xlu1 %932 }
 0x3f2   :  { %3634 = vrcp.f32 %v933_v8  ;;  %1046 = vmatpush.bf16.msra.mxu0 %v3430_v28  ;;  %v3444_v28 = vld [vmem:[#allocation10 + $0x44] sm:$0xf0] }
 0x3f3   :  { %3636 = vrcp.f32 %v3907_v62 }
 0x3f6   :  { %1047 = vmatpush.bf16.msra.mxu0 %v3429_v31  ;;  %v3443_v31 = vld [vmem:[#allocation10 + $0x44] sm:$0xf] }
 0x3f8   :  { %v3635_v9 = vpop.eup %3634 }
 0x3f9   :  { %v935_v10 = vmul.f32 %v3635_v9, %v3621_v38  ;;  %v3427_v38 = vld [vmem:[#allocation7] sm:$0xff]  ;;  %v3637_v63 = vpop.eup %3636 }
 0x3fa   :  { %1048 = vmatpush.bf16.msra.mxu0 %v3428_v37  ;;  %v1065_v0 = vmul.f32 128.0, %v3637_v63  ;;  %vm1069_vm8 = vweird.f32 %v3637_v63  ;;  %v2982_v37 = vld [vmem:[#allocation10 + $0x30] sm:$0xf] }
 0x3fb   :  { %v936_v11 = vpack.c.bf16 %v935_v10, %v935_v10 }
 0x3fc   :  { %v1066_v1 = vsub.f32 1.0, %v1065_v0  ;;  %v3458_v0 = vld [vmem:[#allocation11 + $0x38] sm:$0xff] }
 0x3fd   :  { %2923 = vmatmul.msk.bf16.vlgmr.msrb.gmra.mxu3 %vm504_vm5, %v936_v11  ;;  %v3014_v11 = vld [vmem:[#allocation10 + $0x70] sm:$0xf] }
 0x3fe   :  { %1049 = vmatpush.bf16.msra.mxu0 %v3427_v38  ;;  %v1067_v2 = vmul.f32 %v3637_v63, %v1066_v1  ;;  %v3442_v38 = vld [vmem:[#allocation10 + $0x34] sm:$0xf0]  ;;  %1386 = vmatpush.bf16.msra.mxu3 %v3458_v0 }
 0x3ff   :  { %v3466_v1 = vld [vmem:[#allocation11 + $0x78] sm:$0xff] }
 0x400   :  { %v1068_v3 = vadd.f32 %v3637_v63, %v1067_v2 }
 0x402   :  { %v4169_v4 = vsel %vm1069_vm8, %v3637_v63, %v1068_v3  ;;  %1400 = vmatpush.bf16.msrb.mxu0 %v3466_v1 }
 0x437   :  { %v654_v12 = vpop.f32.mrf.mxu1 }
 0x43f   :  { %v656_v13 = vpop.f32.mrf.mxu1 }
 0x440   :  { %v3449_v13 = vld [vmem:[#allocation10 + $0x74] sm:$0xf] }
 0x444   :  { %v598_v14 = vpop.f32.mrf.mxu3 }
 0x447   :  { %v777_v33 = vpop.f32.mrf.mxu1 }
 0x44c   :  { %v600_v35 = vpop.f32.mrf.mxu3 }
 0x44f   :  { %v779_v15 = vpop.f32.mrf.mxu1 }
 0x450   :  { %v3006_v15 = vld [vmem:[#allocation10 + $0x60] sm:$0xf] }
 0x455   :  { %v710_v16 = vpop.f32.mrf.mxu3 }
 0x45d   :  { %v712_v17 = vpop.f32.mrf.mxu3 }
 0x45e   :  { %v3447_v17 = vld [vmem:[#allocation10 + $0x64] sm:$0xf] }
 0x465   :  { %v842_v18 = vpop.f32.mrf.mxu3 }
 0x466   :  { %v3561_v19 = vpack.i.bf16 %v842_v18, %v598_v14 }
 0x467   :  { %v898_v20 = vpop.f32.mrf.mxu1 }
 0x468   :  { %v3566_v21 = vpack.i.bf16 %v898_v20, %v654_v12  ;;  %3562 = vrot.lane.b32.xlu1 %v3561_v19, %s3905_s2  ;;  %v3450_v12 = vld [vmem:[#allocation10 + $0x74] sm:$0xf0]  ;;  %v3008_v19 = vld [vmem:[#allocation10 + $0x68] sm:$0xf0] }
 0x469   :  { %v3015_v14 = vor.u32 %v3450_v12, %v3014_v11  ;;  %v3011_v20 = vor.u32 %v3447_v17, %v3008_v19  ;;  %v3464_v11 = vld [vmem:[#allocation11 + $0x68] sm:$0xff] }
 0x46a   :  { %3567 = vrot.lane.b32.xlu0 %v3566_v21, %s3895_s26  ;;  %v2998_v21 = vld [vmem:[#allocation10 + $0x50] sm:$0xf] }
 0x46b   :  { %1220 = vmatpush.bf16.msra.mxu1 %v3015_v14  ;;  %v3455_v14 = vld [vmem:[#allocation11 + $0x20] sm:$0xff] }
 0x46d   :  { %v844_v24 = vpop.f32.mrf.mxu3 }
 0x46e   :  { %v2999_v24 = vor.u32 %v3446_v22, %v2998_v21  ;;  %v3592_v22 = vld [vmem:[%s4388_s7] ss:$0 sm:$0xff] }
 0x46f   :  { %v900_v26 = vpop.f32.mrf.mxu1 }
 0x470   :  { %v3003_v26 = vor.u32 %v3445_v23, %v3000_v25 }
 0x480   :  { %v954_v32 = vpop.f32.mrf.mxu3 }
 0x481   :  { %v3571_v34 = vpack.i.bf16 %v954_v32, %v710_v16  ;;  %v3448_v16 = vld [vmem:[#allocation10 + $0x64] sm:$0xf0]  ;;  %v2991_v32 = vor.u32 %v3444_v28, %v2990_v27  ;;  %v3593_v27 = vld [vmem:[%s4389_s8] ss:$0 sm:$0xff] }
 0x482   :  { %v3007_v18 = vor.u32 %v3448_v16, %v3006_v15 }
 0x483   :  { %3572 = vrot.lane.b32.xlu2 %v3571_v34, %s3906_s22  ;;  %v2992_v34 = vld [vmem:[#allocation10 + $0x48] sm:$0xf0] }
 0x484   :  { %1221 = vmatpush.bf16.msra.mxu1 %v3007_v18 }
 0x488   :  { %v956_v36 = vpop.f32.mrf.mxu3  ;;  %1222 = vmatpush.bf16.msra.mxu1 %v2999_v24 }
 0x489   :  { %v2995_v36 = vor.u32 %v3443_v31, %v2992_v34 }
 0x48c   :  { %1223 = vmatpush.bf16.msra.mxu1 %v2991_v32 }
 0x4da   :  { %v3563_v39 = vpop.permute.xlu1 %3562 }
 0x4db   :  { %v3565_v40 = vunpack.i.h.bf16 %v3563_v39  ;;  %v3564_v41 = vunpack.i.l.bf16 %v3563_v39  ;;  %v3441_v39 = vld [vmem:[#allocation10 + $0x34] sm:$0xf] }
 0x4dc   :  { %v3568_v42 = vpop.permute.xlu0 %3567 }
 0x4dd   :  { %v970_v43 = vsel %vm484_vm3, %v777_v33, %v3565_v40  ;;  %v726_v44 = vsel %vm484_vm3, %v4144_v55, %v3564_v41  ;;  %v3570_v46 = vunpack.i.h.bf16 %v3568_v42  ;;  %v3569_v47 = vunpack.i.l.bf16 %v3568_v42  ;;  %v3573_v48 = vpop.permute.xlu2 %3572  ;;  %v3016_v33 = vld [vmem:[#allocation10 + $0x78] sm:$0xf0] }
 0x4de   :  { %v3575_v49 = vunpack.i.h.bf16 %v3573_v48  ;;  %v3574_v50 = vunpack.i.l.bf16 %v3573_v48  ;;  %v3019_v35 = vor.u32 %v3449_v13, %v3016_v33  ;;  %v2983_v40 = vor.u32 %v3442_v38, %v2982_v37  ;;  %v2984_v41 = vld [vmem:[#allocation10 + $0x38] sm:$0xf0]  ;;  %v2976_v48 = vld [vmem:[#allocation10 + $0x28] sm:$0xf0]  ;;  %v3453_v37 = vld [vmem:[#allocation11 + $0x10] sm:$0xff] }
 0x4df   :  { %v971_v45 = vsel %vm727_vm6, %v970_v43, %v3570_v46  ;;  %v728_v51 = vsel %vm727_vm6, %v726_v44, %v3569_v47  ;;  %v2987_v42 = vor.u32 %v3441_v39, %v2984_v41  ;;  %v2974_v43 = vld [vmem:[#allocation10 + $0x20] sm:$0xf]  ;;  %v3440_v44 = vld [vmem:[#allocation10 + $0x24] sm:$0xf0]  ;;  %v3439_v46 = vld [vmem:[#allocation10 + $0x24] sm:$0xf] }
 0x4e0   :  { %v972_v52 = vsel %vm729_vm7, %v971_v45, %v3575_v49  ;;  %v730_v53 = vsel %vm729_vm7, %v728_v51, %v3574_v50  ;;  %1234 = vmatpush.bf16.msra.mxu2 %v3019_v35  ;;  %1224 = vmatpush.bf16.msra.mxu1 %v2983_v40  ;;  %v2975_v47 = vor.u32 %v3440_v44, %v2974_v43  ;;  %v2966_v50 = vld [vmem:[#allocation10 + $0x10] sm:$0xf]  ;;  %v3438_v45 = vld [vmem:[#allocation10 + $0x14] sm:$0xf0]  ;;  %v3437_v51 = vld [vmem:[#allocation10 + $0x14] sm:$0xf] }
 0x4e1   :  { %v973_v54 = vpack.c.bf16 %v972_v52, %v730_v53  ;;  %v2979_v49 = vor.u32 %v3439_v46, %v2976_v48  ;;  %v2967_v52 = vor.u32 %v3438_v45, %v2966_v50  ;;  %v2968_v53 = vld [vmem:[#allocation10 + $0x18] sm:$0xf0]  ;;  %v3461_v39 = vld [vmem:[#allocation11 + $0x50] sm:$0xff]  ;;  %v3451_v40 = vld [vmem:[#allocation11] sm:$0xff] }
 0x4e2   :  { %v3462_v38 = vld [vmem:[#allocation11 + $0x58] sm:$0xff]  ;;  %v3460_v41 = vld [vmem:[#allocation11 + $0x48] sm:$0xff] }
 0x4e3   :  { %1050 = vmatmul.bf16.vlgmr.msra.gmra.mxu0 %v973_v54  ;;  %v2958_v54 = vld [vmem:[#allocation10] sm:$0xf]  ;;  %v1134_v43 = vld [vmem:[%s4393_s12] sm:$0x3] }
 0x4e4   :  { %1235 = vmatpush.bf16.msra.mxu2 %v3011_v20  ;;  %1225 = vmatpush.bf16.msra.mxu1 %v2975_v47  ;;  %v1136_v46 = vperm.slane %v1134_v43, 0  ;;  %v1137_v50 = vperm.slane %v1134_v43, 1  ;;  %v3135_v43 = vld [vmem:[#allocation5 + $0x120] sm:$0xf] }
 0x4e8   :  { %1236 = vmatpush.bf16.msra.mxu2 %v3003_v26  ;;  %1226 = vmatpush.bf16.msra.mxu1 %v2967_v52 }
 0x4ec   :  { %1237 = vmatpush.bf16.msra.mxu2 %v2995_v36  ;;  %v3463_v36 = vld [vmem:[#allocation11 + $0x60] sm:$0xff] }
 0x4f0   :  { %1238 = vmatpush.bf16.msra.mxu2 %v2987_v42  ;;  %v3459_v42 = vld [vmem:[#allocation11 + $0x40] sm:$0xff] }
 0x4f4   :  { %1239 = vmatpush.bf16.msra.mxu2 %v2979_v49 }
 0x560   :  { %v1051_v55 = vpop.f32.mrf.mxu0 }
 0x561   :  { %v1052_v57 = vadd.f32 %v3591_v56, %v1051_v55 }
 0x563   :  { %v1056_v58 = vadd.f32 %v1052_v57, %v4044_v29  ;;  %v2971_v57 = vor.u32 %v3437_v51, %v2968_v53 }
 0x565   :  { %1060 = vadd.xlane.f32.xlu0 %v1056_v58  ;;  %1240 = vmatpush.bf16.msra.mxu2 %v2971_v57 }
 0x568   :  { %v1053_v59 = vpop.f32.mrf.mxu0 }
 0x569   :  { %v1054_v60 = vadd.f32 %v3591_v56, %v1053_v59  ;;  %v3436_v56 = vld [vmem:[#allocation10 + $0x4] sm:$0xf0]  ;;  %v2960_v59 = vld [vmem:[#allocation10 + $0x8] sm:$0xf0] }
 0x56b   :  { %v1057_v61 = vadd.f32 %v1054_v60, %v4046_v30 }
 0x56d   :  { %1062 = vadd.xlane.f32.xlu2 %v1057_v61 }
 0x5d8   :  { %v1061_v5 = vpop.xlane.xlu0 %1060 }
 0x5d9   :  { %v1071_v6 = vmul.f32 %v4169_v4, %v1061_v5  ;;  %v3457_v5 = vld [vmem:[#allocation11 + $0x30] sm:$0xff] }
 0x5da   :  { %1387 = vmatpush.bf16.msra.mxu3 %v3457_v5 }
 0x5db   :  { %v4172_v29 = vsub.f32 %v1056_v58, %v1071_v6  ;;  %v3435_v58 = vld [vmem:[#allocation10 + $0x4] sm:$0xf]  ;;  %v3465_v6 = vld [vmem:[#allocation11 + $0x70] sm:$0xff] }
 0x5dc   :  { %v2963_v62 = vor.u32 %v3435_v58, %v2960_v59  ;;  %1401 = vmatpush.bf16.msrb.mxu0 %v3465_v6 }
 0x5dd   :  { %v1075_v7 = vmul.f32 %v4172_v29, %v4172_v29 }
 0x5de   :  { %1241 = vmatpush.bf16.msra.mxu2 %v2963_v62 }
 0x5df   :  { %1077 = vadd.xlane.f32.xlu1 %v1075_v7 }
 0x5e0   :  { %v1063_v30 = vpop.xlane.xlu2 %1062  ;;  %1402 = vmatpush.bf16.msrb.mxu0 %v3464_v11 }
 0x5e1   :  { %v1072_v8 = vmul.f32 %v4169_v4, %v1063_v30 }
 0x5e3   :  { %v4177_v9 = vsub.f32 %v1057_v61, %v1072_v8  ;;  %v2959_v61 = vor.u32 %v3436_v56, %v2958_v54 }
 0x5e4   :  { %1403 = vmatpush.bf16.msrb.mxu0 %v3463_v36  ;;  %v3483_v36 = vld [vmem:[#allocation5 + $0x140] sm:$0xf0] }
 0x5e5   :  { %v1076_v10 = vmul.f32 %v4177_v9, %v4177_v9  ;;  %1227 = vmatpush.bf16.msra.mxu1 %v2959_v61 }
 0x5e7   :  { %1079 = vadd.xlane.f32.xlu0 %v1076_v10  ;;  %v3456_v10 = vld [vmem:[#allocation11 + $0x28] sm:$0xff] }
 0x5e8   :  { %1388 = vmatpush.bf16.msra.mxu3 %v3456_v10  ;;  %1404 = vmatpush.bf16.msrb.mxu0 %v3462_v38 }
 0x5ec   :  { %1389 = vmatpush.bf16.msra.mxu3 %v3455_v14  ;;  %1405 = vmatpush.bf16.msrb.mxu0 %v3461_v39  ;;  %v3155_v39 = vld [vmem:[#allocation5 + $0x140] sm:$0xf] }
 0x5f0   :  { %1406 = vmatpush.bf16.msrb.mxu0 %v3460_v41 }
 0x5f4   :  { %1407 = vmatpush.bf16.msrb.mxu0 %v3459_v42 }
 0x652   :  { %v1078_v55 = vpop.xlane.xlu1 %1077 }
 0x653   :  { %v1081_v60 = vmul.f32 %v1078_v55, %v4169_v4 }
 0x655   :  { %v1083_v63 = vadd.f32 1e-05, %v1081_v60  ;;  %v3594_v60 = vld [vmem:[%s4395_s14] ss:$0 sm:$0xff] }
 0x657   :  { %3638 = vrsqrt.f32 %v1083_v63  ;;  %vm1091_vm10 = vweird.f32 %v1083_v63 }
 0x65a   :  { %v1080_v2 = vpop.xlane.xlu0 %1079 }
 0x65b   :  { %v1082_v3 = vmul.f32 %v1080_v2, %v4169_v4 }
 0x65d   :  { %v3639_v7 = vpop.eup %3638  ;;  %v1084_v30 = vadd.f32 1e-05, %v1082_v3 }
 0x65e   :  { %v1086_v8 = vmul.f32 %v3639_v7, %v1083_v63  ;;  %vm1092_vm9 = vweird.f32 %v3639_v7 }
 0x65f   :  { %3640 = vrsqrt.f32 %v1084_v30  ;;  %vm1093_vm11 = vmor %vm1091_vm10, %vm1092_vm9  ;;  %vm1101_vm13 = vweird.f32 %v1084_v30 }
 0x660   :  { %v1087_v12 = vmul.f32 %v3639_v7, %v1086_v8 }
 0x662   :  { %v1088_v13 = vmul.f32 0.5, %v1087_v12 }
 0x664   :  { %v1089_v33 = vsub.f32 1.5, %v1088_v13 }
 0x665   :  { %v3641_v35 = vpop.eup %3640 }
 0x666   :  { %v1090_v15 = vmul.f32 %v3639_v7, %v1089_v33  ;;  %v1096_v16 = vmul.f32 %v3641_v35, %v1084_v30  ;;  %vm1102_vm12 = vweird.f32 %v3641_v35 }
 0x667   :  { %vm1103_vm14 = vmor %vm1101_vm13, %vm1102_vm12 }
 0x668   :  { %v1097_v17 = vmul.f32 %v3641_v35, %v1096_v16  ;;  %v1094_v18 = vsel %vm1093_vm11, %v3639_v7, %v1090_v15  ;;  %v3489_v15 = vld [vmem:[#allocation5 + $0x170] sm:$0xf0]  ;;  %v3488_v16 = vld [vmem:[#allocation5 + $0x16c] sm:$0xf] }
 0x669   :  { %v1105_v21 = vmul.f32 %v1094_v18, %v4172_v29  ;;  %v3454_v29 = vld [vmem:[#allocation11 + $0x18] sm:$0xff] }
 0x66a   :  { %v1098_v19 = vmul.f32 0.5, %v1097_v17  ;;  %1390 = vmatpush.bf16.msra.mxu3 %v3454_v29  ;;  %v3173_v18 = vld [vmem:[#allocation5 + $0x174] sm:$0xf0] }
 0x66b   :  { %v1110_v26 = vmul.f32 %v3592_v22, %v1105_v21  ;;  %v3176_v21 = vor.u32 %v3488_v16, %v3173_v18  ;;  %v3147_v29 = vld [vmem:[#allocation5 + $0x138] sm:$0xf]  ;;  %v3468_v18 = vld [vmem:[#allocation5 + $0xc8] sm:$0xf0] }
 0x66c   :  { %v1099_v20 = vsub.f32 1.5, %v1098_v19  ;;  %v3179_v19 = vld [vmem:[#allocation5 + $0x170] sm:$0xf]  ;;  %v3148_v38 = vor.u32 %v3483_v36, %v3147_v29 }
 0x66d   :  { %v1115_v31 = vadd.f32 %v3593_v27, %v1110_v26  ;;  %1653 = vmatpush.bf16.msrb.mxu2 %v3176_v21 }
 0x66e   :  { %v1100_v23 = vmul.f32 %v3641_v35, %v1099_v20  ;;  %1391 = vmatpush.bf16.msra.mxu3 %v3453_v37  ;;  %v3490_v20 = vld [vmem:[#allocation5 + $0x178] sm:$0xf0] }
 0x66f   :  { %v3482_v37 = vld [vmem:[#allocation5 + $0x13c] sm:$0xf] }
 0x670   :  { %v1104_v24 = vsel %vm1103_vm14, %v3641_v35, %v1100_v23  ;;  %v3171_v35 = vld [vmem:[#allocation5 + $0x168] sm:$0xf]  ;;  %v3159_v23 = vld [vmem:[#allocation5 + $0x150] sm:$0xf] }
 0x671   :  { %v1106_v25 = vmul.f32 %v1104_v24, %v4177_v9  ;;  %v3452_v9 = vld [vmem:[#allocation11 + $0x8] sm:$0xff]  ;;  %v3172_v17 = vor.u32 %v3489_v15, %v3171_v35  ;;  %v3486_v24 = vld [vmem:[#allocation5 + $0x158] sm:$0xf0] }
 0x672   :  { %1392 = vmatpush.bf16.msra.mxu3 %v3452_v9  ;;  %v3160_v26 = vor.u32 %v3486_v24, %v3159_v23  ;;  %v3149_v9 = vld [vmem:[#allocation5 + $0x144] sm:$0xf0]  ;;  %v3469_v24 = vld [vmem:[#allocation5 + $0xd0] sm:$0xf0] }
 0x673   :  { %v1111_v28 = vmul.f32 %v3592_v22, %v1106_v25  ;;  %v3180_v22 = vor.u32 %v3490_v20, %v3179_v19  ;;  %1639 = vmatpush.bf16.msrb.mxu1 %v3172_v17  ;;  %v3485_v25 = vld [vmem:[#allocation5 + $0x154] sm:$0xf]  ;;  %v3152_v41 = vor.u32 %v3482_v37, %v3149_v9  ;;  %v3087_v17 = vld [vmem:[#allocation5 + $0xc0] sm:$0xf]  ;;  %v3467_v19 = vld [vmem:[#allocation5 + $0xc4] sm:$0xf] }
 0x674   :  { %v3088_v21 = vor.u32 %v3468_v18, %v3087_v17  ;;  %v3095_v23 = vld [vmem:[#allocation5 + $0xc8] sm:$0xf] }
 0x675   :  { %v1116_v32 = vadd.f32 %v3593_v27, %v1111_v28  ;;  %v3161_v27 = vld [vmem:[#allocation5 + $0x15c] sm:$0xf0]  ;;  %v3167_v28 = vld [vmem:[#allocation5 + $0x158] sm:$0xf] }
 0x676   :  { %1393 = vmatpush.bf16.msra.mxu3 %v3451_v40  ;;  %v3484_v40 = vld [vmem:[#allocation5 + $0x148] sm:$0xf0] }
 0x677   :  { %v1117_v34 = vpack.c.bf16 %v1116_v32, %v1115_v31  ;;  %1640 = vmatpush.bf16.msrb.mxu1 %v3160_v26  ;;  %v3156_v42 = vor.u32 %v3484_v40, %v3155_v39  ;;  %v3096_v26 = vor.u32 %v3469_v24, %v3095_v23 }
 0x679   :  { %1228 = vmatmul.bf16.vlgmr.msra.gmra.mxu1 %v1117_v34  ;;  %1242 = vmatmul.bf16.vlgmr.msra.gmra.mxu2 %v1117_v34 }
 0x67a   :  { %1667 = vmatpush.bf16.msrb.mxu3 %v3180_v22  ;;  %v3089_v22 = vld [vmem:[#allocation5 + $0xcc] sm:$0xf0] }
 0x67b   :  { %1641 = vmatpush.bf16.msrb.mxu1 %v3148_v38 }
 0x6f6   :  { %v1229_v44 = vpop.f32.mrf.mxu1 }
 0x6f7   :  { %v1230_v48 = vadd.f32 %v1229_v44, %v1136_v46  ;;  %v3480_v44 = vld [vmem:[#allocation5 + $0x128] sm:$0xf0] }
 0x6f9   :  { %v1248_v51 = vmax.f32 %v1230_v48, 0.0  ;;  %v3137_v48 = vld [vmem:[#allocation5 + $0x12c] sm:$0xf0] }
 0x6fc   :  { %v1243_v47 = vpop.f32.mrf.mxu2 }
 0x6fd   :  { %v1244_v53 = vadd.f32 %v1243_v47, %v1137_v50  ;;  %v3136_v47 = vor.u32 %v3480_v44, %v3135_v43 }
 0x6fe   :  { %v1231_v49 = vpop.f32.mrf.mxu1 }
 0x6ff   :  { %v1232_v45 = vadd.f32 %v1231_v49, %v1136_v46  ;;  %v1249_v57 = vmax.f32 %v1244_v53, 0.0  ;;  %v3479_v46 = vld [vmem:[#allocation5 + $0x124] sm:$0xf]  ;;  %v3143_v49 = vld [vmem:[#allocation5 + $0x128] sm:$0xf]  ;;  %1642 = vmatpush.bf16.msrb.mxu1 %v3136_v47 }
 0x700   :  { %v3477_v53 = vld [vmem:[#allocation5 + $0x110] sm:$0xf0]  ;;  %v3595_v47 = vld [vmem:[#allocation8] ss:$0 sm:$0xff] }
 0x701   :  { %v1250_v52 = vmax.f32 %v1232_v45, 0.0  ;;  %v3140_v45 = vor.u32 %v3479_v46, %v3137_v48 }
 0x703   :  { %v1252_v54 = vpack.c.bf16 %v1250_v52, %v1248_v51  ;;  %v3123_v52 = vld [vmem:[#allocation5 + $0x108] sm:$0xf] }
 0x704   :  { %v1245_v56 = vpop.f32.mrf.mxu2 }
 0x705   :  { %v1246_v55 = vadd.f32 %v1245_v56, %v1137_v50  ;;  %1394 = vmatmul.bf16.vlgmr.msra.gmra.mxu3 %v1252_v54  ;;  %v3481_v50 = vld [vmem:[#allocation5 + $0x130] sm:$0xf0]  ;;  %v3476_v54 = vld [vmem:[#allocation5 + $0x10c] sm:$0xf]  ;;  %v3124_v56 = vor.u32 %v3477_v53, %v3123_v52 }
 0x706   :  { %v3144_v51 = vor.u32 %v3481_v50, %v3143_v49 }
 0x707   :  { %v1251_v58 = vmax.f32 %v1246_v55, 0.0  ;;  %v3125_v55 = vld [vmem:[#allocation5 + $0x114] sm:$0xf0]  ;;  %1643 = vmatpush.bf16.msrb.mxu1 %v3124_v56 }
 0x709   :  { %v1253_v59 = vpack.c.bf16 %v1251_v58, %v1249_v57  ;;  %v3131_v57 = vld [vmem:[#allocation5 + $0x110] sm:$0xf]  ;;  %v3478_v58 = vld [vmem:[#allocation5 + $0x118] sm:$0xf0] }
 0x70b   :  { %1408 = vmatmul.bf16.vlgmr.msrb.gmra.mxu0 %v1253_v59  ;;  %v3128_v59 = vor.u32 %v3476_v54, %v3125_v55 }
 0x788   :  { %v1395_v61 = vpop.f32.mrf.mxu3  ;;  %v1409_v62 = vpop.f32.mrf.mxu0 }
 0x789   :  { %v1396_v63 = vadd.f32 %v3594_v60, %v1395_v61  ;;  %v3111_v61 = vld [vmem:[#allocation5 + $0xf0] sm:$0xf] }
 0x78b   :  { %v1410_v0 = vadd.f32 %v1409_v62, %v1396_v63  ;;  %v3474_v62 = vld [vmem:[#allocation5 + $0xf8] sm:$0xf0]  ;;  %v3473_v63 = vld [vmem:[#allocation5 + $0xf4] sm:$0xf] }
 0x78d   :  { %v1414_v1 = vadd.f32 %v1410_v0, %v1115_v31  ;;  %v3487_v31 = vld [vmem:[#allocation5 + $0x160] sm:$0xf0]  ;;  %v3112_v0 = vor.u32 %v3474_v62, %v3111_v61 }
 0x78e   :  { %v3168_v34 = vor.u32 %v3487_v31, %v3167_v28 }
 0x78f   :  { %1418 = vadd.xlane.f32.xlu2 %v1414_v1  ;;  %1644 = vmatpush.bf16.msrb.mxu1 %v3112_v0 }
 0x790   :  { %v1397_v2 = vpop.f32.mrf.mxu3  ;;  %v1411_v5 = vpop.f32.mrf.mxu0  ;;  %1668 = vmatpush.bf16.msrb.mxu3 %v3168_v34 }
 0x791   :  { %v1398_v3 = vadd.f32 %v3594_v60, %v1397_v2  ;;  %v3132_v60 = vor.u32 %v3478_v58, %v3131_v57  ;;  %v3119_v2 = vld [vmem:[#allocation5 + $0xf8] sm:$0xf] }
 0x793   :  { %v1412_v6 = vadd.f32 %v1411_v5, %v1398_v3  ;;  %v3475_v3 = vld [vmem:[#allocation5 + $0x100] sm:$0xf0] }
 0x794   :  { %1669 = vmatpush.bf16.msrb.mxu3 %v3156_v42 }
 0x795   :  { %v1415_v7 = vadd.f32 %v1412_v6, %v1116_v32  ;;  %v3164_v32 = vor.u32 %v3485_v25, %v3161_v27  ;;  %v3120_v6 = vor.u32 %v3475_v3, %v3119_v2  ;;  %v3092_v25 = vor.u32 %v3467_v19, %v3089_v22 }
 0x797   :  { %1420 = vadd.xlane.f32.xlu0 %v1415_v7  ;;  %1654 = vmatpush.bf16.msrb.mxu2 %v3164_v32 }
 0x798   :  { %1670 = vmatpush.bf16.msrb.mxu3 %v3144_v51  ;;  %v3596_v51 = vld [vmem:[%s4391_s10] ss:$0 sm:$0xff] }
 0x79b   :  { %1655 = vmatpush.bf16.msrb.mxu2 %v3152_v41 }
 0x79c   :  { %1671 = vmatpush.bf16.msrb.mxu3 %v3132_v60 }
 0x79f   :  { %1656 = vmatpush.bf16.msrb.mxu2 %v3140_v45 }
 0x7a0   :  { %1672 = vmatpush.bf16.msrb.mxu3 %v3120_v6 }
 0x7a3   :  { %1657 = vmatpush.bf16.msrb.mxu2 %v3128_v59 }
 0x802   :  { %v1419_v30 = vpop.xlane.xlu2 %1418 }
 0x803   :  { %v1422_v8 = vmul.f32 %v1419_v30, %v4169_v4  ;;  %v3471_v30 = vld [vmem:[#allocation5 + $0xe0] sm:$0xf0] }
 0x805   :  { %v4198_v10 = vsub.f32 %v1414_v1, %v1422_v8  ;;  %v3113_v1 = vld [vmem:[#allocation5 + $0xfc] sm:$0xf0]  ;;  %v3470_v8 = vld [vmem:[#allocation5 + $0xdc] sm:$0xf] }
 0x806   :  { %v3116_v5 = vor.u32 %v3473_v63, %v3113_v1 }
 0x807   :  { %v1426_v11 = vmul.f32 %v4198_v10, %v4198_v10 }
 0x808   :  { %1658 = vmatpush.bf16.msrb.mxu2 %v3116_v5 }
 0x809   :  { %1428 = vadd.xlane.f32.xlu1 %v1426_v11 }
 0x80a   :  { %v1421_v12 = vpop.xlane.xlu0 %1420 }
 0x80b   :  { %v1423_v13 = vmul.f32 %v1421_v12, %v4169_v4  ;;  %v3101_v12 = vld [vmem:[#allocation5 + $0xe4] sm:$0xf0] }
 0x80c   :  { %v3104_v15 = vor.u32 %v3470_v8, %v3101_v12 }
 0x80d   :  { %v4203_v14 = vsub.f32 %v1415_v7, %v1423_v13  ;;  %v3099_v7 = vld [vmem:[#allocation5 + $0xd8] sm:$0xf]  ;;  %v3107_v13 = vld [vmem:[#allocation5 + $0xe0] sm:$0xf] }
 0x80e   :  { %v3100_v11 = vor.u32 %v3471_v30, %v3099_v7  ;;  %1659 = vmatpush.bf16.msrb.mxu2 %v3104_v15 }
 0x80f   :  { %v1427_v33 = vmul.f32 %v4203_v14, %v4203_v14 }
 0x810   :  { %1645 = vmatpush.bf16.msrb.mxu1 %v3100_v11 }
 0x811   :  { %1430 = vadd.xlane.f32.xlu2 %v1427_v33  ;;  %v3472_v33 = vld [vmem:[#allocation5 + $0xe8] sm:$0xf0] }
 0x812   :  { %v3108_v16 = vor.u32 %v3472_v33, %v3107_v13  ;;  %1660 = vmatpush.bf16.msrb.mxu2 %v3092_v25 }
 0x814   :  { %1673 = vmatpush.bf16.msrb.mxu3 %v3108_v16  ;;  %1646 = vmatpush.bf16.msrb.mxu1 %v3088_v21 }
 0x818   :  { %1674 = vmatpush.bf16.msrb.mxu3 %v3096_v26 }
 0x87c   :  { %v1429_v35 = vpop.xlane.xlu1 %1428 }
 0x87d   :  { %v1432_v20 = vmul.f32 %v1429_v35, %v4169_v4 }
 0x87f   :  { %v1434_v27 = vadd.f32 1e-05, %v1432_v20 }
 0x881   :  { %3642 = vrsqrt.f32 %v1434_v27  ;;  %vm1442_vm0 = vweird.f32 %v1434_v27 }
 0x884   :  { %v1431_v28 = vpop.xlane.xlu2 %1430 }
 0x885   :  { %v1433_v31 = vmul.f32 %v1431_v28, %v4169_v4 }
 0x887   :  { %v3643_v32 = vpop.eup %3642  ;;  %v1435_v34 = vadd.f32 1e-05, %v1433_v31 }
 0x888   :  { %v1437_v29 = vmul.f32 %v3643_v32, %v1434_v27  ;;  %vm1443_vm15 = vweird.f32 %v3643_v32 }
 0x889   :  { %3644 = vrsqrt.f32 %v1435_v34  ;;  %vm1444_vm1 = vmor %vm1442_vm0, %vm1443_vm15  ;;  %vm1452_vm8 = vweird.f32 %v1435_v34 }
 0x88a   :  { %v1438_v36 = vmul.f32 %v3643_v32, %v1437_v29 }
 0x88c   :  { %v1439_v37 = vmul.f32 0.5, %v1438_v36 }
 0x88e   :  { %v1440_v38 = vsub.f32 1.5, %v1439_v37 }
 0x88f   :  { %v3645_v9 = vpop.eup %3644 }
 0x890   :  { %v1441_v39 = vmul.f32 %v3643_v32, %v1440_v38  ;;  %v1447_v40 = vmul.f32 %v3645_v9, %v1435_v34  ;;  %vm1453_vm2 = vweird.f32 %v3645_v9 }
 0x891   :  { %vm1454_vm9 = vmor %vm1452_vm8, %vm1453_vm2 }
 0x892   :  { %v1448_v41 = vmul.f32 %v3645_v9, %v1447_v40  ;;  %v1445_v42 = vsel %vm1444_vm1, %v3643_v32, %v1441_v39 }
 0x893   :  { %v1456_v46 = vmul.f32 %v1445_v42, %v4198_v10 }
 0x894   :  { %v1449_v43 = vmul.f32 0.5, %v1448_v41 }
 0x895   :  { %v1461_v45 = vmul.f32 %v3595_v47, %v1456_v46 }
 0x896   :  { %v1450_v44 = vsub.f32 1.5, %v1449_v43 }
 0x897   :  { %v4214_v53 = vadd.f32 %v3596_v51, %v1461_v45 }
 0x898   :  { %v1451_v48 = vmul.f32 %v3645_v9, %v1450_v44 }
 0x89a   :  { %v1455_v49 = vsel %vm1454_vm9, %v3645_v9, %v1451_v48 }
 0x89b   :  { %v1457_v50 = vmul.f32 %v1455_v49, %v4203_v14  ;;  %v4223_v14 = vld [vmem:[%s4385_s4 + $0x3] sm:$0x7] }
 0x89c   :  { %v1505_v56 = vperm.slane %v4223_v14, 0  ;;  %v1506_v59 = vperm.slane %v4223_v14, 1  ;;  %v1507_v60 = vperm.slane %v4223_v14, 2 }
 0x89d   :  { %v1462_v52 = vmul.f32 %v3595_v47, %v1457_v50 }
 0x89f   :  { %v4216_v54 = vadd.f32 %v3596_v51, %v1462_v52 }
 0x8a1   :  { %v1468_v10 = vpack.c.bf16 %v4216_v54, %v4214_v53 }
 0x8a3   :  { %1647 = vmatmul.bf16.vlgmr.msrb.gmra.mxu1 %v1468_v10  ;;  %1661 = vmatmul.bf16.vlgmr.msrb.gmra.mxu2 %v1468_v10 }
 0x8a4   :  { %1675 = vmatmul.bf16.vlgmr.msrb.gmra.mxu3 %v1468_v10 }
 0x920   :  { %v1648_v55 = vpop.f32.mrf.mxu1 }
 0x921   :  { %v1649_v57 = vadd.f32 %v1648_v55, %v1505_v56 }
 0x923   :  { %v1681_v58 = vpack.c.bf16 %v1649_v57, %v1649_v57 }
 0x925   :  { %v1738_v61 = vunpack.c.l.b16 %v1681_v58 }
 0x926   :  { %v1662_v62 = vpop.f32.mrf.mxu2 }
 0x927   :  { %v1739_v63 = vpack.c.b16 %v1738_v61, %v1738_v61  ;;  %v1663_v0 = vadd.f32 %v1662_v62, %v1506_v59  ;;  %v1676_v1 = vpop.f32.mrf.mxu3 }
 0x928   :  { %v1677_v2 = vadd.f32 %v1676_v1, %v1507_v60  ;;  %v1650_v3 = vpop.f32.mrf.mxu1 }
 0x929   :  { %v1683_v5 = vpack.c.bf16 %v1663_v0, %v1663_v0  ;;  %1740 = vrot.lane.b32.xlu1 %v1739_v63, %s3906_s22  ;;  %v1651_v8 = vadd.f32 %v1650_v3, %v1505_v56 }
 0x92a   :  { %v4231_v6 = vpack.c.bf16 %v1677_v2, %v1677_v2 }
 0x92b   :  { %v1691_v7 = vsel %vm484_vm3, %v1683_v5, 0  ;;  %v1743_v30 = vunpack.c.l.b16 %v1683_v5  ;;  %v1682_v33 = vpack.c.bf16 %v1651_v8, %v1651_v8 }
 0x92c   :  { %v1722_v11 = vsel %vm520_vm4, %v4231_v6, 0  ;;  %1700 = vmatpush.bf16.xpose.msra.mxu0 %v1691_v7  ;;  %v1779_v7 = vunpack.c.l.b16 %v4231_v6 }
 0x92d   :  { %v1744_v12 = vpack.c.b16 %v1743_v30, %v1743_v30  ;;  %1731 = vmatpush.bf16.msra.mxu1 %v1722_v11  ;;  %v1980_v15 = vunpack.c.l.b16 %v1682_v33 }
 0x92e   :  { %v1664_v13 = vpop.f32.mrf.mxu2  ;;  %v1780_v30 = vpack.c.b16 %v1779_v7, %v1779_v7 }
 0x92f   :  { %1860 = vrot.lane.b32.xlu2 %v1744_v12, %s3905_s2  ;;  %1745 = vrot.lane.b32.xlu0 %v1744_v12, %s3906_s22  ;;  %v1665_v35 = vadd.f32 %v1664_v13, %v1506_v59  ;;  %v1981_v17 = vpack.c.b16 %v1980_v15, %v1980_v15 }
 0x931   :  { %1804 = vrot.lane.b32.xlu1 %v1744_v12, %s3895_s26  ;;  %v1684_v16 = vpack.c.bf16 %v1665_v35, %v1665_v35 }
 0x933   :  { %3181 = vmatmul.msk.bf16.vlgmr.msra.gmra.mxu0 %vm484_vm3, %v1681_v58  ;;  %v1985_v18 = vunpack.c.l.b16 %v1684_v16  ;;  %v1933_v27 = vsel %vm484_vm3, %v1684_v16, 0 }
 0x935   :  { %v1986_v19 = vpack.c.b16 %v1985_v18, %v1985_v18 }
 0x937   :  { %1802 = vrot.lane.b32.xlu2 %v1739_v63, %s3895_s26  ;;  %1858 = vrot.lane.b32.xlu0 %v1739_v63, %s3905_s2 }
 0x939   :  { %1982 = vrot.lane.b32.xlu1 %v1981_v17, %s3906_s22 }
 0x93f   :  { %2100 = vrot.lane.b32.xlu2 %v1981_v17, %s3905_s2  ;;  %1987 = vrot.lane.b32.xlu0 %v1986_v19, %s3906_s22 }
 0x941   :  { %2046 = vrot.lane.b32.xlu1 %v1986_v19, %s3895_s26 }
 0x947   :  { %2102 = vrot.lane.b32.xlu0 %v1986_v19, %s3905_s2 }
 0x94f   :  { %2044 = vrot.lane.b32.xlu0 %v1981_v17, %s3895_s26 }
 0x989   :  { %v1861_v21 = vpop.permute.xlu2 %1860 }
 0x98a   :  { %v1866_v24 = vsel %vm484_vm3, %v1861_v21, 0 }
 0x991   :  { %v1803_v31 = vpop.permute.xlu2 %1802 }
 0x999   :  { %v2101_v43 = vpop.permute.xlu2 %2100 }
 0x99b   :  { %v1741_v20 = vpop.permute.xlu1 %1740 }
 0x9a1   :  { %v1746_v22 = vpop.permute.xlu0 %1745 }
 0x9a2   :  { %v1751_v23 = vsel %vm484_vm3, %v1746_v22, 0 }
 0x9a3   :  { %1760 = vmatpush.bf16.xpose.msra.mxu2 %v1751_v23  ;;  %v1805_v25 = vpop.permute.xlu1 %1804 }
 0x9a4   :  { %v1810_v26 = vsel %vm484_vm3, %v1805_v25, 0 }
 0x9a5   :  { %1819 = vmatpush.bf16.xpose.msrb.mxu0 %v1810_v26 }
 0x9a9   :  { %v1859_v28 = vpop.permute.xlu0 %1858 }
 0x9aa   :  { %3183 = vmatmul.msk.bf16.vlgmr.msra.gmra.mxu2 %vm484_vm3, %v1741_v20 }
 0x9ab   :  { %1875 = vmatpush.bf16.xpose.msrb.mxu2 %v1866_v24  ;;  %v1983_v32 = vpop.permute.xlu1 %1982 }
 0x9ac   :  { %3185 = vmatmul.msk.bf16.vlgmr.msrb.gmra.mxu0 %vm484_vm3, %v1803_v31 }
 0x9ad   :  { %1942 = vmatpush.bf16.xpose.msra.mxu0 %v1933_v27 }
 0x9b0   :  { %v1702_v34 = vpop.f32.mrf.mxu0 }
 0x9b1   :  { %v1988_v29 = vpop.permute.xlu0 %1987  ;;  %v1706_v36 = vsel %vm504_vm5, %v1702_v34, -inf }
 0x9b2   :  { %v1993_v37 = vsel %vm484_vm3, %v1988_v29, 0  ;;  %1707 = vmax.xlane.f32.xlu1 %v1706_v36 }
 0x9b3   :  { %2002 = vmatpush.bf16.xpose.msra.mxu2 %v1993_v37  ;;  %v2047_v38 = vpop.permute.xlu1 %2046 }
 0x9b4   :  { %v2052_v9 = vsel %vm484_vm3, %v2047_v38, 0  ;;  %v1678_v38 = vpop.f32.mrf.mxu3 }
 0x9b5   :  { %2061 = vmatpush.bf16.xpose.msrb.mxu0 %v2052_v9  ;;  %v1679_v9 = vadd.f32 %v1678_v38, %v1507_v60 }
 0x9b8   :  { %v1704_v39 = vpop.f32.mrf.mxu0 }
 0x9b9   :  { %v2103_v40 = vpop.permute.xlu0 %2102  ;;  %v1686_v39 = vpack.c.bf16 %v1679_v9, %v1679_v9 }
 0x9ba   :  { %v2108_v41 = vsel %vm484_vm3, %v2103_v40, 0  ;;  %3187 = vmatmul.msk.bf16.vlgmr.msrb.gmra.mxu2 %vm484_vm3, %v1859_v28 }
 0x9bb   :  { %2117 = vmatpush.bf16.xpose.msrb.mxu2 %v2108_v41  ;;  %v2021_v40 = vunpack.c.l.b16 %v1686_v39 }
 0x9bc   :  { %3189 = vmatmul.msk.bf16.vlgmr.msra.gmra.mxu0 %vm484_vm3, %v1682_v33 }
 0x9bd   :  { %v2022_v41 = vpack.c.b16 %v2021_v40, %v2021_v40 }
 0x9c1   :  { %v2045_v42 = vpop.permute.xlu0 %2044 }
 0x9ca   :  { %3191 = vmatmul.msk.bf16.vlgmr.msra.gmra.mxu2 %vm484_vm3, %v1983_v32 }
 0x9cc   :  { %3193 = vmatmul.msk.bf16.vlgmr.msrb.gmra.mxu0 %vm484_vm3, %v2045_v42 }
 0x9da   :  { %3195 = vmatmul.msk.bf16.vlgmr.msrb.gmra.mxu2 %vm484_vm3, %v2101_v43 }
 0xa25   :  { %v1708_v46 = vpop.xlane.xlu1 %1707 }
 0xa26   :  { %v1709_v47 = vsub.f32 %v1702_v34, %v1708_v46 }
 0xa28   :  { %v1710_v50 = vmul.f32 1.442695, %v1709_v47 }
 0xa29   :  { %v1821_v44 = vpop.f32.mrf.mxu0 }
 0xa2a   :  { %3646 = vpow2.f32 %v1710_v50  ;;  %v1825_v52 = vsel %vm504_vm5, %v1821_v44, -inf }
 0xa2d   :  { %v1762_v48 = vpop.f32.mrf.mxu2 }
 0xa2e   :  { %v1766_v49 = vsel %vm504_vm5, %v1762_v48, -inf }
 0xa2f   :  { %1767 = vmax.xlane.f32.xlu2 %v1766_v49 }
 0xa30   :  { %v3647_v55 = vpop.eup %3646 }
 0xa31   :  { %v1823_v45 = vpop.f32.mrf.mxu0  ;;  %v1712_v58 = vsel %vm504_vm5, %v3647_v55, 0.0 }
 0xa35   :  { %v1764_v51 = vpop.f32.mrf.mxu2 }
 0xa37   :  { %1826 = vmax.xlane.f32.xlu2 %v1825_v52 }
 0xa39   :  { %v1944_v10 = vpop.f32.mrf.mxu0 }
 0xa3a   :  { %v1948_v56 = vsel %vm504_vm5, %v1944_v10, -inf }
 0xa3b   :  { %1949 = vmax.xlane.f32.xlu0 %v1948_v56 }
 0xa3d   :  { %v1877_v57 = vpop.f32.mrf.mxu2 }
 0xa3e   :  { %v1881_v61 = vsel %vm504_vm5, %v1877_v57, -inf }
 0xa3f   :  { %1713 = vadd.xlane.f32.xlu2 %v1712_v58 }
 0xa41   :  { %v1946_v59 = vpop.f32.mrf.mxu0 }
 0xa43   :  { %1882 = vmax.xlane.f32.xlu0 %v1881_v61 }
 0xa45   :  { %v1879_v62 = vpop.f32.mrf.mxu2 }
 0xa49   :  { %v4268_v63 = vpop.f32.mrf.mxu0 }
 0xa4a   :  { %v2067_v0 = vsel %vm504_vm5, %v4268_v63, -inf }
 0xa4b   :  { %2068 = vmax.xlane.f32.xlu0 %v2067_v0 }
 0xa4d   :  { %v2004_v1 = vpop.f32.mrf.mxu2 }
 0xa4e   :  { %v2008_v2 = vsel %vm504_vm5, %v2004_v1, -inf }
 0xa4f   :  { %2009 = vmax.xlane.f32.xlu1 %v2008_v2 }
 0xa51   :  { %v2065_v3 = vpop.f32.mrf.mxu0 }
 0xa55   :  { %v2006_v5 = vpop.f32.mrf.mxu2 }
 0xa5d   :  { %v2119_v8 = vpop.f32.mrf.mxu2 }
 0xa5e   :  { %v2123_v11 = vsel %vm504_vm5, %v2119_v8, -inf }
 0xa5f   :  { %2124 = vmax.xlane.f32.xlu2 %v2123_v11  ;;  %1893 = vrot.lane.b32.xlu0 %v1780_v30, %s3905_s2 }
 0xa65   :  { %v2121_v12 = vpop.f32.mrf.mxu2 }
 0xaa2   :  { %v1768_v13 = vpop.xlane.xlu2 %1767 }
 0xaa3   :  { %v1769_v33 = vsub.f32 %v1762_v48, %v1768_v13 }
 0xaa5   :  { %v1770_v35 = vmul.f32 1.442695, %v1769_v33 }
 0xaa7   :  { %3648 = vpow2.f32 %v1770_v35 }
 0xaaa   :  { %v1827_v15 = vpop.xlane.xlu2 %1826 }
 0xaab   :  { %v1828_v16 = vsub.f32 %v1821_v44, %v1827_v15 }
 0xaad   :  { %v4276_v17 = vpop.eup %3648  ;;  %v1829_v18 = vmul.f32 1.442695, %v1828_v16 }
 0xaae   :  { %v1950_v19 = vpop.xlane.xlu0 %1949  ;;  %v1772_v6 = vsel %vm504_vm5, %v4276_v17, 0.0 }
 0xaaf   :  { %3650 = vpow2.f32 %v1829_v18  ;;  %v1951_v20 = vsub.f32 %v1944_v10, %v1950_v19  ;;  %1773 = vadd.xlane.f32.xlu1 %v1772_v6 }
 0xab1   :  { %v1952_v21 = vmul.f32 1.442695, %v1951_v20 }
 0xab2   :  { %v1714_v22 = vpop.xlane.xlu2 %1713 }
 0xab3   :  { %3652 = vpow2.f32 %v1952_v21 }
 0xab4   :  { %3654 = vrcp.f32 %v1714_v22 }
 0xab5   :  { %v3651_v23 = vpop.eup %3650 }
 0xab6   :  { %v1883_v24 = vpop.xlane.xlu0 %1882  ;;  %v1831_v25 = vsel %vm504_vm5, %v3651_v23, 0.0 }
 0xab7   :  { %v1884_v26 = vsub.f32 %v1877_v57, %v1883_v24  ;;  %1832 = vadd.xlane.f32.xlu2 %v1831_v25 }
 0xab9   :  { %v4281_v27 = vpop.eup %3652  ;;  %v1885_v28 = vmul.f32 1.442695, %v1884_v26 }
 0xaba   :  { %v3655_v31 = vpop.eup %3654  ;;  %v1954_v32 = vsel %vm504_vm5, %v4281_v27, 0.0 }
 0xabb   :  { %v1716_v34 = vmul.f32 %v3655_v31, %v3647_v55  ;;  %3656 = vpow2.f32 %v1885_v28  ;;  %1955 = vadd.xlane.f32.xlu0 %v1954_v32 }
 0xabd   :  { %v1717_v29 = vpack.c.bf16 %v1716_v34, %v1716_v34 }
 0xabe   :  { %v2069_v46 = vpop.xlane.xlu0 %2068 }
 0xabf   :  { %3182 = vmatmul.msk.bf16.vlgmr.msra.gmra.mxu1 %vm504_vm5, %v1717_v29  ;;  %v2070_v47 = vsub.f32 %v4268_v63, %v2069_v46 }
 0xac1   :  { %v4286_v36 = vpop.eup %3656  ;;  %v2071_v49 = vmul.f32 1.442695, %v2070_v47 }
 0xac2   :  { %v1887_v37 = vsel %vm504_vm5, %v4286_v36, 0.0  ;;  %v2010_v42 = vpop.xlane.xlu1 %2009 }
 0xac3   :  { %1888 = vadd.xlane.f32.xlu0 %v1887_v37  ;;  %v2011_v43 = vsub.f32 %v2004_v1, %v2010_v42  ;;  %v1964_v1 = vsel %vm520_vm4, %v1686_v39, 0 }
 0xac5   :  { %v2012_v44 = vmul.f32 1.442695, %v2011_v43 }
 0xac7   :  { %3658 = vpow2.f32 %v2012_v44 }
 0xac8   :  { %1781 = vrot.lane.b32.xlu1 %v1780_v30, %s3906_s22  ;;  %3660 = vpow2.f32 %v2071_v49 }
 0xacd   :  { %v3659_v14 = vpop.eup %3658 }
 0xace   :  { %v2014_v50 = vsel %vm504_vm5, %v3659_v14, 0.0  ;;  %v4298_v51 = vpop.eup %3660 }
 0xacf   :  { %1837 = vrot.lane.b32.xlu2 %v1780_v30, %s3895_s26  ;;  %v2073_v52 = vsel %vm504_vm5, %v4298_v51, 0.0 }
 0xad1   :  { %v1894_v57 = vpop.permute.xlu0 %1893 }
 0xad2   :  { %v2125_v48 = vpop.xlane.xlu2 %2124 }
 0xad3   :  { %v2126_v60 = vsub.f32 %v2119_v8, %v2125_v48  ;;  %v1899_v8 = vsel %vm520_vm4, %v1894_v57, 0  ;;  %v3496_v57 = vld [vmem:[#allocation7 + $0x68] sm:$0xff] }
 0xad5   :  { %v2127_v45 = vmul.f32 1.442695, %v2126_v60 }
 0xad7   :  { %2023 = vrot.lane.b32.xlu2 %v2022_v41, %s3906_s22  ;;  %2135 = vrot.lane.b32.xlu0 %v2022_v41, %s3905_s2  ;;  %3662 = vpow2.f32 %v2127_v45 }
 0xadd   :  { %v3663_v10 = vpop.eup %3662 }
 0xade   :  { %v2129_v56 = vsel %vm504_vm5, %v3663_v10, 0.0 }
 0xaf2   :  { %2015 = vadd.xlane.f32.xlu1 %v2014_v50 }
 0xafa   :  { %2074 = vadd.xlane.f32.xlu1 %v2073_v52 }
 0xb00   :  { %2130 = vadd.xlane.f32.xlu2 %v2129_v56  ;;  %v3498_v56 = vld [vmem:[#allocation7 + $0x78] sm:$0xff] }
 0xb01   :  { %2242 = vmatpush.bf16.msra.mxu0 %v3498_v56  ;;  %v3259_v56 = vld [vmem:[#allocation10 + $0xb0] sm:$0xf] }
 0xb13   :  { %2079 = vrot.lane.b32.xlu1 %v2022_v41, %s3895_s26 }
 0xb22   :  { %v1774_v58 = vpop.xlane.xlu1 %1773 }
 0xb2a   :  { %v1833_v55 = vpop.xlane.xlu2 %1832 }
 0xb2b   :  { %3664 = vrcp.f32 %v1833_v55  ;;  %v3497_v55 = vld [vmem:[#allocation7 + $0x70] sm:$0xff] }
 0xb2c   :  { %3666 = vrcp.f32 %v1774_v58  ;;  %2243 = vmatpush.bf16.msra.mxu0 %v3497_v55  ;;  %v3495_v58 = vld [vmem:[#allocation7 + $0x60] sm:$0xff]  ;;  %v3506_v55 = vld [vmem:[#allocation10 + $0xb4] sm:$0xf0] }
 0xb2e   :  { %v1956_v63 = vpop.xlane.xlu0 %1955 }
 0xb2f   :  { %3668 = vrcp.f32 %v1956_v63  ;;  %v3491_v63 = vld [vmem:[#allocation7 + $0x40] sm:$0xff] }
 0xb30   :  { %2244 = vmatpush.bf16.msra.mxu0 %v3496_v57  ;;  %v3505_v57 = vld [vmem:[#allocation10 + $0xb4] sm:$0xf] }
 0xb31   :  { %v3665_v59 = vpop.eup %3664 }
 0xb32   :  { %v1835_v61 = vmul.f32 %v3665_v59, %v3651_v23  ;;  %v1838_v62 = vpop.permute.xlu2 %1837  ;;  %v3667_v3 = vpop.eup %3666  ;;  %v3494_v59 = vld [vmem:[#allocation7 + $0x58] sm:$0xff] }
 0xb33   :  { %v1843_v0 = vsel %vm520_vm4, %v1838_v62, 0  ;;  %v1776_v5 = vmul.f32 %v3667_v3, %v4276_v17  ;;  %v3492_v62 = vld [vmem:[#allocation7 + $0x48] sm:$0xff] }
 0xb34   :  { %v1836_v2 = vpack.c.bf16 %v1835_v61, %v1835_v61  ;;  %1852 = vmatpush.bf16.msrb.mxu1 %v1843_v0  ;;  %2245 = vmatpush.bf16.msra.mxu0 %v3495_v58  ;;  %v3493_v61 = vld [vmem:[#allocation7 + $0x50] sm:$0xff]  ;;  %v3260_v58 = vor.u32 %v3506_v55, %v3259_v56  ;;  %v3526_v55 = vld [vmem:[#allocation11 + $0xd8] sm:$0xff] }
 0xb35   :  { %v1777_v13 = vpack.c.bf16 %v1776_v5, %v1776_v5  ;;  %v3669_v35 = vpop.eup %3668  ;;  %v3517_v56 = vld [vmem:[#allocation11 + $0x90] sm:$0xff] }
 0xb36   :  { %v1889_v33 = vpop.xlane.xlu0 %1888  ;;  %v1958_v16 = vmul.f32 %v3669_v35, %v4281_v27 }
 0xb37   :  { %3186 = vmatmul.msk.bf16.vlgmr.msrb.gmra.mxu1 %vm504_vm5, %v1836_v2  ;;  %3670 = vrcp.f32 %v1889_v33 }
 0xb38   :  { %1973 = vmatpush.bf16.msra.mxu1 %v1964_v1  ;;  %v1959_v18 = vpack.c.bf16 %v1958_v16, %v1958_v16  ;;  %2246 = vmatpush.bf16.msra.mxu0 %v3494_v59  ;;  %v3261_v59 = vld [vmem:[#allocation10 + $0xb8] sm:$0xf0] }
 0xb3a   :  { %v1782_v7 = vpop.permute.xlu1 %1781  ;;  %v2024_v11 = vpop.permute.xlu2 %2023 }
 0xb3b   :  { %v1787_v30 = vsel %vm520_vm4, %v1782_v7, 0  ;;  %v2029_v15 = vsel %vm520_vm4, %v2024_v11, 0 }
 0xb3c   :  { %v4310_v12 = vpop.f32.mrf.mxu1  ;;  %1796 = vmatpush.bf16.msra.mxu3 %v1787_v30  ;;  %2247 = vmatpush.bf16.msra.mxu0 %v3493_v61  ;;  %v3264_v61 = vor.u32 %v3505_v57, %v3261_v59  ;;  %v3525_v57 = vld [vmem:[#allocation11 + $0xd0] sm:$0xff]  ;;  %v3524_v59 = vld [vmem:[#allocation11 + $0xc8] sm:$0xff] }
 0xb3d   :  { %v3671_v19 = vpop.eup %3670 }
 0xb3e   :  { %v1891_v6 = vmul.f32 %v3671_v19, %v4286_v36  ;;  %v3597_v19 = vld [vmem:[%s4387_s6 + $0x1] ss:$0 sm:$0xff] }
 0xb3f   :  { %3184 = vmatmul.msk.bf16.vlgmr.msra.gmra.mxu3 %vm504_vm5, %v1777_v13 }
 0xb40   :  { %1908 = vmatpush.bf16.msrb.mxu3 %v1899_v8  ;;  %v1892_v21 = vpack.c.bf16 %v1891_v6, %v1891_v6  ;;  %2248 = vmatpush.bf16.msra.mxu0 %v3492_v62  ;;  %v3251_v62 = vld [vmem:[#allocation10 + $0xa0] sm:$0xf] }
 0xb44   :  { %2038 = vmatpush.bf16.msra.mxu3 %v2029_v15  ;;  %v1735_v17 = vpop.f32.mrf.mxu1  ;;  %2249 = vmatpush.bf16.msra.mxu0 %v3491_v63  ;;  %v3504_v63 = vld [vmem:[#allocation10 + $0xa4] sm:$0xf0] }
 0xb47   :  { %3190 = vmatmul.msk.bf16.vlgmr.msra.gmra.mxu1 %vm504_vm5, %v1959_v18 }
 0xb49   :  { %v2136_v20 = vpop.permute.xlu0 %2135 }
 0xb4a   :  { %v2141_v22 = vsel %vm520_vm4, %v2136_v20, 0 }
 0xb4f   :  { %3188 = vmatmul.msk.bf16.vlgmr.msrb.gmra.mxu3 %vm504_vm5, %v1892_v21 }
 0xb50   :  { %2150 = vmatpush.bf16.msrb.mxu3 %v2141_v22 }
 0xb65   :  { %v2016_v23 = vpop.xlane.xlu1 %2015 }
 0xb66   :  { %3672 = vrcp.f32 %v2016_v23 }
 0xb6c   :  { %v3673_v24 = vpop.eup %3672 }
 0xb6d   :  { %v2018_v25 = vmul.f32 %v3673_v24, %v3659_v14  ;;  %v2075_v28 = vpop.xlane.xlu1 %2074 }
 0xb6f   :  { %v2019_v26 = vpack.c.bf16 %v2018_v25, %v2018_v25 }
 0xb71   :  { %3192 = vmatmul.msk.bf16.vlgmr.msra.gmra.mxu3 %vm504_vm5, %v2019_v26 }
 0xb73   :  { %v2131_v27 = vpop.xlane.xlu2 %2130 }
 0xb74   :  { %3674 = vrcp.f32 %v2131_v27 }
 0xb75   :  { %3676 = vrcp.f32 %v2075_v28 }
 0xb7a   :  { %v3675_v31 = vpop.eup %3674 }
 0xb7b   :  { %v2133_v32 = vmul.f32 %v3675_v31, %v3663_v10  ;;  %v3677_v29 = vpop.eup %3676 }
 0xb7c   :  { %v2077_v36 = vmul.f32 %v3677_v29, %v4298_v51  ;;  %v3513_v29 = vld [vmem:[#allocation10 + $0xf4] sm:$0xf] }
 0xb7d   :  { %v2134_v34 = vpack.c.bf16 %v2133_v32, %v2133_v32 }
 0xb7e   :  { %v2078_v9 = vpack.c.bf16 %v2077_v36, %v2077_v36 }
 0xb81   :  { %3196 = vmatmul.msk.bf16.vlgmr.msrb.gmra.mxu3 %vm504_vm5, %v2134_v34  ;;  %v3514_v34 = vld [vmem:[#allocation10 + $0xf4] sm:$0xf0] }
 0xb85   :  { %v2080_v37 = vpop.permute.xlu1 %2079 }
 0xb86   :  { %v2085_v38 = vsel %vm520_vm4, %v2080_v37, 0  ;;  %v3293_v37 = vld [vmem:[#allocation10 + $0xf8] sm:$0xf0] }
 0xb87   :  { %2094 = vmatpush.bf16.msrb.mxu1 %v2085_v38  ;;  %v3296_v38 = vor.u32 %v3513_v29, %v3293_v37 }
 0xb89   :  { %2431 = vmatpush.bf16.msra.mxu2 %v3296_v38 }
 0xb8a   :  { %3194 = vmatmul.msk.bf16.vlgmr.msrb.gmra.mxu1 %vm504_vm5, %v2078_v9  ;;  %v3283_v9 = vld [vmem:[#allocation10 + $0xe0] sm:$0xf] }
 0xbb4   :  { %v1854_v39 = vpop.f32.mrf.mxu1 }
 0xbbc   :  { %v1856_v40 = vpop.f32.mrf.mxu1 }
 0xbbd   :  { %v3511_v40 = vld [vmem:[#allocation10 + $0xe4] sm:$0xf] }
 0xbc2   :  { %v1798_v41 = vpop.f32.mrf.mxu3 }
 0xbc4   :  { %v1975_v42 = vpop.f32.mrf.mxu1 }
 0xbca   :  { %v1800_v43 = vpop.f32.mrf.mxu3 }
 0xbcc   :  { %v1977_v44 = vpop.f32.mrf.mxu1 }
 0xbcd   :  { %v3275_v44 = vld [vmem:[#allocation10 + $0xd0] sm:$0xf] }
 0xbd2   :  { %v1910_v46 = vpop.f32.mrf.mxu3 }
 0xbda   :  { %v1912_v47 = vpop.f32.mrf.mxu3 }
 0xbdb   :  { %v3509_v47 = vld [vmem:[#allocation10 + $0xd4] sm:$0xf] }
 0xbf4   :  { %v2040_v48 = vpop.f32.mrf.mxu3 }
 0xbf5   :  { %v3576_v49 = vpack.i.bf16 %v2040_v48, %v1798_v41 }
 0xbf7   :  { %3577 = vrot.lane.b32.xlu2 %v3576_v49, %s3905_s2  ;;  %v3277_v49 = vld [vmem:[#allocation10 + $0xd8] sm:$0xf0] }
 0xbfc   :  { %v2042_v14 = vpop.f32.mrf.mxu3 }
 0xbfd   :  { %v3280_v14 = vor.u32 %v3509_v47, %v3277_v49 }
 0xc04   :  { %v2152_v60 = vpop.f32.mrf.mxu3 }
 0xc05   :  { %v3586_v10 = vpack.i.bf16 %v2152_v60, %v1910_v46  ;;  %v3510_v46 = vld [vmem:[#allocation10 + $0xd4] sm:$0xf0]  ;;  %v3267_v60 = vld [vmem:[#allocation10 + $0xc0] sm:$0xf] }
 0xc06   :  { %v3276_v48 = vor.u32 %v3510_v46, %v3275_v44  ;;  %v3598_v46 = vld [vmem:[%s4388_s7 + $0x1] ss:$0 sm:$0xff] }
 0xc07   :  { %v2096_v50 = vpop.f32.mrf.mxu1 }
 0xc08   :  { %v3581_v45 = vpack.i.bf16 %v2096_v50, %v1854_v39  ;;  %v3512_v39 = vld [vmem:[#allocation10 + $0xe4] sm:$0xf0] }
 0xc09   :  { %v3284_v41 = vor.u32 %v3512_v39, %v3283_v9  ;;  %v3508_v50 = vld [vmem:[#allocation10 + $0xc4] sm:$0xf0] }
 0xc0a   :  { %3582 = vrot.lane.b32.xlu0 %v3581_v45, %s3895_s26  ;;  %v3507_v45 = vld [vmem:[#allocation10 + $0xc4] sm:$0xf] }
 0xc0c   :  { %v2154_v51 = vpop.f32.mrf.mxu3 }
 0xc0d   :  { %v3268_v51 = vor.u32 %v3508_v50, %v3267_v60  ;;  %v3599_v60 = vld [vmem:[%s4389_s8 + $0x1] ss:$0 sm:$0xff] }
 0xc0f   :  { %v2098_v52 = vpop.f32.mrf.mxu1 }
 0xc10   :  { %v3269_v52 = vld [vmem:[#allocation10 + $0xc8] sm:$0xf0] }
 0xc12   :  { %3587 = vrot.lane.b32.xlu0 %v3586_v10, %s3906_s22  ;;  %v3272_v10 = vor.u32 %v3507_v45, %v3269_v52 }
 0xc51   :  { %v3578_v1 = vpop.permute.xlu2 %3577 }
 0xc52   :  { %v3580_v2 = vunpack.i.h.bf16 %v3578_v1  ;;  %v3579_v3 = vunpack.i.l.bf16 %v3578_v1  ;;  %v3252_v1 = vor.u32 %v3504_v63, %v3251_v62  ;;  %v3232_v62 = vld [vmem:[%s4393_s12 + $0x2] sm:$0x3] }
 0xc54   :  { %v2168_v8 = vsel %vm484_vm3, %v1975_v42, %v3580_v2  ;;  %v1926_v11 = vsel %vm484_vm3, %v4310_v12, %v3579_v3  ;;  %v3285_v42 = vld [vmem:[#allocation10 + $0xe8] sm:$0xf0] }
 0xc55   :  { %v3288_v43 = vor.u32 %v3511_v40, %v3285_v42  ;;  %v3253_v2 = vld [vmem:[#allocation10 + $0xa8] sm:$0xf0] }
 0xc57   :  { %2432 = vmatpush.bf16.msra.mxu2 %v3288_v43 }
 0xc5b   :  { %2433 = vmatpush.bf16.msra.mxu2 %v3280_v14 }
 0xc5f   :  { %2434 = vmatpush.bf16.msra.mxu2 %v3272_v10  ;;  %v3527_v10 = vld [vmem:[#allocation11 + $0xe0] sm:$0xff] }
 0xc63   :  { %2435 = vmatpush.bf16.msra.mxu2 %v3264_v61  ;;  %v3523_v61 = vld [vmem:[#allocation11 + $0xc0] sm:$0xff] }
 0xc7c   :  { %v3583_v0 = vpop.permute.xlu0 %3582 }
 0xc7d   :  { %v3585_v5 = vunpack.i.h.bf16 %v3583_v0  ;;  %v3584_v7 = vunpack.i.l.bf16 %v3583_v0  ;;  %v3503_v0 = vld [vmem:[#allocation10 + $0xa4] sm:$0xf] }
 0xc7e   :  { %v3256_v3 = vor.u32 %v3503_v0, %v3253_v2  ;;  %v2333_v0 = vperm.slane %v3232_v62, 0 }
 0xc7f   :  { %v2169_v35 = vsel %vm727_vm6, %v2168_v8, %v3585_v5  ;;  %v1927_v15 = vsel %vm727_vm6, %v1926_v11, %v3584_v7  ;;  %v3243_v5 = vld [vmem:[#allocation10 + $0x90] sm:$0xf]  ;;  %v3502_v7 = vld [vmem:[#allocation10 + $0x94] sm:$0xf0]  ;;  %v3245_v11 = vld [vmem:[#allocation10 + $0x98] sm:$0xf0] }
 0xc80   :  { %2436 = vmatpush.bf16.msra.mxu2 %v3256_v3  ;;  %v3244_v8 = vor.u32 %v3502_v7, %v3243_v5  ;;  %v2334_v5 = vperm.slane %v3232_v62, 1 }
 0xc84   :  { %v3588_v30 = vpop.permute.xlu0 %3587 }
 0xc85   :  { %v3590_v13 = vunpack.i.h.bf16 %v3588_v30  ;;  %v3589_v33 = vunpack.i.l.bf16 %v3588_v30  ;;  %v3501_v30 = vld [vmem:[#allocation10 + $0x94] sm:$0xf] }
 0xc87   :  { %v1928_v16 = vsel %vm729_vm7, %v1927_v15, %v3589_v33  ;;  %v2170_v17 = vsel %vm729_vm7, %v2169_v35, %v3590_v13  ;;  %v3235_v13 = vld [vmem:[#allocation10 + $0x80] sm:$0xf]  ;;  %v3500_v33 = vld [vmem:[#allocation10 + $0x84] sm:$0xf0]  ;;  %v3248_v15 = vor.u32 %v3501_v30, %v3245_v11 }
 0xc88   :  { %v2171_v18 = vpack.c.bf16 %v2170_v17, %v1928_v16  ;;  %v3499_v16 = vld [vmem:[#allocation10 + $0x84] sm:$0xf]  ;;  %v3237_v17 = vld [vmem:[#allocation10 + $0x88] sm:$0xf0] }
 0xc89   :  { %2437 = vmatpush.bf16.msra.mxu2 %v3248_v15 }
 0xc8a   :  { %2250 = vmatmul.bf16.vlgmr.msra.gmra.mxu0 %v2171_v18 }
 0xd07   :  { %v2251_v6 = vpop.f32.mrf.mxu0 }
 0xd08   :  { %v2252_v20 = vadd.f32 %v3597_v19, %v2251_v6  ;;  %v3240_v6 = vor.u32 %v3499_v16, %v3237_v17 }
 0xd0a   :  { %v2256_v12 = vadd.f32 %v2252_v20, %v4214_v53  ;;  %2438 = vmatpush.bf16.msra.mxu2 %v3240_v6 }
 0xd0c   :  { %2262 = vadd.xlane.f32.xlu1 %v2256_v12 }
 0xd0f   :  { %v2253_v21 = vpop.f32.mrf.mxu0 }
 0xd10   :  { %v2254_v22 = vadd.f32 %v3597_v19, %v2253_v21  ;;  %v3236_v19 = vor.u32 %v3500_v33, %v3235_v13  ;;  %v3530_v21 = vld [vmem:[#allocation11 + $0xf8] sm:$0xff] }
 0xd11   :  { %2599 = vmatpush.bf16.msrb.mxu0 %v3530_v21 }
 0xd12   :  { %v2257_v23 = vadd.f32 %v2254_v22, %v4216_v54  ;;  %v3291_v54 = vld [vmem:[#allocation10 + $0xf0] sm:$0xf] }
 0xd13   :  { %v3292_v36 = vor.u32 %v3514_v34, %v3291_v54  ;;  %v3528_v54 = vld [vmem:[#allocation11 + $0xe8] sm:$0xff] }
 0xd14   :  { %2264 = vadd.xlane.f32.xlu2 %v2257_v23 }
 0xd15   :  { %2417 = vmatpush.bf16.msra.mxu1 %v3292_v36  ;;  %v3519_v36 = vld [vmem:[#allocation11 + $0xa0] sm:$0xff] }
 0xd19   :  { %2418 = vmatpush.bf16.msra.mxu1 %v3284_v41 }
 0xd1d   :  { %2419 = vmatpush.bf16.msra.mxu1 %v3276_v48 }
 0xd21   :  { %2420 = vmatpush.bf16.msra.mxu1 %v3268_v51 }
 0xd25   :  { %2421 = vmatpush.bf16.msra.mxu1 %v3260_v58  ;;  %v3515_v58 = vld [vmem:[#allocation11 + $0x80] sm:$0xff] }
 0xd29   :  { %2422 = vmatpush.bf16.msra.mxu1 %v3252_v1 }
 0xd2d   :  { %2423 = vmatpush.bf16.msra.mxu1 %v3244_v8 }
 0xd31   :  { %2424 = vmatpush.bf16.msra.mxu1 %v3236_v19 }
 0xd7f   :  { %v2263_v24 = vpop.xlane.xlu1 %2262 }
 0xd80   :  { %v2266_v25 = vmul.f32 %v2263_v24, %v4169_v4  ;;  %v3521_v24 = vld [vmem:[#allocation11 + $0xb0] sm:$0xff] }
 0xd82   :  { %v4340_v26 = vsub.f32 %v2256_v12, %v2266_v25  ;;  %v3522_v12 = vld [vmem:[#allocation11 + $0xb8] sm:$0xff]  ;;  %v3529_v25 = vld [vmem:[#allocation11 + $0xf0] sm:$0xff] }
 0xd83   :  { %2585 = vmatpush.bf16.msra.mxu3 %v3522_v12  ;;  %2600 = vmatpush.bf16.msrb.mxu0 %v3529_v25 }
 0xd84   :  { %v2270_v27 = vmul.f32 %v4340_v26, %v4340_v26 }
 0xd86   :  { %2272 = vadd.xlane.f32.xlu0 %v2270_v27 }
 0xd87   :  { %v2265_v28 = vpop.xlane.xlu2 %2264  ;;  %2586 = vmatpush.bf16.msra.mxu3 %v3521_v24  ;;  %2601 = vmatpush.bf16.msrb.mxu0 %v3528_v54 }
 0xd88   :  { %v2267_v31 = vmul.f32 %v2265_v28, %v4169_v4 }
 0xd8a   :  { %v4345_v32 = vsub.f32 %v2257_v23, %v2267_v31 }
 0xd8b   :  { %2602 = vmatpush.bf16.msrb.mxu0 %v3527_v10 }
 0xd8c   :  { %v2271_v53 = vmul.f32 %v4345_v32, %v4345_v32 }
 0xd8e   :  { %2274 = vadd.xlane.f32.xlu1 %v2271_v53  ;;  %v3520_v53 = vld [vmem:[#allocation11 + $0xa8] sm:$0xff] }
 0xd8f   :  { %2587 = vmatpush.bf16.msra.mxu3 %v3520_v53  ;;  %2603 = vmatpush.bf16.msrb.mxu0 %v3526_v55 }
 0xd93   :  { %2588 = vmatpush.bf16.msra.mxu3 %v3519_v36  ;;  %2604 = vmatpush.bf16.msrb.mxu0 %v3525_v57 }
 0xd97   :  { %2605 = vmatpush.bf16.msrb.mxu0 %v3524_v59 }
 0xd9b   :  { %2606 = vmatpush.bf16.msrb.mxu0 %v3523_v61 }
 0xdf9   :  { %v2273_v35 = vpop.xlane.xlu0 %2272 }
 0xdfa   :  { %v2276_v18 = vmul.f32 %v2273_v35, %v4169_v4 }
 0xdfc   :  { %v2278_v20 = vadd.f32 1e-05, %v2276_v18  ;;  %v3600_v18 = vld [vmem:[%s4395_s14 + $0x1] ss:$0 sm:$0xff] }
 0xdfe   :  { %3678 = vrsqrt.f32 %v2278_v20  ;;  %vm2286_vm4 = vweird.f32 %v2278_v20 }
 0xe01   :  { %v2275_v22 = vpop.xlane.xlu1 %2274 }
 0xe02   :  { %v2277_v23 = vmul.f32 %v2275_v22, %v4169_v4 }
 0xe04   :  { %v3679_v27 = vpop.eup %3678  ;;  %v2279_v28 = vadd.f32 1e-05, %v2277_v23 }
 0xe05   :  { %v2281_v31 = vmul.f32 %v3679_v27, %v2278_v20  ;;  %vm2287_vm3 = vweird.f32 %v3679_v27 }
 0xe06   :  { %3680 = vrsqrt.f32 %v2279_v28  ;;  %vm2288_vm5 = vmor %vm2286_vm4, %vm2287_vm3  ;;  %vm2296_vm7 = vweird.f32 %v2279_v28 }
 0xe07   :  { %v2282_v34 = vmul.f32 %v3679_v27, %v2281_v31 }
 0xe09   :  { %v2283_v29 = vmul.f32 0.5, %v2282_v34 }
 0xe0b   :  { %v2284_v37 = vsub.f32 1.5, %v2283_v29 }
 0xe0c   :  { %v3681_v38 = vpop.eup %3680 }
 0xe0d   :  { %v2285_v9 = vmul.f32 %v3679_v27, %v2284_v37  ;;  %v2291_v39 = vmul.f32 %v3681_v38, %v2279_v28  ;;  %vm2297_vm6 = vweird.f32 %v3681_v38 }
 0xe0e   :  { %vm2298_vm10 = vmor %vm2296_vm7, %vm2297_vm6 }
 0xe0f   :  { %v2292_v40 = vmul.f32 %v3681_v38, %v2291_v39  ;;  %v2289_v41 = vsel %vm2288_vm5, %v3679_v27, %v2285_v9  ;;  %v3537_v9 = vld [vmem:[#allocation13 + $0x30] sm:$0xff]  ;;  %v3536_v39 = vld [vmem:[#allocation13 + $0x28] sm:$0xff] }
 0xe10   :  { %v2300_v44 = vmul.f32 %v2289_v41, %v4340_v26  ;;  %v3518_v26 = vld [vmem:[#allocation11 + $0x98] sm:$0xff] }
 0xe11   :  { %v2293_v42 = vmul.f32 0.5, %v2292_v40  ;;  %2589 = vmatpush.bf16.msra.mxu3 %v3518_v26  ;;  %v3535_v40 = vld [vmem:[#allocation13 + $0x20] sm:$0xff]  ;;  %v3534_v41 = vld [vmem:[#allocation13 + $0x18] sm:$0xff] }
 0xe12   :  { %v2305_v14 = vmul.f32 %v3598_v46, %v2300_v44 }
 0xe13   :  { %v2294_v43 = vsub.f32 1.5, %v2293_v42  ;;  %v3533_v42 = vld [vmem:[#allocation13 + $0x10] sm:$0xff] }
 0xe14   :  { %v2310_v45 = vadd.f32 %v3599_v60, %v2305_v14 }
 0xe15   :  { %v2295_v47 = vmul.f32 %v3681_v38, %v2294_v43  ;;  %2590 = vmatpush.bf16.msra.mxu3 %v3517_v56  ;;  %v3532_v43 = vld [vmem:[#allocation13 + $0x8] sm:$0xff] }
 0xe17   :  { %v2299_v48 = vsel %vm2298_vm10, %v3681_v38, %v2295_v47  ;;  %v3538_v38 = vld [vmem:[#allocation13 + $0x38] sm:$0xff]  ;;  %v3531_v47 = vld [vmem:[#allocation13] sm:$0xff] }
 0xe18   :  { %v2301_v49 = vmul.f32 %v2299_v48, %v4345_v32  ;;  %v3516_v32 = vld [vmem:[#allocation11 + $0x88] sm:$0xff]  ;;  %2738 = vmatpush.bf16.msrb.mxu1 %v3538_v38 }
 0xe19   :  { %2591 = vmatpush.bf16.msra.mxu3 %v3516_v32 }
 0xe1a   :  { %v2306_v50 = vmul.f32 %v3598_v46, %v2301_v49 }
 0xe1c   :  { %v2311_v51 = vadd.f32 %v3599_v60, %v2306_v50  ;;  %2739 = vmatpush.bf16.msrb.mxu1 %v3537_v9 }
 0xe1d   :  { %2592 = vmatpush.bf16.msra.mxu3 %v3515_v58 }
 0xe1e   :  { %v2312_v52 = vpack.c.bf16 %v2311_v51, %v2310_v45 }
 0xe20   :  { %2425 = vmatmul.bf16.vlgmr.msra.gmra.mxu1 %v2312_v52  ;;  %2439 = vmatmul.bf16.vlgmr.msra.gmra.mxu2 %v2312_v52 }
 0xe21   :  { %2740 = vmatpush.bf16.msrb.mxu1 %v3536_v39 }
 0xe25   :  { %2741 = vmatpush.bf16.msrb.mxu1 %v3535_v40 }
 0xe29   :  { %2742 = vmatpush.bf16.msrb.mxu1 %v3534_v41 }
 0xe2d   :  { %2743 = vmatpush.bf16.msrb.mxu1 %v3533_v42 }
 0xe31   :  { %2744 = vmatpush.bf16.msrb.mxu1 %v3532_v43 }
 0xe35   :  { %2745 = vmatpush.bf16.msrb.mxu1 %v3531_v47 }
 0xe9d   :  { %v2426_v63 = vpop.f32.mrf.mxu1 }
 0xe9e   :  { %v2427_v2 = vadd.f32 %v2426_v63, %v2333_v0 }
 0xea0   :  { %v2445_v30 = vmax.f32 %v2427_v2, 0.0  ;;  %v3602_v2 = vld [vmem:[%s4391_s10 + $0x1] ss:$0 sm:$0xff] }
 0xea3   :  { %v2440_v1 = vpop.f32.mrf.mxu2 }
 0xea4   :  { %v2441_v11 = vadd.f32 %v2440_v1, %v2334_v5 }
 0xea5   :  { %v2428_v3 = vpop.f32.mrf.mxu1 }
 0xea6   :  { %v2429_v7 = vadd.f32 %v2428_v3, %v2333_v0  ;;  %v2446_v15 = vmax.f32 %v2441_v11, 0.0 }
 0xea8   :  { %v2447_v8 = vmax.f32 %v2429_v7, 0.0 }
 0xeaa   :  { %v2449_v13 = vpack.c.bf16 %v2447_v8, %v2445_v30  ;;  %v3603_v8 = vld [vmem:[%s4397_s16] ss:$0 sm:$0xff] }
 0xeab   :  { %v2442_v33 = vpop.f32.mrf.mxu2 }
 0xeac   :  { %v2443_v35 = vadd.f32 %v2442_v33, %v2334_v5  ;;  %2593 = vmatmul.bf16.vlgmr.msra.gmra.mxu3 %v2449_v13 }
 0xeae   :  { %v2448_v16 = vmax.f32 %v2443_v35, 0.0 }
 0xeb0   :  { %v2450_v17 = vpack.c.bf16 %v2448_v16, %v2446_v15 }
 0xeb2   :  { %2607 = vmatmul.bf16.vlgmr.msrb.gmra.mxu0 %v2450_v17 }
 0xf2f   :  { %v2594_v19 = vpop.f32.mrf.mxu3  ;;  %v2608_v6 = vpop.f32.mrf.mxu0 }
 0xf30   :  { %v2595_v20 = vadd.f32 %v3600_v18, %v2594_v19 }
 0xf32   :  { %v2609_v12 = vadd.f32 %v2608_v6, %v2595_v20 }
 0xf34   :  { %v2613_v21 = vadd.f32 %v2609_v12, %v2310_v45 }
 0xf36   :  { %2619 = vadd.xlane.f32.xlu2 %v2613_v21 }
 0xf37   :  { %v2596_v22 = vpop.f32.mrf.mxu3  ;;  %v2610_v24 = vpop.f32.mrf.mxu0 }
 0xf38   :  { %v2597_v23 = vadd.f32 %v3600_v18, %v2596_v22 }
 0xf3a   :  { %v2611_v25 = vadd.f32 %v2610_v24, %v2597_v23 }
 0xf3c   :  { %v2614_v27 = vadd.f32 %v2611_v25, %v2311_v51 }
 0xf3e   :  { %2621 = vadd.xlane.f32.xlu0 %v2614_v27 }
 0xfa9   :  { %v2620_v28 = vpop.xlane.xlu2 %2619 }
 0xfaa   :  { %v2623_v31 = vmul.f32 %v2620_v28, %v4169_v4 }
 0xfac   :  { %v2625_v53 = vsub.f32 %v2613_v21, %v2623_v31 }
 0xfae   :  { %v2627_v54 = vmul.f32 %v2625_v53, %v2625_v53 }
 0xfb0   :  { %2629 = vadd.xlane.f32.xlu1 %v2627_v54 }
 0xfb1   :  { %v2622_v34 = vpop.xlane.xlu0 %2621 }
 0xfb2   :  { %v2624_v29 = vmul.f32 %v2622_v34, %v4169_v4 }
 0xfb4   :  { %v2626_v36 = vsub.f32 %v2614_v27, %v2624_v29 }
 0xfb6   :  { %v2628_v37 = vmul.f32 %v2626_v36, %v2626_v36 }
 0xfb8   :  { %2631 = vadd.xlane.f32.xlu2 %v2628_v37 }
0x1023   :  { %v2630_v44 = vpop.xlane.xlu1 %2629 }
0x1024   :  { %v2633_v46 = vmul.f32 %v2630_v44, %v4169_v4 }
0x1026   :  { %v2635_v48 = vadd.f32 1e-05, %v2633_v46 }
0x1028   :  { %3682 = vrsqrt.f32 %v2635_v48  ;;  %vm2643_vm12 = vweird.f32 %v2635_v48 }
0x102b   :  { %v2632_v49 = vpop.xlane.xlu2 %2631 }
0x102c   :  { %v2634_v14 = vmul.f32 %v2632_v49, %v4169_v4  ;;  %v3601_v4 = vld [vmem:[#allocation8 + $0x1] ss:$0 sm:$0xff] }
0x102e   :  { %v3683_v60 = vpop.eup %3682  ;;  %v2636_v50 = vadd.f32 1e-05, %v2634_v14 }
0x102f   :  { %v2638_v45 = vmul.f32 %v3683_v60, %v2635_v48  ;;  %vm2644_vm11 = vweird.f32 %v3683_v60 }
0x1030   :  { %3684 = vrsqrt.f32 %v2636_v50  ;;  %vm2645_vm13 = vmor %vm2643_vm12, %vm2644_vm11  ;;  %vm2653_vm15 = vweird.f32 %v2636_v50 }
0x1031   :  { %v2639_v51 = vmul.f32 %v3683_v60, %v2638_v45 }
0x1033   :  { %v2640_v52 = vmul.f32 0.5, %v2639_v51 }
0x1035   :  { %v2641_v26 = vsub.f32 1.5, %v2640_v52 }
0x1036   :  { %v3685_v10 = vpop.eup %3684 }
0x1037   :  { %v2642_v56 = vmul.f32 %v3683_v60, %v2641_v26  ;;  %v2648_v55 = vmul.f32 %v3685_v10, %v2636_v50  ;;  %vm2654_vm14 = vweird.f32 %v3685_v10 }
0x1038   :  { %vm2655_vm0 = vmor %vm2653_vm15, %vm2654_vm14 }
0x1039   :  { %v2649_v32 = vmul.f32 %v3685_v10, %v2648_v55  ;;  %v2646_v57 = vsel %vm2645_vm13, %v3683_v60, %v2642_v56 }
0x103a   :  { %v2657_v61 = vmul.f32 %v2646_v57, %v2625_v53 }
0x103b   :  { %v2650_v58 = vmul.f32 0.5, %v2649_v32 }
0x103c   :  { %v2662_v1 = vmul.f32 %v3601_v4, %v2657_v61 }
0x103d   :  { %v2651_v59 = vsub.f32 1.5, %v2650_v58 }
0x103e   :  { %v2667_v5 = vadd.f32 %v3602_v2, %v2662_v1 }
0x103f   :  { %v2652_v62 = vmul.f32 %v3685_v10, %v2651_v59 }
0x1041   :  { %v2656_v63 = vsel %vm2655_vm0, %v3685_v10, %v2652_v62 }
0x1042   :  { %v2658_v0 = vmul.f32 %v2656_v63, %v2626_v36 }
0x1044   :  { %v2663_v3 = vmul.f32 %v3601_v4, %v2658_v0 }
0x1046   :  { %v2668_v7 = vadd.f32 %v3602_v2, %v2663_v3 }
0x1048   :  { %v2669_v30 = vpack.c.bf16 %v2668_v7, %v2667_v5 }
0x104a   :  { %2746 = vmatmul.bf16.vlgmr.msrb.gmra.mxu1 %v2669_v30 }
0x10c7   :  { %v2747_v11 = vpop.f32.mrf.mxu1 }
0x10c8   :  { %v2748_v13 = vadd.f32 %v3603_v8, %v2747_v11 }
0x10ca   :  { %2752 = vst [vmem:[#allocation14] sm:$0xff] %v2748_v13 }
0x10cf   :  { %v2749_v33 = vpop.f32.mrf.mxu1 }
0x10d0   :  { %v2750_v35 = vadd.f32 %v3603_v8, %v2749_v33 }
0x10d2   :  { %2753 = vst [vmem:[#allocation14 + $0x8] sm:$0xff] %v2750_v35 }
0x10d3   :  { %2766 = dma.vmem_to_hbm [thread:$0]  %s2759_s24, 256, %s2761_s11, [#allocation4], %s3900_s25, %s3900_s25, %s3901_s27  }
0x10d4   :  { %3886 = dma.done.wait [#allocation4], 256  }
0x10d5   :  { %3887 = vsyncadd [#allocation4], 4294967040 }
0x10d6   :  { %2771 = vsyncpa [#allocation3], 1 }
0x10d7   :  { %2772 = vsyncpa [#allocation6], 1 }
0x10d8   :  { %2773 = vsyncpa [#allocation9], 1 }
0x10d9   :  { %2774 = vsyncpa [#allocation12], 1 }
0x10da   :  { %2775 = vsyncpa [#allocation4], 1 }

</bundles_post_ra>
